<compile_context>
chip_gen: v5e
topology: v5e:2x2
jax: 0.10.0
libtpu: 0.0.40
codegen_flags: <defaults>
</compile_context>

<pallas_src>
import functools

import numpy as np

import jax
import jax.numpy as jnp
from jax.experimental import pallas as pl
from jax.experimental.pallas import tpu as pltpu


# ----------------------------------------------------------------------------
# One-time constants: block one-hot expander E (n_out -> n_out*d_out) and E^T.
# ----------------------------------------------------------------------------
@functools.lru_cache(maxsize=None)
def _expander(n_out, d_out):
    e = np.kron(np.eye(n_out, dtype=np.float32), np.ones((1, d_out), np.float32))
    return jnp.asarray(e), jnp.asarray(e.T)


# ----------------------------------------------------------------------------
# EM routing iterations on a batch tile (pure function traced into the kernel).
#   f_a  : [TB, n_inp]      input-capsule activations (sigmoid of a_in)
#   V    : [TB, n_inp, K]   votes, K = n_out * d_out (lane-dense)
#   bubi : beta_use + beta_ign, [1, n_out] (shared) or [n_inp, n_out] (per-input)
#   bi   : beta_ign, same shape as bubi
#   E : [n_out, K], Et : [K, n_out]
# ----------------------------------------------------------------------------
def _em_routing(f_a, V, bubi, bi, E, Et, *, n_out, n_iters, eps):
    TB, n_inp, K = V.shape
    f_a3 = f_a[:, :, None]                                        # [TB, n_inp, 1]
    shared_beta = bubi.shape[0] == 1

    # Loop-invariant pieces of the M-step activation update (hoisted: JAX does
    # not CSE broadcast_in_dim, so broadcasts must not live inside the loop).
    if shared_beta:
        fa_bi = jnp.sum(f_a, axis=1, keepdims=True) * bi          # [TB, n_out]
        bubi_b = None
    else:
        fa_bi = jnp.dot(f_a, bi, preferred_element_type=jnp.float32)  # [TB, n_out]
        bubi_b = bubi[None]                                        # [1, n_inp, n_out]

    a_out = mu_flat = sig2_flat = V_less_mu2 = None
    for it in range(n_iters):
        # ---- E-step ----
        if it == 0:
            R = jnp.full((TB, n_inp, n_out), 1.0 / n_out, dtype=jnp.float32)
        else:
            t1 = (V_less_mu2 * (0.5 / sig2_flat)).reshape(TB * n_inp, K)
            term1 = jnp.dot(t1, Et, preferred_element_type=jnp.float32)
            term1 = term1.reshape(TB, n_inp, n_out)
            term2 = jnp.dot(0.5 * jnp.log(sig2_flat[:, 0, :]), Et,
                            preferred_element_type=jnp.float32)       # [TB, n_out]
            logits = (jax.nn.log_sigmoid(a_out) - term2)[:, None, :] - term1
            m = jnp.max(logits, axis=-1, keepdims=True)
            ex = jnp.exp(logits - m)
            R = ex * pl.reciprocal(jnp.sum(ex, axis=-1, keepdims=True), approx=True)

        # ---- D-step ----
        D_use = f_a3 * R                                            # [TB, n_inp, n_out]
        sum_use = jnp.sum(D_use, axis=1)                            # [TB, n_out]

        # ---- M-step ----
        if shared_beta:
            a_out = sum_use * bubi - fa_bi                          # [TB, n_out]
        else:
            a_out = jnp.sum(D_use * bubi_b, axis=1) - fa_bi
        over = pl.reciprocal(sum_use + eps, approx=True)            # [TB, n_out]
        over_flat = jnp.dot(over, E, preferred_element_type=jnp.float32)[:, None, :]
        D_use_flat = jnp.dot(D_use.reshape(TB * n_inp, n_out), E,
                             preferred_element_type=jnp.float32).reshape(TB, n_inp, K)
        mu_flat = jnp.sum(D_use_flat * V, axis=1, keepdims=True) * over_flat
        V_less_mu2 = (V - mu_flat) ** 2
        sig2_flat = (jnp.sum(D_use_flat * V_less_mu2, axis=1, keepdims=True)
                     * over_flat + eps)

    return a_out, mu_flat[:, 0, :], sig2_flat[:, 0, :]


# ----------------------------------------------------------------------------
# Fused kernel: detect_parts + routing layer 1 + routing layer 2 per batch tile.
# ----------------------------------------------------------------------------
def fused_forward_kernel(a_ref, x_ref, lw_ref, dwb_ref, lngb_ref,
                         w1_ref, b1_ref, beta1_ref, e1_ref, e1t_ref,
                         w2b_ref, b2_ref, beta2_ref, e2_ref, e2t_ref,
                         out_ref,
                         *, n_iters, n_parts, n_classes, d_cap, eps):
    TB, n_inp1 = a_ref.shape
    d_inp = w1_ref.shape[0]
    K1 = n_parts * d_cap
    K2 = n_classes * d_cap

    # ---- detect_parts: Linear (bf16 MXU, f32 acc) + folded depth-emb bias ----
    y = jnp.dot(x_ref[...], lw_ref[...], preferred_element_type=jnp.float32)
    y = (y.reshape(TB, n_inp1, d_inp) + dwb_ref[...][None]).reshape(TB * n_inp1, d_inp)
    y = y * (0.5 * (jnp.tanh(0.5 * y) + 1.0))                       # Swish: x*sigmoid(x)
    mean = jnp.mean(y, axis=-1, keepdims=True)
    var = jnp.mean((y - mean) ** 2, axis=-1, keepdims=True)
    mu0 = ((y - mean) * jax.lax.rsqrt(var + 1e-5)
           * lngb_ref[0:1, :] + lngb_ref[1:2, :])                   # LayerNorm

    # ---- routing layer 1: shared vote weights, one bf16 MXU matmul ----
    V1 = (jnp.dot(mu0.astype(jnp.bfloat16), w1_ref[...],
                  preferred_element_type=jnp.float32)
          + b1_ref[...]).reshape(TB, n_inp1, K1)
    # sigmoid via tanh (EUP); a is pre-clamped to +/-30 so this is exactly 1.0/0.0
    f_a1 = 0.5 * (jnp.tanh(0.5 * a_ref[...]) + 1.0)                 # [TB, n_inp1]
    a1, mu1, _ = _em_routing(f_a1, V1,
                             beta1_ref[0:1, :], beta1_ref[1:2, :],
                             e1_ref[...], e1t_ref[...],
                             n_out=n_parts, n_iters=n_iters, eps=eps)

    # ---- routing layer 2: per-input weights as one block-diagonal bf16 matmul ----
    V2 = jnp.dot(mu1.astype(jnp.bfloat16), w2b_ref[...],
                 preferred_element_type=jnp.float32)
    V2 = V2.reshape(TB, n_parts, K2) + b2_ref[...][None]
    f_a2 = 0.5 * (jnp.tanh(0.5 * a1) + 1.0)                         # [TB, n_parts]
    a2, mu2, sig2_2 = _em_routing(f_a2, V2,
                                  beta2_ref[:, :n_classes], beta2_ref[:, n_classes:],
                                  e2_ref[...], e2t_ref[...],
                                  n_out=n_classes, n_iters=n_iters, eps=eps)

    # ---- single lane-dense packed store: [a2 | mu2 | sig2 | pad] ----
    pieces = [a2, mu2, sig2_2]
    pad_w = out_ref.shape[1] - (n_classes + 2 * K2)
    if pad_w:
        pieces.append(jnp.zeros((TB, pad_w), jnp.float32))
    out_ref[...] = jnp.concatenate(pieces, axis=-1)


# ----------------------------------------------------------------------------
# One-time precompute of kernel-facing constants (hoisted out of the forward).
# ----------------------------------------------------------------------------
def precompute_kernel_params(params, n):
    d_depth, d_emb = params["depth_emb"].shape
    d_inp = params["lin_w"].shape[0]
    n_parts, d_cap = params["W1"].shape[1], params["W1"].shape[3]
    n_classes = params["W2"].shape[1]
    K1, K2 = n_parts * d_cap, n_classes * d_cap

    lw_t = jnp.transpose(params["lin_w"])                            # [d_emb, d_inp]
    # depth emb folded into a post-matmul bias: (x+de)@W + b = x@W + (de@W + b)
    de_tile = jnp.tile(params["depth_emb"], (n, 1))                  # [n*d_depth, d_emb]
    dwb = jnp.dot(de_tile, lw_t) + params["lin_b"].reshape(1, d_inp)  # [n_inp1, d_inp]

    # routing-2 per-input weights folded into a block-diagonal matrix:
    # V2[b, i, :] = mu1[b, i*d_cap:(i+1)*d_cap] @ W2[i]  via one [K1, n_parts*K2] matmul
    w2 = jnp.transpose(params["W2"], (0, 2, 1, 3)).reshape(n_parts, d_cap, K2)
    w2_blk = (jnp.eye(n_parts, dtype=jnp.float32)[:, None, :, None]
              * w2[:, :, None, :]).reshape(n_parts * d_cap, n_parts * K2)

    E1, E1t = _expander(n_parts, d_cap)
    E2, E2t = _expander(n_classes, d_cap)

    return {
        "dims": (d_depth, d_emb, d_inp, d_cap, n_parts, n_classes),
        "lw_t": lw_t.astype(jnp.bfloat16),                           # [d_emb, d_inp]
        "dwb": dwb,                                                  # [n_inp1, d_inp] f32
        "ln_gb": jnp.stack([params["ln_g"], params["ln_b"]], 0),     # [2, d_inp]
        "w1": jnp.transpose(params["W1"][0], (1, 0, 2))
                 .reshape(d_inp, K1).astype(jnp.bfloat16),           # [d_inp, K1]
        "b1": params["B1"].reshape(1, K1),
        "beta1": jnp.concatenate([params["bu1"] + params["bi1"],
                                  params["bi1"]], axis=0),           # [2, n_parts]
        "E1": E1, "E1t": E1t,
        "w2_blk": w2_blk.astype(jnp.bfloat16),                       # [K1, n_parts*K2]
        "b2": params["B2"].reshape(1, K2),
        "beta2": jnp.concatenate([params["bu2"] + params["bi2"],
                                  params["bi2"]], axis=1),           # [n_parts, 2*n_classes]
        "E2": E2, "E2t": E2t,
    }


# ----------------------------------------------------------------------------
# Forward pass wrapper: batch-tiled grid over one fused pallas_call.
# ----------------------------------------------------------------------------
def sst_classifier_forward(kp, mask, embs, *, n_iters=3, batch_tile=128):
    d_depth, d_emb, d_inp, d_cap, n_parts, n_classes = kp["dims"]
    Bsz, n = mask.shape
    n_inp1 = n * d_depth
    K1, K2 = n_parts * d_cap, n_classes * d_cap
    Wp = pl.cdiv(n_classes + 2 * K2, 128) * 128        # packed output lane width

    # activations from the padding mask: log(mask/(1-mask)), clamped to +/-30 so
    # sigmoid is exactly 1.0/0.0 in f32 without relying on inf propagation.
    a = jnp.clip(jnp.log(mask / (1.0 - mask)), -30.0, 30.0)
    a = jnp.broadcast_to(a[:, :, None], (Bsz, n, d_depth)).reshape(Bsz, n_inp1)
    # embs pre-flattened + pre-cast to bf16 (halves the biggest per-step DMA).
    x = embs.reshape(Bsz * n_inp1, d_emb).astype(jnp.bfloat16)

    # explicit batch padding to a multiple of the batch tile.
    # NOTE: on v7x keep Bp//TB >= 2 so ("parallel",) can use both TensorCores.
    TB = batch_tile if Bsz >= batch_tile else Bsz
    Bp = pl.cdiv(Bsz, TB) * TB
    if Bp != Bsz:
        a = jnp.pad(a, ((0, Bp - Bsz), (0, 0)))
        x = jnp.pad(x, ((0, (Bp - Bsz) * n_inp1), (0, 0)))

    kernel = functools.partial(fused_forward_kernel, n_iters=n_iters,
                               n_parts=n_parts, n_classes=n_classes,
                               d_cap=d_cap, eps=1e-5)

    packed = pl.pallas_call(
        kernel,
        out_shape=jax.ShapeDtypeStruct((Bp, Wp), jnp.float32),
        grid=(Bp // TB,),
        in_specs=[
            pl.BlockSpec((TB, n_inp1), lambda b: (b, 0)),                 # a (clamped)
            pl.BlockSpec((TB * n_inp1, d_emb), lambda b: (b, 0)),         # embs flat bf16
            pl.BlockSpec((d_emb, d_inp), lambda b: (0, 0)),               # linear W^T bf16
            pl.BlockSpec((n_inp1, d_inp), lambda b: (0, 0)),              # de@W + lin_b
            pl.BlockSpec((2, d_inp), lambda b: (0, 0)),                   # [LN gamma; beta]
            pl.BlockSpec((d_inp, K1), lambda b: (0, 0)),                  # W1 shared bf16
            pl.BlockSpec((1, K1), lambda b: (0, 0)),                      # B1
            pl.BlockSpec((2, n_parts), lambda b: (0, 0)),                 # [bu1+bi1; bi1]
            pl.BlockSpec((n_parts, K1), lambda b: (0, 0)),                # E1
            pl.BlockSpec((K1, n_parts), lambda b: (0, 0)),                # E1^T
            pl.BlockSpec((K1, n_parts * K2), lambda b: (0, 0)),           # W2 blockdiag bf16
            pl.BlockSpec((1, K2), lambda b: (0, 0)),                      # B2
            pl.BlockSpec((n_parts, 2 * n_classes), lambda b: (0, 0)),     # [bu2+bi2 | bi2]
            pl.BlockSpec((n_classes, K2), lambda b: (0, 0)),              # E2
            pl.BlockSpec((K2, n_classes), lambda b: (0, 0)),              # E2^T
        ],
        out_specs=pl.BlockSpec((TB, Wp), lambda b: (b, 0)),               # packed outputs
        compiler_params=pltpu.CompilerParams(
            dimension_semantics=("parallel",),
            vmem_limit_bytes=32 * 1024 * 1024),
    )(a, x, kp["lw_t"], kp["dwb"], kp["ln_gb"],
      kp["w1"], kp["b1"], kp["beta1"], kp["E1"], kp["E1t"],
      kp["w2_blk"], kp["b2"], kp["beta2"], kp["E2"], kp["E2t"])

    # unpack + match PyTorch output shapes: [B,n_classes], [B,n_classes,1,d_cap] x2
    a_out = packed[:Bsz, :n_classes]
    mu_out = packed[:Bsz, n_classes:n_classes + K2]
    sig2_out = packed[:Bsz, n_classes + K2:n_classes + 2 * K2]
    mu_out = mu_out.reshape(Bsz, n_classes, d_cap)[:, :, None, :]
    sig2_out = sig2_out.reshape(Bsz, n_classes, d_cap)[:, :, None, :]
    return a_out, mu_out, sig2_out


def make_params(key, d_depth, d_emb, d_inp, d_cap, n_parts, n_classes):
    ks = jax.random.split(key, 8)
    f32 = jnp.float32
    return {
        "depth_emb": jnp.zeros((d_depth, d_emb), f32),                     # zeros init
        "lin_w": jax.random.normal(ks[0], (d_inp, d_emb), f32) * jnp.sqrt(2.0 / d_emb),
        "lin_b": jnp.zeros((d_inp,), f32),
        "ln_g": jnp.ones((d_inp,), f32),
        "ln_b": jnp.zeros((d_inp,), f32),
        # routing 1 (variable n_inp -> W shared across input capsules)
        "W1": jax.random.normal(ks[1], (1, n_parts, d_inp, d_cap), f32) / d_inp,
        "B1": 0.1 * jax.random.normal(ks[2], (n_parts, 1, d_cap), f32),
        "bu1": 0.1 * jax.random.normal(ks[3], (1, n_parts), f32),
        "bi1": 0.1 * jax.random.normal(ks[4], (1, n_parts), f32),
        # routing 2 (fixed n_inp = n_parts, per-input W)
        "W2": jax.random.normal(ks[5], (n_parts, n_classes, d_cap, d_cap), f32) / d_cap,
        "B2": 0.1 * jax.random.normal(ks[6], (n_classes, 1, d_cap), f32),
        "bu2": 0.1 * jax.random.normal(ks[7], (n_parts, n_classes), f32),
        "bi2": jnp.zeros((n_parts, n_classes), f32),
    }


if __name__ == "__main__":
    d_depth, d_emb, d_inp, d_cap = 2, 16, 32, 8
    n_parts, n_classes = 16, 4
    B, n = 2, 8

    key = jax.random.PRNGKey(0)
    k_params, k_embs = jax.random.split(key)
    params = make_params(k_params, d_depth, d_emb, d_inp, d_cap, n_parts, n_classes)
    kp = precompute_kernel_params(params, n)

    embs = jax.random.normal(k_embs, (B, n, d_depth, d_emb), jnp.float32)
    mask = jnp.array([[1, 1, 1, 1, 1, 1, 0, 0],
                      [1, 1, 1, 0, 0, 0, 0, 0]], jnp.float32)

    a_out, mu_out, sig2_out = sst_classifier_forward(kp, mask, embs, n_iters=3)
    jax.block_until_ready((a_out, mu_out, sig2_out))

    assert a_out.shape == (B, n_classes)
    assert mu_out.shape == (B, n_classes, 1, d_cap)
    assert sig2_out.shape == (B, n_classes, 1, d_cap)
    assert bool(jnp.all(jnp.isfinite(a_out)))
    assert bool(jnp.all(jnp.isfinite(mu_out)))
    assert bool(jnp.all(jnp.isfinite(sig2_out)))
    assert bool(jnp.all(sig2_out > 0.0))
    print("KERNEL_OK")
</pallas_src>

<mosaic_0001>
module attributes {stable_mosaic.version = 11 : i64} {
  func.func @fused_forward_kernel(%arg0: i32, %arg1: memref<2x16xf32, #tpu.memory_space<vmem>>, %arg2: memref<32x16xbf16, #tpu.memory_space<vmem>>, %arg3: memref<16x32xbf16, #tpu.memory_space<vmem>>, %arg4: memref<16x32xf32, #tpu.memory_space<vmem>>, %arg5: memref<2x32xf32, #tpu.memory_space<vmem>>, %arg6: memref<32x128xbf16, #tpu.memory_space<vmem>>, %arg7: memref<1x128xf32, #tpu.memory_space<vmem>>, %arg8: memref<2x16xf32, #tpu.memory_space<vmem>>, %arg9: memref<16x128xf32, #tpu.memory_space<vmem>>, %arg10: memref<128x16xf32, #tpu.memory_space<vmem>>, %arg11: memref<128x512xbf16, #tpu.memory_space<vmem>>, %arg12: memref<1x32xf32, #tpu.memory_space<vmem>>, %arg13: memref<16x8xf32, #tpu.memory_space<vmem>>, %arg14: memref<4x32xf32, #tpu.memory_space<vmem>>, %arg15: memref<32x4xf32, #tpu.memory_space<vmem>>, %arg16: memref<2x128xf32, #tpu.memory_space<vmem>>) attributes {dimension_semantics = [#tpu.dimension_semantics<parallel>], iteration_bounds = array<i64: 1>, scalar_prefetch = 0 : i64, scratch_operands = 0 : i64, tpu.core_type = #tpu.core_type<tc>, window_params = [{transform_indices = @transform_0, window_bounds = array<i64: 2, 16>}, {transform_indices = @transform_1, window_bounds = array<i64: 32, 16>}, {pipeline_mode = #tpu.pipeline_mode<synchronous>, transform_indices = @transform_2, window_bounds = array<i64: 16, 32>}, {pipeline_mode = #tpu.pipeline_mode<synchronous>, transform_indices = @transform_3, window_bounds = array<i64: 16, 32>}, {pipeline_mode = #tpu.pipeline_mode<synchronous>, transform_indices = @transform_4, window_bounds = array<i64: 2, 32>}, {pipeline_mode = #tpu.pipeline_mode<synchronous>, transform_indices = @transform_5, window_bounds = array<i64: 32, 128>}, {pipeline_mode = #tpu.pipeline_mode<synchronous>, transform_indices = @transform_6, window_bounds = array<i64: 1, 128>}, {pipeline_mode = #tpu.pipeline_mode<synchronous>, transform_indices = @transform_7, window_bounds = array<i64: 2, 16>}, {pipeline_mode = #tpu.pipeline_mode<synchronous>, transform_indices = @transform_8, window_bounds = array<i64: 16, 128>}, {pipeline_mode = #tpu.pipeline_mode<synchronous>, transform_indices = @transform_9, window_bounds = array<i64: 128, 16>}, {pipeline_mode = #tpu.pipeline_mode<synchronous>, transform_indices = @transform_10, window_bounds = array<i64: 128, 512>}, {pipeline_mode = #tpu.pipeline_mode<synchronous>, transform_indices = @transform_11, window_bounds = array<i64: 1, 32>}, {pipeline_mode = #tpu.pipeline_mode<synchronous>, transform_indices = @transform_12, window_bounds = array<i64: 16, 8>}, {pipeline_mode = #tpu.pipeline_mode<synchronous>, transform_indices = @transform_13, window_bounds = array<i64: 4, 32>}, {pipeline_mode = #tpu.pipeline_mode<synchronous>, transform_indices = @transform_14, window_bounds = array<i64: 32, 4>}, {transform_indices = @transform_15, window_bounds = array<i64: 2, 128>}]} {
    %c0 = arith.constant 0 : index
    %c0_0 = arith.constant 0 : index
    %0 = vector.load %arg2[%c0, %c0_0] : memref<32x16xbf16, #tpu.memory_space<vmem>>, vector<32x16xbf16>
    %c0_1 = arith.constant 0 : index
    %c0_2 = arith.constant 0 : index
    %1 = vector.load %arg3[%c0_1, %c0_2] : memref<16x32xbf16, #tpu.memory_space<vmem>>, vector<16x32xbf16>
    %cst = arith.constant dense<0.000000e+00> : vector<32x32xf32>
    %2 = tpu.matmul %0, %1, %cst {dimension_numbers = #tpu.dot_dimension_numbers<[1], [0], [0], [1], [0, 0, 1, 1], [], []>} : vector<32x16xbf16>, vector<16x32xbf16>, vector<32x32xf32> -> vector<32x32xf32>
    %3 = vector.shape_cast %2 : vector<32x32xf32> to vector<2x16x32xf32>
    %c0_3 = arith.constant 0 : index
    %c0_4 = arith.constant 0 : index
    %4 = vector.load %arg4[%c0_3, %c0_4] : memref<16x32xf32, #tpu.memory_space<vmem>>, vector<16x32xf32>
    %5 = vector.shape_cast %4 : vector<16x32xf32> to vector<1x16x32xf32>
    %6 = vector.broadcast %5 : vector<1x16x32xf32> to vector<2x16x32xf32>
    %7 = arith.addf %3, %6 : vector<2x16x32xf32>
    %8 = vector.shape_cast %7 : vector<2x16x32xf32> to vector<32x32xf32>
    %cst_5 = arith.constant 5.000000e-01 : f32
    %9 = vector.broadcast %cst_5 : f32 to vector<32x32xf32>
    %10 = arith.mulf %9, %8 : vector<32x32xf32>
    %11 = math.tanh %10 : vector<32x32xf32>
    %cst_6 = arith.constant 1.000000e+00 : f32
    %12 = vector.broadcast %cst_6 : f32 to vector<32x32xf32>
    %13 = arith.addf %11, %12 : vector<32x32xf32>
    %cst_7 = arith.constant 5.000000e-01 : f32
    %14 = vector.broadcast %cst_7 : f32 to vector<32x32xf32>
    %15 = arith.mulf %14, %13 : vector<32x32xf32>
    %16 = arith.mulf %8, %15 : vector<32x32xf32>
    %cst_8 = arith.constant dense<0.000000e+00> : vector<32xf32>
    %17 = vector.multi_reduction <add>, %16, %cst_8 [1] : vector<32x32xf32> to vector<32xf32>
    %18 = vector.shape_cast %17 : vector<32xf32> to vector<32x1xf32>
    %cst_9 = arith.constant 3.200000e+01 : f32
    %19 = vector.broadcast %cst_9 : f32 to vector<32x1xf32>
    %20 = arith.divf %18, %19 : vector<32x1xf32>
    %21 = vector.broadcast %20 : vector<32x1xf32> to vector<32x32xf32>
    %22 = arith.subf %16, %21 : vector<32x32xf32>
    %23 = arith.mulf %22, %22 : vector<32x32xf32>
    %cst_10 = arith.constant dense<0.000000e+00> : vector<32xf32>
    %24 = vector.multi_reduction <add>, %23, %cst_10 [1] : vector<32x32xf32> to vector<32xf32>
    %25 = vector.shape_cast %24 : vector<32xf32> to vector<32x1xf32>
    %cst_11 = arith.constant 3.200000e+01 : f32
    %26 = vector.broadcast %cst_11 : f32 to vector<32x1xf32>
    %27 = arith.divf %25, %26 : vector<32x1xf32>
    %28 = vector.broadcast %20 : vector<32x1xf32> to vector<32x32xf32>
    %29 = arith.subf %16, %28 : vector<32x32xf32>
    %cst_12 = arith.constant 9.99999974E-6 : f32
    %30 = vector.broadcast %cst_12 : f32 to vector<32x1xf32>
    %31 = arith.addf %27, %30 : vector<32x1xf32>
    %32 = math.rsqrt %31 : vector<32x1xf32>
    %33 = vector.broadcast %32 : vector<32x1xf32> to vector<32x32xf32>
    %34 = arith.mulf %29, %33 : vector<32x32xf32>
    %c0_13 = arith.constant 0 : index
    %c0_14 = arith.constant 0 : index
    %35 = vector.load %arg5[%c0_13, %c0_14] : memref<2x32xf32, #tpu.memory_space<vmem>>, vector<1x32xf32>
    %36 = vector.broadcast %35 : vector<1x32xf32> to vector<32x32xf32>
    %37 = arith.mulf %34, %36 : vector<32x32xf32>
    %c1 = arith.constant 1 : index
    %c0_15 = arith.constant 0 : index
    %38 = vector.load %arg5[%c1, %c0_15] : memref<2x32xf32, #tpu.memory_space<vmem>>, vector<1x32xf32>
    %39 = vector.broadcast %38 : vector<1x32xf32> to vector<32x32xf32>
    %40 = arith.addf %37, %39 : vector<32x32xf32>
    %41 = arith.truncf %40 : vector<32x32xf32> to vector<32x32xbf16>
    %c0_16 = arith.constant 0 : index
    %c0_17 = arith.constant 0 : index
    %42 = vector.load %arg6[%c0_16, %c0_17] : memref<32x128xbf16, #tpu.memory_space<vmem>>, vector<32x128xbf16>
    %cst_18 = arith.constant dense<0.000000e+00> : vector<32x128xf32>
    %43 = tpu.matmul %41, %42, %cst_18 {dimension_numbers = #tpu.dot_dimension_numbers<[1], [0], [0], [1], [0, 0, 1, 1], [], []>} : vector<32x32xbf16>, vector<32x128xbf16>, vector<32x128xf32> -> vector<32x128xf32>
    %c0_19 = arith.constant 0 : index
    %c0_20 = arith.constant 0 : index
    %44 = vector.load %arg7[%c0_19, %c0_20] : memref<1x128xf32, #tpu.memory_space<vmem>>, vector<1x128xf32>
    %45 = vector.broadcast %44 : vector<1x128xf32> to vector<32x128xf32>
    %46 = arith.addf %43, %45 : vector<32x128xf32>
    %47 = vector.shape_cast %46 : vector<32x128xf32> to vector<2x16x128xf32>
    %c0_21 = arith.constant 0 : index
    %c0_22 = arith.constant 0 : index
    %48 = vector.load %arg1[%c0_21, %c0_22] : memref<2x16xf32, #tpu.memory_space<vmem>>, vector<2x16xf32>
    %cst_23 = arith.constant 5.000000e-01 : f32
    %49 = vector.broadcast %cst_23 : f32 to vector<2x16xf32>
    %50 = arith.mulf %49, %48 : vector<2x16xf32>
    %51 = math.tanh %50 : vector<2x16xf32>
    %cst_24 = arith.constant 1.000000e+00 : f32
    %52 = vector.broadcast %cst_24 : f32 to vector<2x16xf32>
    %53 = arith.addf %51, %52 : vector<2x16xf32>
    %cst_25 = arith.constant 5.000000e-01 : f32
    %54 = vector.broadcast %cst_25 : f32 to vector<2x16xf32>
    %55 = arith.mulf %54, %53 : vector<2x16xf32>
    %c0_26 = arith.constant 0 : index
    %c0_27 = arith.constant 0 : index
    %56 = vector.load %arg8[%c0_26, %c0_27] : memref<2x16xf32, #tpu.memory_space<vmem>>, vector<1x16xf32>
    %c1_28 = arith.constant 1 : index
    %c0_29 = arith.constant 0 : index
    %57 = vector.load %arg8[%c1_28, %c0_29] : memref<2x16xf32, #tpu.memory_space<vmem>>, vector<1x16xf32>
    %c0_30 = arith.constant 0 : index
    %c0_31 = arith.constant 0 : index
    %58 = vector.load %arg9[%c0_30, %c0_31] : memref<16x128xf32, #tpu.memory_space<vmem>>, vector<16x128xf32>
    %c0_32 = arith.constant 0 : index
    %c0_33 = arith.constant 0 : index
    %59 = vector.load %arg10[%c0_32, %c0_33] : memref<128x16xf32, #tpu.memory_space<vmem>>, vector<128x16xf32>
    %60 = vector.shape_cast %55 : vector<2x16xf32> to vector<2x16x1xf32>
    %cst_34 = arith.constant dense<0.000000e+00> : vector<2xf32>
    %61 = vector.multi_reduction <add>, %55, %cst_34 [1] : vector<2x16xf32> to vector<2xf32>
    %62 = vector.shape_cast %61 : vector<2xf32> to vector<2x1xf32>
    %63 = vector.broadcast %62 : vector<2x1xf32> to vector<2x16xf32>
    %64 = vector.broadcast %57 : vector<1x16xf32> to vector<2x16xf32>
    %65 = arith.mulf %63, %64 : vector<2x16xf32>
    %cst_35 = arith.constant 6.250000e-02 : f32
    %66 = vector.broadcast %cst_35 : f32 to vector<2x16x16xf32>
    %67 = vector.broadcast %60 : vector<2x16x1xf32> to vector<2x16x16xf32>
    %68 = arith.mulf %67, %66 : vector<2x16x16xf32>
    %cst_36 = arith.constant dense<0.000000e+00> : vector<2x16xf32>
    %69 = vector.multi_reduction <add>, %68, %cst_36 [1] : vector<2x16x16xf32> to vector<2x16xf32>
    %70 = vector.broadcast %56 : vector<1x16xf32> to vector<2x16xf32>
    %71 = arith.mulf %69, %70 : vector<2x16xf32>
    %72 = arith.subf %71, %65 : vector<2x16xf32>
    %cst_37 = arith.constant 9.99999974E-6 : f32
    %73 = vector.broadcast %cst_37 : f32 to vector<2x16xf32>
    %74 = arith.addf %69, %73 : vector<2x16xf32>
    %75 = tpu.reciprocal %74 {approx = true} : vector<2x16xf32> -> vector<2x16xf32>
    %cst_38 = arith.constant dense<0.000000e+00> : vector<2x128xf32>
    %76 = tpu.matmul %75, %58, %cst_38 {dimension_numbers = #tpu.dot_dimension_numbers<[1], [0], [0], [1], [0, 0, 1, 1], [], []>} : vector<2x16xf32>, vector<16x128xf32>, vector<2x128xf32> -> vector<2x128xf32>
    %77 = vector.shape_cast %76 : vector<2x128xf32> to vector<2x1x128xf32>
    %78 = vector.shape_cast %68 : vector<2x16x16xf32> to vector<32x16xf32>
    %cst_39 = arith.constant dense<0.000000e+00> : vector<32x128xf32>
    %79 = tpu.matmul %78, %58, %cst_39 {dimension_numbers = #tpu.dot_dimension_numbers<[1], [0], [0], [1], [0, 0, 1, 1], [], []>} : vector<32x16xf32>, vector<16x128xf32>, vector<32x128xf32> -> vector<32x128xf32>
    %80 = vector.shape_cast %79 : vector<32x128xf32> to vector<2x16x128xf32>
    %81 = arith.mulf %80, %47 : vector<2x16x128xf32>
    %cst_40 = arith.constant dense<0.000000e+00> : vector<2x128xf32>
    %82 = vector.multi_reduction <add>, %81, %cst_40 [1] : vector<2x16x128xf32> to vector<2x128xf32>
    %83 = vector.shape_cast %82 : vector<2x128xf32> to vector<2x1x128xf32>
    %84 = arith.mulf %83, %77 : vector<2x1x128xf32>
    %85 = vector.broadcast %84 : vector<2x1x128xf32> to vector<2x16x128xf32>
    %86 = arith.subf %47, %85 : vector<2x16x128xf32>
    %87 = arith.mulf %86, %86 : vector<2x16x128xf32>
    %88 = arith.mulf %80, %87 : vector<2x16x128xf32>
    %cst_41 = arith.constant dense<0.000000e+00> : vector<2x128xf32>
    %89 = vector.multi_reduction <add>, %88, %cst_41 [1] : vector<2x16x128xf32> to vector<2x128xf32>
    %90 = vector.shape_cast %89 : vector<2x128xf32> to vector<2x1x128xf32>
    %91 = arith.mulf %90, %77 : vector<2x1x128xf32>
    %cst_42 = arith.constant 9.99999974E-6 : f32
    %92 = vector.broadcast %cst_42 : f32 to vector<2x1x128xf32>
    %93 = arith.addf %91, %92 : vector<2x1x128xf32>
    %cst_43 = arith.constant 5.000000e-01 : f32
    %94 = vector.broadcast %cst_43 : f32 to vector<2x1x128xf32>
    %95 = arith.divf %94, %93 : vector<2x1x128xf32>
    %96 = vector.broadcast %95 : vector<2x1x128xf32> to vector<2x16x128xf32>
    %97 = arith.mulf %87, %96 : vector<2x16x128xf32>
    %98 = vector.shape_cast %97 : vector<2x16x128xf32> to vector<32x128xf32>
    %cst_44 = arith.constant dense<0.000000e+00> : vector<32x16xf32>
    %99 = tpu.matmul %98, %59, %cst_44 {dimension_numbers = #tpu.dot_dimension_numbers<[1], [0], [0], [1], [0, 0, 1, 1], [], []>} : vector<32x128xf32>, vector<128x16xf32>, vector<32x16xf32> -> vector<32x16xf32>
    %100 = vector.shape_cast %99 : vector<32x16xf32> to vector<2x16x16xf32>
    %101 = vector.shape_cast %93 : vector<2x1x128xf32> to vector<2x128xf32>
    %102 = math.log %101 : vector<2x128xf32>
    %cst_45 = arith.constant 5.000000e-01 : f32
    %103 = vector.broadcast %cst_45 : f32 to vector<2x128xf32>
    %104 = arith.mulf %103, %102 : vector<2x128xf32>
    %cst_46 = arith.constant dense<0.000000e+00> : vector<2x16xf32>
    %105 = tpu.matmul %104, %59, %cst_46 {dimension_numbers = #tpu.dot_dimension_numbers<[1], [0], [0], [1], [0, 0, 1, 1], [], []>} : vector<2x128xf32>, vector<128x16xf32>, vector<2x16xf32> -> vector<2x16xf32>
    %cst_47 = arith.constant 0.000000e+00 : f32
    %106 = vector.broadcast %cst_47 : f32 to vector<2x16xf32>
    %107 = arith.subf %106, %72 : vector<2x16xf32>
    %cst_48 = arith.constant 0.000000e+00 : f32
    %108 = vector.broadcast %cst_48 : f32 to vector<2x16xf32>
    %109 = arith.maximumf %107, %108 : vector<2x16xf32>
    %110 = vector.broadcast %cst_48 : f32 to vector<2x16xf32>
    %111 = arith.subf %107, %110 : vector<2x16xf32>
    %112 = arith.cmpf one, %111, %111 : vector<2x16xf32>
    %113 = vector.broadcast %cst_48 : f32 to vector<2x16xf32>
    %114 = arith.addf %107, %113 : vector<2x16xf32>
    %115 = math.absf %111 : vector<2x16xf32>
    %cst_49 = arith.constant 0.000000e+00 : f32
    %116 = vector.broadcast %cst_49 : f32 to vector<2x16xf32>
    %117 = arith.subf %116, %115 : vector<2x16xf32>
    %118 = math.exp %117 : vector<2x16xf32>
    %119 = math.log1p %118 : vector<2x16xf32>
    %120 = arith.addf %109, %119 : vector<2x16xf32>
    %121 = arith.select %112, %114, %120 : vector<2x16xi1>, vector<2x16xf32>
    %cst_50 = arith.constant 0.000000e+00 : f32
    %122 = vector.broadcast %cst_50 : f32 to vector<2x16xf32>
    %123 = arith.subf %122, %121 : vector<2x16xf32>
    %124 = arith.subf %123, %105 : vector<2x16xf32>
    %125 = vector.shape_cast %124 : vector<2x16xf32> to vector<2x1x16xf32>
    %126 = vector.broadcast %125 : vector<2x1x16xf32> to vector<2x16x16xf32>
    %127 = arith.subf %126, %100 : vector<2x16x16xf32>
    %cst_51 = arith.constant dense<0xFF800000> : vector<2x16xf32>
    %128 = vector.multi_reduction <maximumf>, %127, %cst_51 [2] : vector<2x16x16xf32> to vector<2x16xf32>
    %129 = vector.shape_cast %128 : vector<2x16xf32> to vector<2x16x1xf32>
    %130 = vector.broadcast %129 : vector<2x16x1xf32> to vector<2x16x16xf32>
    %131 = arith.subf %127, %130 : vector<2x16x16xf32>
    %132 = math.exp %131 : vector<2x16x16xf32>
    %cst_52 = arith.constant dense<0.000000e+00> : vector<2x16xf32>
    %133 = vector.multi_reduction <add>, %132, %cst_52 [2] : vector<2x16x16xf32> to vector<2x16xf32>
    %134 = vector.shape_cast %133 : vector<2x16xf32> to vector<2x16x1xf32>
    %135 = tpu.reciprocal %134 {approx = true} : vector<2x16x1xf32> -> vector<2x16x1xf32>
    %136 = vector.broadcast %135 : vector<2x16x1xf32> to vector<2x16x16xf32>
    %137 = arith.mulf %132, %136 : vector<2x16x16xf32>
    %138 = vector.broadcast %60 : vector<2x16x1xf32> to vector<2x16x16xf32>
    %139 = arith.mulf %138, %137 : vector<2x16x16xf32>
    %cst_53 = arith.constant dense<0.000000e+00> : vector<2x16xf32>
    %140 = vector.multi_reduction <add>, %139, %cst_53 [1] : vector<2x16x16xf32> to vector<2x16xf32>
    %141 = vector.broadcast %56 : vector<1x16xf32> to vector<2x16xf32>
    %142 = arith.mulf %140, %141 : vector<2x16xf32>
    %143 = arith.subf %142, %65 : vector<2x16xf32>
    %cst_54 = arith.constant 9.99999974E-6 : f32
    %144 = vector.broadcast %cst_54 : f32 to vector<2x16xf32>
    %145 = arith.addf %140, %144 : vector<2x16xf32>
    %146 = tpu.reciprocal %145 {approx = true} : vector<2x16xf32> -> vector<2x16xf32>
    %cst_55 = arith.constant dense<0.000000e+00> : vector<2x128xf32>
    %147 = tpu.matmul %146, %58, %cst_55 {dimension_numbers = #tpu.dot_dimension_numbers<[1], [0], [0], [1], [0, 0, 1, 1], [], []>} : vector<2x16xf32>, vector<16x128xf32>, vector<2x128xf32> -> vector<2x128xf32>
    %148 = vector.shape_cast %147 : vector<2x128xf32> to vector<2x1x128xf32>
    %149 = vector.shape_cast %139 : vector<2x16x16xf32> to vector<32x16xf32>
    %cst_56 = arith.constant dense<0.000000e+00> : vector<32x128xf32>
    %150 = tpu.matmul %149, %58, %cst_56 {dimension_numbers = #tpu.dot_dimension_numbers<[1], [0], [0], [1], [0, 0, 1, 1], [], []>} : vector<32x16xf32>, vector<16x128xf32>, vector<32x128xf32> -> vector<32x128xf32>
    %151 = vector.shape_cast %150 : vector<32x128xf32> to vector<2x16x128xf32>
    %152 = arith.mulf %151, %47 : vector<2x16x128xf32>
    %cst_57 = arith.constant dense<0.000000e+00> : vector<2x128xf32>
    %153 = vector.multi_reduction <add>, %152, %cst_57 [1] : vector<2x16x128xf32> to vector<2x128xf32>
    %154 = vector.shape_cast %153 : vector<2x128xf32> to vector<2x1x128xf32>
    %155 = arith.mulf %154, %148 : vector<2x1x128xf32>
    %156 = vector.broadcast %155 : vector<2x1x128xf32> to vector<2x16x128xf32>
    %157 = arith.subf %47, %156 : vector<2x16x128xf32>
    %158 = arith.mulf %157, %157 : vector<2x16x128xf32>
    %159 = arith.mulf %151, %158 : vector<2x16x128xf32>
    %cst_58 = arith.constant dense<0.000000e+00> : vector<2x128xf32>
    %160 = vector.multi_reduction <add>, %159, %cst_58 [1] : vector<2x16x128xf32> to vector<2x128xf32>
    %161 = vector.shape_cast %160 : vector<2x128xf32> to vector<2x1x128xf32>
    %162 = arith.mulf %161, %148 : vector<2x1x128xf32>
    %cst_59 = arith.constant 9.99999974E-6 : f32
    %163 = vector.broadcast %cst_59 : f32 to vector<2x1x128xf32>
    %164 = arith.addf %162, %163 : vector<2x1x128xf32>
    %cst_60 = arith.constant 5.000000e-01 : f32
    %165 = vector.broadcast %cst_60 : f32 to vector<2x1x128xf32>
    %166 = arith.divf %165, %164 : vector<2x1x128xf32>
    %167 = vector.broadcast %166 : vector<2x1x128xf32> to vector<2x16x128xf32>
    %168 = arith.mulf %158, %167 : vector<2x16x128xf32>
    %169 = vector.shape_cast %168 : vector<2x16x128xf32> to vector<32x128xf32>
    %cst_61 = arith.constant dense<0.000000e+00> : vector<32x16xf32>
    %170 = tpu.matmul %169, %59, %cst_61 {dimension_numbers = #tpu.dot_dimension_numbers<[1], [0], [0], [1], [0, 0, 1, 1], [], []>} : vector<32x128xf32>, vector<128x16xf32>, vector<32x16xf32> -> vector<32x16xf32>
    %171 = vector.shape_cast %170 : vector<32x16xf32> to vector<2x16x16xf32>
    %172 = vector.shape_cast %164 : vector<2x1x128xf32> to vector<2x128xf32>
    %173 = math.log %172 : vector<2x128xf32>
    %cst_62 = arith.constant 5.000000e-01 : f32
    %174 = vector.broadcast %cst_62 : f32 to vector<2x128xf32>
    %175 = arith.mulf %174, %173 : vector<2x128xf32>
    %cst_63 = arith.constant dense<0.000000e+00> : vector<2x16xf32>
    %176 = tpu.matmul %175, %59, %cst_63 {dimension_numbers = #tpu.dot_dimension_numbers<[1], [0], [0], [1], [0, 0, 1, 1], [], []>} : vector<2x128xf32>, vector<128x16xf32>, vector<2x16xf32> -> vector<2x16xf32>
    %cst_64 = arith.constant 0.000000e+00 : f32
    %177 = vector.broadcast %cst_64 : f32 to vector<2x16xf32>
    %178 = arith.subf %177, %143 : vector<2x16xf32>
    %cst_65 = arith.constant 0.000000e+00 : f32
    %179 = vector.broadcast %cst_65 : f32 to vector<2x16xf32>
    %180 = arith.maximumf %178, %179 : vector<2x16xf32>
    %181 = vector.broadcast %cst_65 : f32 to vector<2x16xf32>
    %182 = arith.subf %178, %181 : vector<2x16xf32>
    %183 = arith.cmpf one, %182, %182 : vector<2x16xf32>
    %184 = vector.broadcast %cst_65 : f32 to vector<2x16xf32>
    %185 = arith.addf %178, %184 : vector<2x16xf32>
    %186 = math.absf %182 : vector<2x16xf32>
    %cst_66 = arith.constant 0.000000e+00 : f32
    %187 = vector.broadcast %cst_66 : f32 to vector<2x16xf32>
    %188 = arith.subf %187, %186 : vector<2x16xf32>
    %189 = math.exp %188 : vector<2x16xf32>
    %190 = math.log1p %189 : vector<2x16xf32>
    %191 = arith.addf %180, %190 : vector<2x16xf32>
    %192 = arith.select %183, %185, %191 : vector<2x16xi1>, vector<2x16xf32>
    %cst_67 = arith.constant 0.000000e+00 : f32
    %193 = vector.broadcast %cst_67 : f32 to vector<2x16xf32>
    %194 = arith.subf %193, %192 : vector<2x16xf32>
    %195 = arith.subf %194, %176 : vector<2x16xf32>
    %196 = vector.shape_cast %195 : vector<2x16xf32> to vector<2x1x16xf32>
    %197 = vector.broadcast %196 : vector<2x1x16xf32> to vector<2x16x16xf32>
    %198 = arith.subf %197, %171 : vector<2x16x16xf32>
    %cst_68 = arith.constant dense<0xFF800000> : vector<2x16xf32>
    %199 = vector.multi_reduction <maximumf>, %198, %cst_68 [2] : vector<2x16x16xf32> to vector<2x16xf32>
    %200 = vector.shape_cast %199 : vector<2x16xf32> to vector<2x16x1xf32>
    %201 = vector.broadcast %200 : vector<2x16x1xf32> to vector<2x16x16xf32>
    %202 = arith.subf %198, %201 : vector<2x16x16xf32>
    %203 = math.exp %202 : vector<2x16x16xf32>
    %cst_69 = arith.constant dense<0.000000e+00> : vector<2x16xf32>
    %204 = vector.multi_reduction <add>, %203, %cst_69 [2] : vector<2x16x16xf32> to vector<2x16xf32>
    %205 = vector.shape_cast %204 : vector<2x16xf32> to vector<2x16x1xf32>
    %206 = tpu.reciprocal %205 {approx = true} : vector<2x16x1xf32> -> vector<2x16x1xf32>
    %207 = vector.broadcast %206 : vector<2x16x1xf32> to vector<2x16x16xf32>
    %208 = arith.mulf %203, %207 : vector<2x16x16xf32>
    %209 = vector.broadcast %60 : vector<2x16x1xf32> to vector<2x16x16xf32>
    %210 = arith.mulf %209, %208 : vector<2x16x16xf32>
    %cst_70 = arith.constant dense<0.000000e+00> : vector<2x16xf32>
    %211 = vector.multi_reduction <add>, %210, %cst_70 [1] : vector<2x16x16xf32> to vector<2x16xf32>
    %212 = vector.broadcast %56 : vector<1x16xf32> to vector<2x16xf32>
    %213 = arith.mulf %211, %212 : vector<2x16xf32>
    %214 = arith.subf %213, %65 : vector<2x16xf32>
    %cst_71 = arith.constant 9.99999974E-6 : f32
    %215 = vector.broadcast %cst_71 : f32 to vector<2x16xf32>
    %216 = arith.addf %211, %215 : vector<2x16xf32>
    %217 = tpu.reciprocal %216 {approx = true} : vector<2x16xf32> -> vector<2x16xf32>
    %cst_72 = arith.constant dense<0.000000e+00> : vector<2x128xf32>
    %218 = tpu.matmul %217, %58, %cst_72 {dimension_numbers = #tpu.dot_dimension_numbers<[1], [0], [0], [1], [0, 0, 1, 1], [], []>} : vector<2x16xf32>, vector<16x128xf32>, vector<2x128xf32> -> vector<2x128xf32>
    %219 = vector.shape_cast %218 : vector<2x128xf32> to vector<2x1x128xf32>
    %220 = vector.shape_cast %210 : vector<2x16x16xf32> to vector<32x16xf32>
    %cst_73 = arith.constant dense<0.000000e+00> : vector<32x128xf32>
    %221 = tpu.matmul %220, %58, %cst_73 {dimension_numbers = #tpu.dot_dimension_numbers<[1], [0], [0], [1], [0, 0, 1, 1], [], []>} : vector<32x16xf32>, vector<16x128xf32>, vector<32x128xf32> -> vector<32x128xf32>
    %222 = vector.shape_cast %221 : vector<32x128xf32> to vector<2x16x128xf32>
    %223 = arith.mulf %222, %47 : vector<2x16x128xf32>
    %cst_74 = arith.constant dense<0.000000e+00> : vector<2x128xf32>
    %224 = vector.multi_reduction <add>, %223, %cst_74 [1] : vector<2x16x128xf32> to vector<2x128xf32>
    %225 = vector.shape_cast %224 : vector<2x128xf32> to vector<2x1x128xf32>
    %226 = arith.mulf %225, %219 : vector<2x1x128xf32>
    %227 = vector.shape_cast %226 : vector<2x1x128xf32> to vector<2x128xf32>
    %228 = arith.truncf %227 : vector<2x128xf32> to vector<2x128xbf16>
    %c0_75 = arith.constant 0 : index
    %c0_76 = arith.constant 0 : index
    %229 = vector.load %arg11[%c0_75, %c0_76] : memref<128x512xbf16, #tpu.memory_space<vmem>>, vector<128x512xbf16>
    %cst_77 = arith.constant dense<0.000000e+00> : vector<2x512xf32>
    %230 = tpu.matmul %228, %229, %cst_77 {dimension_numbers = #tpu.dot_dimension_numbers<[1], [0], [0], [1], [0, 0, 1, 1], [], []>} : vector<2x128xbf16>, vector<128x512xbf16>, vector<2x512xf32> -> vector<2x512xf32>
    %231 = vector.shape_cast %230 : vector<2x512xf32> to vector<2x16x32xf32>
    %c0_78 = arith.constant 0 : index
    %c0_79 = arith.constant 0 : index
    %232 = vector.load %arg12[%c0_78, %c0_79] : memref<1x32xf32, #tpu.memory_space<vmem>>, vector<1x32xf32>
    %233 = vector.shape_cast %232 : vector<1x32xf32> to vector<1x1x32xf32>
    %234 = vector.broadcast %233 : vector<1x1x32xf32> to vector<2x16x32xf32>
    %235 = arith.addf %231, %234 : vector<2x16x32xf32>
    %cst_80 = arith.constant 5.000000e-01 : f32
    %236 = vector.broadcast %cst_80 : f32 to vector<2x16xf32>
    %237 = arith.mulf %236, %214 : vector<2x16xf32>
    %238 = math.tanh %237 : vector<2x16xf32>
    %cst_81 = arith.constant 1.000000e+00 : f32
    %239 = vector.broadcast %cst_81 : f32 to vector<2x16xf32>
    %240 = arith.addf %238, %239 : vector<2x16xf32>
    %cst_82 = arith.constant 5.000000e-01 : f32
    %241 = vector.broadcast %cst_82 : f32 to vector<2x16xf32>
    %242 = arith.mulf %241, %240 : vector<2x16xf32>
    %c0_83 = arith.constant 0 : index
    %c0_84 = arith.constant 0 : index
    %243 = vector.load %arg13[%c0_83, %c0_84] : memref<16x8xf32, #tpu.memory_space<vmem>>, vector<16x4xf32>
    %c0_85 = arith.constant 0 : index
    %c4 = arith.constant 4 : index
    %244 = vector.load %arg13[%c0_85, %c4] : memref<16x8xf32, #tpu.memory_space<vmem>>, vector<16x4xf32>
    %c0_86 = arith.constant 0 : index
    %c0_87 = arith.constant 0 : index
    %245 = vector.load %arg14[%c0_86, %c0_87] : memref<4x32xf32, #tpu.memory_space<vmem>>, vector<4x32xf32>
    %c0_88 = arith.constant 0 : index
    %c0_89 = arith.constant 0 : index
    %246 = vector.load %arg15[%c0_88, %c0_89] : memref<32x4xf32, #tpu.memory_space<vmem>>, vector<32x4xf32>
    %247 = vector.shape_cast %242 : vector<2x16xf32> to vector<2x16x1xf32>
    %cst_90 = arith.constant dense<0.000000e+00> : vector<2x4xf32>
    %248 = tpu.matmul %242, %244, %cst_90 {dimension_numbers = #tpu.dot_dimension_numbers<[1], [0], [0], [1], [0, 0, 1, 1], [], []>} : vector<2x16xf32>, vector<16x4xf32>, vector<2x4xf32> -> vector<2x4xf32>
    %249 = vector.shape_cast %243 : vector<16x4xf32> to vector<1x16x4xf32>
    %cst_91 = arith.constant 2.500000e-01 : f32
    %250 = vector.broadcast %cst_91 : f32 to vector<2x16x4xf32>
    %251 = vector.broadcast %247 : vector<2x16x1xf32> to vector<2x16x4xf32>
    %252 = arith.mulf %251, %250 : vector<2x16x4xf32>
    %cst_92 = arith.constant dense<0.000000e+00> : vector<2x4xf32>
    %253 = vector.multi_reduction <add>, %252, %cst_92 [1] : vector<2x16x4xf32> to vector<2x4xf32>
    %254 = vector.broadcast %249 : vector<1x16x4xf32> to vector<2x16x4xf32>
    %255 = arith.mulf %252, %254 : vector<2x16x4xf32>
    %cst_93 = arith.constant dense<0.000000e+00> : vector<2x4xf32>
    %256 = vector.multi_reduction <add>, %255, %cst_93 [1] : vector<2x16x4xf32> to vector<2x4xf32>
    %257 = arith.subf %256, %248 : vector<2x4xf32>
    %cst_94 = arith.constant 9.99999974E-6 : f32
    %258 = vector.broadcast %cst_94 : f32 to vector<2x4xf32>
    %259 = arith.addf %253, %258 : vector<2x4xf32>
    %260 = tpu.reciprocal %259 {approx = true} : vector<2x4xf32> -> vector<2x4xf32>
    %cst_95 = arith.constant dense<0.000000e+00> : vector<2x32xf32>
    %261 = tpu.matmul %260, %245, %cst_95 {dimension_numbers = #tpu.dot_dimension_numbers<[1], [0], [0], [1], [0, 0, 1, 1], [], []>} : vector<2x4xf32>, vector<4x32xf32>, vector<2x32xf32> -> vector<2x32xf32>
    %262 = vector.shape_cast %261 : vector<2x32xf32> to vector<2x1x32xf32>
    %263 = vector.shape_cast %252 : vector<2x16x4xf32> to vector<32x4xf32>
    %cst_96 = arith.constant dense<0.000000e+00> : vector<32x32xf32>
    %264 = tpu.matmul %263, %245, %cst_96 {dimension_numbers = #tpu.dot_dimension_numbers<[1], [0], [0], [1], [0, 0, 1, 1], [], []>} : vector<32x4xf32>, vector<4x32xf32>, vector<32x32xf32> -> vector<32x32xf32>
    %265 = vector.shape_cast %264 : vector<32x32xf32> to vector<2x16x32xf32>
    %266 = arith.mulf %265, %235 : vector<2x16x32xf32>
    %cst_97 = arith.constant dense<0.000000e+00> : vector<2x32xf32>
    %267 = vector.multi_reduction <add>, %266, %cst_97 [1] : vector<2x16x32xf32> to vector<2x32xf32>
    %268 = vector.shape_cast %267 : vector<2x32xf32> to vector<2x1x32xf32>
    %269 = arith.mulf %268, %262 : vector<2x1x32xf32>
    %270 = vector.broadcast %269 : vector<2x1x32xf32> to vector<2x16x32xf32>
    %271 = arith.subf %235, %270 : vector<2x16x32xf32>
    %272 = arith.mulf %271, %271 : vector<2x16x32xf32>
    %273 = arith.mulf %265, %272 : vector<2x16x32xf32>
    %cst_98 = arith.constant dense<0.000000e+00> : vector<2x32xf32>
    %274 = vector.multi_reduction <add>, %273, %cst_98 [1] : vector<2x16x32xf32> to vector<2x32xf32>
    %275 = vector.shape_cast %274 : vector<2x32xf32> to vector<2x1x32xf32>
    %276 = arith.mulf %275, %262 : vector<2x1x32xf32>
    %cst_99 = arith.constant 9.99999974E-6 : f32
    %277 = vector.broadcast %cst_99 : f32 to vector<2x1x32xf32>
    %278 = arith.addf %276, %277 : vector<2x1x32xf32>
    %cst_100 = arith.constant 5.000000e-01 : f32
    %279 = vector.broadcast %cst_100 : f32 to vector<2x1x32xf32>
    %280 = arith.divf %279, %278 : vector<2x1x32xf32>
    %281 = vector.broadcast %280 : vector<2x1x32xf32> to vector<2x16x32xf32>
    %282 = arith.mulf %272, %281 : vector<2x16x32xf32>
    %283 = vector.shape_cast %282 : vector<2x16x32xf32> to vector<32x32xf32>
    %cst_101 = arith.constant dense<0.000000e+00> : vector<32x4xf32>
    %284 = tpu.matmul %283, %246, %cst_101 {dimension_numbers = #tpu.dot_dimension_numbers<[1], [0], [0], [1], [0, 0, 1, 1], [], []>} : vector<32x32xf32>, vector<32x4xf32>, vector<32x4xf32> -> vector<32x4xf32>
    %285 = vector.shape_cast %284 : vector<32x4xf32> to vector<2x16x4xf32>
    %286 = vector.shape_cast %278 : vector<2x1x32xf32> to vector<2x32xf32>
    %287 = math.log %286 : vector<2x32xf32>
    %cst_102 = arith.constant 5.000000e-01 : f32
    %288 = vector.broadcast %cst_102 : f32 to vector<2x32xf32>
    %289 = arith.mulf %288, %287 : vector<2x32xf32>
    %cst_103 = arith.constant dense<0.000000e+00> : vector<2x4xf32>
    %290 = tpu.matmul %289, %246, %cst_103 {dimension_numbers = #tpu.dot_dimension_numbers<[1], [0], [0], [1], [0, 0, 1, 1], [], []>} : vector<2x32xf32>, vector<32x4xf32>, vector<2x4xf32> -> vector<2x4xf32>
    %cst_104 = arith.constant 0.000000e+00 : f32
    %291 = vector.broadcast %cst_104 : f32 to vector<2x4xf32>
    %292 = arith.subf %291, %257 : vector<2x4xf32>
    %cst_105 = arith.constant 0.000000e+00 : f32
    %293 = vector.broadcast %cst_105 : f32 to vector<2x4xf32>
    %294 = arith.maximumf %292, %293 : vector<2x4xf32>
    %295 = vector.broadcast %cst_105 : f32 to vector<2x4xf32>
    %296 = arith.subf %292, %295 : vector<2x4xf32>
    %297 = arith.cmpf one, %296, %296 : vector<2x4xf32>
    %298 = vector.broadcast %cst_105 : f32 to vector<2x4xf32>
    %299 = arith.addf %292, %298 : vector<2x4xf32>
    %300 = math.absf %296 : vector<2x4xf32>
    %cst_106 = arith.constant 0.000000e+00 : f32
    %301 = vector.broadcast %cst_106 : f32 to vector<2x4xf32>
    %302 = arith.subf %301, %300 : vector<2x4xf32>
    %303 = math.exp %302 : vector<2x4xf32>
    %304 = math.log1p %303 : vector<2x4xf32>
    %305 = arith.addf %294, %304 : vector<2x4xf32>
    %306 = arith.select %297, %299, %305 : vector<2x4xi1>, vector<2x4xf32>
    %cst_107 = arith.constant 0.000000e+00 : f32
    %307 = vector.broadcast %cst_107 : f32 to vector<2x4xf32>
    %308 = arith.subf %307, %306 : vector<2x4xf32>
    %309 = arith.subf %308, %290 : vector<2x4xf32>
    %310 = vector.shape_cast %309 : vector<2x4xf32> to vector<2x1x4xf32>
    %311 = vector.broadcast %310 : vector<2x1x4xf32> to vector<2x16x4xf32>
    %312 = arith.subf %311, %285 : vector<2x16x4xf32>
    %cst_108 = arith.constant dense<0xFF800000> : vector<2x16xf32>
    %313 = vector.multi_reduction <maximumf>, %312, %cst_108 [2] : vector<2x16x4xf32> to vector<2x16xf32>
    %314 = vector.shape_cast %313 : vector<2x16xf32> to vector<2x16x1xf32>
    %315 = vector.broadcast %314 : vector<2x16x1xf32> to vector<2x16x4xf32>
    %316 = arith.subf %312, %315 : vector<2x16x4xf32>
    %317 = math.exp %316 : vector<2x16x4xf32>
    %cst_109 = arith.constant dense<0.000000e+00> : vector<2x16xf32>
    %318 = vector.multi_reduction <add>, %317, %cst_109 [2] : vector<2x16x4xf32> to vector<2x16xf32>
    %319 = vector.shape_cast %318 : vector<2x16xf32> to vector<2x16x1xf32>
    %320 = tpu.reciprocal %319 {approx = true} : vector<2x16x1xf32> -> vector<2x16x1xf32>
    %321 = vector.broadcast %320 : vector<2x16x1xf32> to vector<2x16x4xf32>
    %322 = arith.mulf %317, %321 : vector<2x16x4xf32>
    %323 = vector.broadcast %247 : vector<2x16x1xf32> to vector<2x16x4xf32>
    %324 = arith.mulf %323, %322 : vector<2x16x4xf32>
    %cst_110 = arith.constant dense<0.000000e+00> : vector<2x4xf32>
    %325 = vector.multi_reduction <add>, %324, %cst_110 [1] : vector<2x16x4xf32> to vector<2x4xf32>
    %326 = vector.broadcast %249 : vector<1x16x4xf32> to vector<2x16x4xf32>
    %327 = arith.mulf %324, %326 : vector<2x16x4xf32>
    %cst_111 = arith.constant dense<0.000000e+00> : vector<2x4xf32>
    %328 = vector.multi_reduction <add>, %327, %cst_111 [1] : vector<2x16x4xf32> to vector<2x4xf32>
    %329 = arith.subf %328, %248 : vector<2x4xf32>
    %cst_112 = arith.constant 9.99999974E-6 : f32
    %330 = vector.broadcast %cst_112 : f32 to vector<2x4xf32>
    %331 = arith.addf %325, %330 : vector<2x4xf32>
    %332 = tpu.reciprocal %331 {approx = true} : vector<2x4xf32> -> vector<2x4xf32>
    %cst_113 = arith.constant dense<0.000000e+00> : vector<2x32xf32>
    %333 = tpu.matmul %332, %245, %cst_113 {dimension_numbers = #tpu.dot_dimension_numbers<[1], [0], [0], [1], [0, 0, 1, 1], [], []>} : vector<2x4xf32>, vector<4x32xf32>, vector<2x32xf32> -> vector<2x32xf32>
    %334 = vector.shape_cast %333 : vector<2x32xf32> to vector<2x1x32xf32>
    %335 = vector.shape_cast %324 : vector<2x16x4xf32> to vector<32x4xf32>
    %cst_114 = arith.constant dense<0.000000e+00> : vector<32x32xf32>
    %336 = tpu.matmul %335, %245, %cst_114 {dimension_numbers = #tpu.dot_dimension_numbers<[1], [0], [0], [1], [0, 0, 1, 1], [], []>} : vector<32x4xf32>, vector<4x32xf32>, vector<32x32xf32> -> vector<32x32xf32>
    %337 = vector.shape_cast %336 : vector<32x32xf32> to vector<2x16x32xf32>
    %338 = arith.mulf %337, %235 : vector<2x16x32xf32>
    %cst_115 = arith.constant dense<0.000000e+00> : vector<2x32xf32>
    %339 = vector.multi_reduction <add>, %338, %cst_115 [1] : vector<2x16x32xf32> to vector<2x32xf32>
    %340 = vector.shape_cast %339 : vector<2x32xf32> to vector<2x1x32xf32>
    %341 = arith.mulf %340, %334 : vector<2x1x32xf32>
    %342 = vector.broadcast %341 : vector<2x1x32xf32> to vector<2x16x32xf32>
    %343 = arith.subf %235, %342 : vector<2x16x32xf32>
    %344 = arith.mulf %343, %343 : vector<2x16x32xf32>
    %345 = arith.mulf %337, %344 : vector<2x16x32xf32>
    %cst_116 = arith.constant dense<0.000000e+00> : vector<2x32xf32>
    %346 = vector.multi_reduction <add>, %345, %cst_116 [1] : vector<2x16x32xf32> to vector<2x32xf32>
    %347 = vector.shape_cast %346 : vector<2x32xf32> to vector<2x1x32xf32>
    %348 = arith.mulf %347, %334 : vector<2x1x32xf32>
    %cst_117 = arith.constant 9.99999974E-6 : f32
    %349 = vector.broadcast %cst_117 : f32 to vector<2x1x32xf32>
    %350 = arith.addf %348, %349 : vector<2x1x32xf32>
    %cst_118 = arith.constant 5.000000e-01 : f32
    %351 = vector.broadcast %cst_118 : f32 to vector<2x1x32xf32>
    %352 = arith.divf %351, %350 : vector<2x1x32xf32>
    %353 = vector.broadcast %352 : vector<2x1x32xf32> to vector<2x16x32xf32>
    %354 = arith.mulf %344, %353 : vector<2x16x32xf32>
    %355 = vector.shape_cast %354 : vector<2x16x32xf32> to vector<32x32xf32>
    %cst_119 = arith.constant dense<0.000000e+00> : vector<32x4xf32>
    %356 = tpu.matmul %355, %246, %cst_119 {dimension_numbers = #tpu.dot_dimension_numbers<[1], [0], [0], [1], [0, 0, 1, 1], [], []>} : vector<32x32xf32>, vector<32x4xf32>, vector<32x4xf32> -> vector<32x4xf32>
    %357 = vector.shape_cast %356 : vector<32x4xf32> to vector<2x16x4xf32>
    %358 = vector.shape_cast %350 : vector<2x1x32xf32> to vector<2x32xf32>
    %359 = math.log %358 : vector<2x32xf32>
    %cst_120 = arith.constant 5.000000e-01 : f32
    %360 = vector.broadcast %cst_120 : f32 to vector<2x32xf32>
    %361 = arith.mulf %360, %359 : vector<2x32xf32>
    %cst_121 = arith.constant dense<0.000000e+00> : vector<2x4xf32>
    %362 = tpu.matmul %361, %246, %cst_121 {dimension_numbers = #tpu.dot_dimension_numbers<[1], [0], [0], [1], [0, 0, 1, 1], [], []>} : vector<2x32xf32>, vector<32x4xf32>, vector<2x4xf32> -> vector<2x4xf32>
    %cst_122 = arith.constant 0.000000e+00 : f32
    %363 = vector.broadcast %cst_122 : f32 to vector<2x4xf32>
    %364 = arith.subf %363, %329 : vector<2x4xf32>
    %cst_123 = arith.constant 0.000000e+00 : f32
    %365 = vector.broadcast %cst_123 : f32 to vector<2x4xf32>
    %366 = arith.maximumf %364, %365 : vector<2x4xf32>
    %367 = vector.broadcast %cst_123 : f32 to vector<2x4xf32>
    %368 = arith.subf %364, %367 : vector<2x4xf32>
    %369 = arith.cmpf one, %368, %368 : vector<2x4xf32>
    %370 = vector.broadcast %cst_123 : f32 to vector<2x4xf32>
    %371 = arith.addf %364, %370 : vector<2x4xf32>
    %372 = math.absf %368 : vector<2x4xf32>
    %cst_124 = arith.constant 0.000000e+00 : f32
    %373 = vector.broadcast %cst_124 : f32 to vector<2x4xf32>
    %374 = arith.subf %373, %372 : vector<2x4xf32>
    %375 = math.exp %374 : vector<2x4xf32>
    %376 = math.log1p %375 : vector<2x4xf32>
    %377 = arith.addf %366, %376 : vector<2x4xf32>
    %378 = arith.select %369, %371, %377 : vector<2x4xi1>, vector<2x4xf32>
    %cst_125 = arith.constant 0.000000e+00 : f32
    %379 = vector.broadcast %cst_125 : f32 to vector<2x4xf32>
    %380 = arith.subf %379, %378 : vector<2x4xf32>
    %381 = arith.subf %380, %362 : vector<2x4xf32>
    %382 = vector.shape_cast %381 : vector<2x4xf32> to vector<2x1x4xf32>
    %383 = vector.broadcast %382 : vector<2x1x4xf32> to vector<2x16x4xf32>
    %384 = arith.subf %383, %357 : vector<2x16x4xf32>
    %cst_126 = arith.constant dense<0xFF800000> : vector<2x16xf32>
    %385 = vector.multi_reduction <maximumf>, %384, %cst_126 [2] : vector<2x16x4xf32> to vector<2x16xf32>
    %386 = vector.shape_cast %385 : vector<2x16xf32> to vector<2x16x1xf32>
    %387 = vector.broadcast %386 : vector<2x16x1xf32> to vector<2x16x4xf32>
    %388 = arith.subf %384, %387 : vector<2x16x4xf32>
    %389 = math.exp %388 : vector<2x16x4xf32>
    %cst_127 = arith.constant dense<0.000000e+00> : vector<2x16xf32>
    %390 = vector.multi_reduction <add>, %389, %cst_127 [2] : vector<2x16x4xf32> to vector<2x16xf32>
    %391 = vector.shape_cast %390 : vector<2x16xf32> to vector<2x16x1xf32>
    %392 = tpu.reciprocal %391 {approx = true} : vector<2x16x1xf32> -> vector<2x16x1xf32>
    %393 = vector.broadcast %392 : vector<2x16x1xf32> to vector<2x16x4xf32>
    %394 = arith.mulf %389, %393 : vector<2x16x4xf32>
    %395 = vector.broadcast %247 : vector<2x16x1xf32> to vector<2x16x4xf32>
    %396 = arith.mulf %395, %394 : vector<2x16x4xf32>
    %cst_128 = arith.constant dense<0.000000e+00> : vector<2x4xf32>
    %397 = vector.multi_reduction <add>, %396, %cst_128 [1] : vector<2x16x4xf32> to vector<2x4xf32>
    %398 = vector.broadcast %249 : vector<1x16x4xf32> to vector<2x16x4xf32>
    %399 = arith.mulf %396, %398 : vector<2x16x4xf32>
    %cst_129 = arith.constant dense<0.000000e+00> : vector<2x4xf32>
    %400 = vector.multi_reduction <add>, %399, %cst_129 [1] : vector<2x16x4xf32> to vector<2x4xf32>
    %401 = arith.subf %400, %248 : vector<2x4xf32>
    %cst_130 = arith.constant 9.99999974E-6 : f32
    %402 = vector.broadcast %cst_130 : f32 to vector<2x4xf32>
    %403 = arith.addf %397, %402 : vector<2x4xf32>
    %404 = tpu.reciprocal %403 {approx = true} : vector<2x4xf32> -> vector<2x4xf32>
    %cst_131 = arith.constant dense<0.000000e+00> : vector<2x32xf32>
    %405 = tpu.matmul %404, %245, %cst_131 {dimension_numbers = #tpu.dot_dimension_numbers<[1], [0], [0], [1], [0, 0, 1, 1], [], []>} : vector<2x4xf32>, vector<4x32xf32>, vector<2x32xf32> -> vector<2x32xf32>
    %406 = vector.shape_cast %405 : vector<2x32xf32> to vector<2x1x32xf32>
    %407 = vector.shape_cast %396 : vector<2x16x4xf32> to vector<32x4xf32>
    %cst_132 = arith.constant dense<0.000000e+00> : vector<32x32xf32>
    %408 = tpu.matmul %407, %245, %cst_132 {dimension_numbers = #tpu.dot_dimension_numbers<[1], [0], [0], [1], [0, 0, 1, 1], [], []>} : vector<32x4xf32>, vector<4x32xf32>, vector<32x32xf32> -> vector<32x32xf32>
    %409 = vector.shape_cast %408 : vector<32x32xf32> to vector<2x16x32xf32>
    %410 = arith.mulf %409, %235 : vector<2x16x32xf32>
    %cst_133 = arith.constant dense<0.000000e+00> : vector<2x32xf32>
    %411 = vector.multi_reduction <add>, %410, %cst_133 [1] : vector<2x16x32xf32> to vector<2x32xf32>
    %412 = vector.shape_cast %411 : vector<2x32xf32> to vector<2x1x32xf32>
    %413 = arith.mulf %412, %406 : vector<2x1x32xf32>
    %414 = vector.broadcast %413 : vector<2x1x32xf32> to vector<2x16x32xf32>
    %415 = arith.subf %235, %414 : vector<2x16x32xf32>
    %416 = arith.mulf %415, %415 : vector<2x16x32xf32>
    %417 = arith.mulf %409, %416 : vector<2x16x32xf32>
    %cst_134 = arith.constant dense<0.000000e+00> : vector<2x32xf32>
    %418 = vector.multi_reduction <add>, %417, %cst_134 [1] : vector<2x16x32xf32> to vector<2x32xf32>
    %419 = vector.shape_cast %418 : vector<2x32xf32> to vector<2x1x32xf32>
    %420 = arith.mulf %419, %406 : vector<2x1x32xf32>
    %cst_135 = arith.constant 9.99999974E-6 : f32
    %421 = vector.broadcast %cst_135 : f32 to vector<2x1x32xf32>
    %422 = arith.addf %420, %421 : vector<2x1x32xf32>
    %423 = vector.shape_cast %413 : vector<2x1x32xf32> to vector<2x32xf32>
    %424 = vector.shape_cast %422 : vector<2x1x32xf32> to vector<2x32xf32>
    %cst_136 = arith.constant 0.000000e+00 : f32
    %425 = vector.broadcast %cst_136 : f32 to vector<2x60xf32>
    %426 = tpu.concatenate %401, %423, %424, %425 in 1 : vector<2x4xf32>, vector<2x32xf32>, vector<2x32xf32>, vector<2x60xf32> -> vector<2x128xf32>
    %c0_137 = arith.constant 0 : index
    %c0_138 = arith.constant 0 : index
    %427 = vector.load %arg16[%c0_137, %c0_138] : memref<2x128xf32, #tpu.memory_space<vmem>>, vector<2x128xf32>
    tpu.vector_store %arg16[%c0_137, %c0_138], %426 {strides = array<i32>} : memref<2x128xf32, #tpu.memory_space<vmem>>, vector<2x128xf32>,
    return
  }
  func.func @transform_0(%arg0: i32) -> (i32, i32) {
    %c0_i32 = arith.constant 0 : i32
    %c0_i32_0 = arith.constant 0 : i32
    return %arg0, %c0_i32 : i32, i32
  }
  func.func @transform_1(%arg0: i32) -> (i32, i32) {
    %c0_i32 = arith.constant 0 : i32
    %c0_i32_0 = arith.constant 0 : i32
    return %arg0, %c0_i32 : i32, i32
  }
  func.func @transform_2(%arg0: i32) -> (i32, i32) {
    %c0_i32 = arith.constant 0 : i32
    %c0_i32_0 = arith.constant 0 : i32
    %c0_i32_1 = arith.constant 0 : i32
    return %c0_i32, %c0_i32_0 : i32, i32
  }
  func.func @transform_3(%arg0: i32) -> (i32, i32) {
    %c0_i32 = arith.constant 0 : i32
    %c0_i32_0 = arith.constant 0 : i32
    %c0_i32_1 = arith.constant 0 : i32
    return %c0_i32, %c0_i32_0 : i32, i32
  }
  func.func @transform_4(%arg0: i32) -> (i32, i32) {
    %c0_i32 = arith.constant 0 : i32
    %c0_i32_0 = arith.constant 0 : i32
    %c0_i32_1 = arith.constant 0 : i32
    return %c0_i32, %c0_i32_0 : i32, i32
  }
  func.func @transform_5(%arg0: i32) -> (i32, i32) {
    %c0_i32 = arith.constant 0 : i32
    %c0_i32_0 = arith.constant 0 : i32
    %c0_i32_1 = arith.constant 0 : i32
    return %c0_i32, %c0_i32_0 : i32, i32
  }
  func.func @transform_6(%arg0: i32) -> (i32, i32) {
    %c0_i32 = arith.constant 0 : i32
    %c0_i32_0 = arith.constant 0 : i32
    %c0_i32_1 = arith.constant 0 : i32
    return %c0_i32, %c0_i32_0 : i32, i32
  }
  func.func @transform_7(%arg0: i32) -> (i32, i32) {
    %c0_i32 = arith.constant 0 : i32
    %c0_i32_0 = arith.constant 0 : i32
    %c0_i32_1 = arith.constant 0 : i32
    return %c0_i32, %c0_i32_0 : i32, i32
  }
  func.func @transform_8(%arg0: i32) -> (i32, i32) {
    %c0_i32 = arith.constant 0 : i32
    %c0_i32_0 = arith.constant 0 : i32
    %c0_i32_1 = arith.constant 0 : i32
    return %c0_i32, %c0_i32_0 : i32, i32
  }
  func.func @transform_9(%arg0: i32) -> (i32, i32) {
    %c0_i32 = arith.constant 0 : i32
    %c0_i32_0 = arith.constant 0 : i32
    %c0_i32_1 = arith.constant 0 : i32
    return %c0_i32, %c0_i32_0 : i32, i32
  }
  func.func @transform_10(%arg0: i32) -> (i32, i32) {
    %c0_i32 = arith.constant 0 : i32
    %c0_i32_0 = arith.constant 0 : i32
    %c0_i32_1 = arith.constant 0 : i32
    return %c0_i32, %c0_i32_0 : i32, i32
  }
  func.func @transform_11(%arg0: i32) -> (i32, i32) {
    %c0_i32 = arith.constant 0 : i32
    %c0_i32_0 = arith.constant 0 : i32
    %c0_i32_1 = arith.constant 0 : i32
    return %c0_i32, %c0_i32_0 : i32, i32
  }
  func.func @transform_12(%arg0: i32) -> (i32, i32) {
    %c0_i32 = arith.constant 0 : i32
    %c0_i32_0 = arith.constant 0 : i32
    %c0_i32_1 = arith.constant 0 : i32
    return %c0_i32, %c0_i32_0 : i32, i32
  }
  func.func @transform_13(%arg0: i32) -> (i32, i32) {
    %c0_i32 = arith.constant 0 : i32
    %c0_i32_0 = arith.constant 0 : i32
    %c0_i32_1 = arith.constant 0 : i32
    return %c0_i32, %c0_i32_0 : i32, i32
  }
  func.func @transform_14(%arg0: i32) -> (i32, i32) {
    %c0_i32 = arith.constant 0 : i32
    %c0_i32_0 = arith.constant 0 : i32
    %c0_i32_1 = arith.constant 0 : i32
    return %c0_i32, %c0_i32_0 : i32, i32
  }
  func.func @transform_15(%arg0: i32) -> (i32, i32) {
    %c0_i32 = arith.constant 0 : i32
    %c0_i32_0 = arith.constant 0 : i32
    return %arg0, %c0_i32 : i32, i32
  }
}

</mosaic_0001>

<bundles_post_ra>
// kernel: tpu_custom_call.1
= control target key start
LH: loop header
LB: loop body
LE: loop exit
PB: predicated region body
PF: predicated region fallthrough
CT: control target
= control target key end

     0   :  { %20 = vsyncpa [#allocation3], 0  ;;  %s3990_s0 = inlined_call_operand.vmem [shape: f32[2,16], index: 0, kind: input, shape index: {}]   ;;  %s3991_s1 = inlined_call_operand.vmem [shape: bf16[32,16], index: 1, kind: input, shape index: {}]   ;;  %s3992_s2 = inlined_call_operand.vmem [shape: bf16[16,32], index: 2, kind: input, shape index: {}]   ;;  %s3993_s3 = inlined_call_operand.vmem [shape: f32[16,32], index: 3, kind: input, shape index: {}]   ;;  %s3994_s4 = inlined_call_operand.vmem [shape: f32[2,32], index: 4, kind: input, shape index: {}]   ;;  %s3995_s5 = inlined_call_operand.vmem [shape: bf16[32,128], index: 5, kind: input, shape index: {}]   ;;  %s3996_s6 = inlined_call_operand.vmem [shape: f32[1,128], index: 6, kind: input, shape index: {}]   ;;  %s3997_s7 = inlined_call_operand.vmem [shape: f32[2,16], index: 7, kind: input, shape index: {}]   ;;  %s3998_s8 = inlined_call_operand.vmem [shape: f32[16,128], index: 8, kind: input, shape index: {}]   ;;  %s3999_s9 = inlined_call_operand.vmem [shape: f32[128,16], index: 9, kind: input, shape index: {}]   ;;  %s4000_s10 = inlined_call_operand.hbm [shape: bf16[128,512], index: 10, kind: input, shape index: {}]   ;;  %s4001_s11 = inlined_call_operand.vmem [shape: f32[1,32], index: 11, kind: input, shape index: {}]   ;;  %s4002_s12 = inlined_call_operand.vmem [shape: f32[16,8], index: 12, kind: input, shape index: {}]   ;;  %s4003_s13 = inlined_call_operand.vmem [shape: f32[4,32], index: 13, kind: input, shape index: {}]   ;;  %s4004_s14 = inlined_call_operand.vmem [shape: f32[32,4], index: 14, kind: input, shape index: {}]   ;;  %s4005_s15 = inlined_call_operand.hbm [shape: f32[2,128], index: 15, kind: output, shape index: {}]  }
   0x1   :  { %21 = vsyncpa [#allocation4], 0  ;;  %s46_s20 = sshll.u32 %s4000_s10, 4  ;;  %s3113_s21 = smov [#allocation2]   ;;  %s47_s20 = int_to_ptr.hbm [resolvable:$true] %s46_s20 }
   0x2   :  { %s48_s22 = sshll.u32 %s3113_s21, 4  ;;  %s3114_s23 = smov 256   ;;  %s49_s22 = int_to_ptr.vmem [resolvable:$true] %s48_s22 }
   0x3   :  { %s3115_s24 = smov 16  }
   0x4   :  { %54 = dma.hbm_to_vmem [thread:$0]  %s47_s20, 4096, %s49_s22, [#allocation3], %s3114_s23, %s3114_s23, %s3115_s24  }
   0x5   :  { %3109 = dma.done.wait [#allocation3], 4096  }
   0x6   :  { %3110 = vsyncadd [#allocation3], 4294963200  ;;  %v2814_v0 = vld [vmem:[%s3992_s2] sm:$0xff]  ;;  %vm90_vm0 = vcmask 130048   ;;  %v2813_v2 = vld [vmem:[%s3991_s1 + $0x8] sm:$0xff]  ;;  %vm142_vm1 = vcmask 261120   ;;  %v323_v43 = vlaneseq }
   0x7   :  { %v2812_v1 = vld [vmem:[%s3991_s1] sm:$0xff]  ;;  %104 = vmatpush.bf16.msra.mxu0 %v2814_v0  ;;  %v117_v7 = vld [vmem:[%s3993_s3 + $0x8] sm:$0xff]  ;;  %v3116_v37 = vmov 32.0   ;;  %vm348_vm3 = vcmask 123904   ;;  %s3117_s21 = smov 124   ;;  %s3119_s24 = smov 96  }
   0x8   :  { %v116_v3 = vld [vmem:[%s3993_s3] sm:$0xff]  ;;  %v324_v44 = vshrl.u32 %v323_v43, 7  ;;  %s3124_s17 = smov 36  }
   0x9   :  { %v297_v55 = vld [vmem:[%s3990_s0] sm:$0x3] }
   0xa   :  { %2625 = vmatmul.msk.bf16.vlgmr.msra.gmra.mxu0 %vm90_vm0, %v2812_v1  ;;  %2864 = vset.pattern.permute.xlu2 %v324_v44  ;;  %v3232_v47 = vadd.s32 8, %v324_v44  ;;  %v298_v58 = vmul.f32 0.5, %v297_v55 }
   0xb   :  { %2866 = vset.pattern.permute.xlu1 %v324_v44 }
   0xc   :  { %2865 = vset.pattern.permute.xlu0 %v3232_v47 }
  0x1a   :  { %2626 = vmatmul.msk.bf16.gmra.mxu0 %vm90_vm0, %v2813_v2 }
  0x87   :  { %v106_v4 = vpop.f32.mrf.mxu0 }
  0x88   :  { %v118_v5 = vadd.f32 %v116_v3, %v106_v4 }
  0x8a   :  { %v122_v6 = vmul.f32 0.5, %v118_v5 }
  0x8c   :  { %2883 = vtanh.f32 %v122_v6 }
  0x8f   :  { %v108_v8 = vpop.f32.mrf.mxu0 }
  0x90   :  { %v119_v9 = vadd.f32 %v117_v7, %v108_v8 }
  0x92   :  { %v2884_v10 = vpop.eup %2883  ;;  %v123_v11 = vmul.f32 0.5, %v119_v9 }
  0x93   :  { %v130_v12 = vadd.f32 1.0, %v2884_v10 }
  0x94   :  { %2885 = vtanh.f32 %v123_v11  ;;  %v2816_v11 = vld [vmem:[%s3995_s5 + $0x8] sm:$0xff] }
  0x95   :  { %v134_v13 = vmul.f32 0.5, %v130_v12  ;;  %284 = vmatpush.bf16.msra.mxu1 %v2816_v11 }
  0x97   :  { %v111_v14 = vpop.f32.mrf.mxu0  ;;  %v138_v15 = vmul.f32 %v134_v13, %v118_v5 }
  0x98   :  { %v120_v16 = vadd.f32 %v116_v3, %v111_v14  ;;  %v2815_v14 = vld [vmem:[%s3995_s5] sm:$0xff]  ;;  %s3120_s5 = smov 64  }
  0x99   :  { %v143_v17 = vsel %vm142_vm1, %v138_v15, 0.0  ;;  %285 = vmatpush.bf16.msra.mxu1 %v2815_v14 }
  0x9a   :  { %v2886_v18 = vpop.eup %2885  ;;  %v124_v19 = vmul.f32 0.5, %v120_v16  ;;  %144 = vadd.xlane.f32.xlu0 %v143_v17 }
  0x9b   :  { %v131_v20 = vadd.f32 1.0, %v2886_v18 }
  0x9c   :  { %2887 = vtanh.f32 %v124_v19  ;;  %v3282_v19 = vld [vmem:[%s3998_s8] sm:$0xff] }
  0x9d   :  { %v135_v21 = vmul.f32 0.5, %v131_v20 }
  0x9f   :  { %v113_v22 = vpop.f32.mrf.mxu0  ;;  %v139_v23 = vmul.f32 %v135_v21, %v119_v9 }
  0xa0   :  { %v121_v24 = vadd.f32 %v117_v7, %v113_v22 }
  0xa1   :  { %v146_v25 = vsel %vm142_vm1, %v139_v23, 0.0 }
  0xa2   :  { %v2888_v26 = vpop.eup %2887  ;;  %v125_v27 = vmul.f32 0.5, %v121_v24  ;;  %147 = vadd.xlane.f32.xlu0 %v146_v25 }
  0xa3   :  { %v132_v28 = vadd.f32 1.0, %v2888_v26 }
  0xa4   :  { %2889 = vtanh.f32 %v125_v27 }
  0xa5   :  { %v136_v29 = vmul.f32 0.5, %v132_v28  ;;  %2891 = vrcp.f32 %v3116_v37 }
  0xa6   :  { %2893 = vtanh.f32 %v298_v58 }
  0xa7   :  { %v140_v30 = vmul.f32 %v136_v29, %v120_v16  ;;  %v3274_v16 = vld [vmem:[%s3998_s8 + $0x8] sm:$0xff] }
  0xa8   :  { %440 = vmatpush.msrb.mxu1 %v3274_v16  ;;  %2849 = vmatpush.msra.mxu3 %v3274_v16 }
  0xa9   :  { %v149_v31 = vsel %vm142_vm1, %v140_v30, 0.0  ;;  %405 = vmatpush.msra.mxu2 %v3274_v16 }
  0xaa   :  { %v2890_v32 = vpop.eup %2889  ;;  %150 = vadd.xlane.f32.xlu1 %v149_v31  ;;  %2850 = vmatpush.msra.mxu3 %v3282_v19 }
  0xab   :  { %v133_v33 = vadd.f32 1.0, %v2890_v32  ;;  %v2892_v38 = vpop.eup %2891  ;;  %441 = vmatpush.msrb.mxu1 %v3282_v19  ;;  %406 = vmatpush.msra.mxu2 %v3282_v19 }
  0xac   :  { %v156_v39 = vmul.f32 32.0, %v2892_v38  ;;  %vm160_vm2 = vweird.f32 %v2892_v38  ;;  %v2894_v1 = vpop.eup %2893  ;;  %1091 = vmatpush.msrb.mxu3 %v3274_v16 }
  0xad   :  { %v137_v34 = vmul.f32 0.5, %v133_v33  ;;  %v300_v4 = vadd.f32 1.0, %v2894_v1 }
  0xae   :  { %v157_v40 = vsub.f32 1.0, %v156_v39  ;;  %1092 = vmatpush.msrb.mxu3 %v3282_v19 }
  0xaf   :  { %v141_v35 = vmul.f32 %v137_v34, %v121_v24  ;;  %v301_v7 = vmul.f32 0.5, %v300_v4 }
  0xb0   :  { %v158_v41 = vmul.f32 %v2892_v38, %v157_v40 }
  0xb1   :  { %v152_v36 = vsel %vm142_vm1, %v141_v35, 0.0  ;;  %v322_v8 = vperm.slane %v301_v7, 0  ;;  %v335_v9 = vperm.slane %v301_v7, 1  ;;  %v349_v10 = vsel %vm348_vm3, %v301_v7, 0.0 }
  0xb2   :  { %153 = vadd.xlane.f32.xlu1 %v152_v36  ;;  %v159_v42 = vadd.f32 %v2892_v38, %v158_v41  ;;  %v2877_v41 = vld [vmem:[%s3994_s4] ss:$0 sm:$0xff] }
  0xb4   :  { %v3230_v45 = vsel %vm160_vm2, %v2892_v38, %v159_v42  ;;  %vm387_vm2 = vcmask 1041409  }
 0x10d   :  { %v145_v46 = vpop.xlane.xlu0 %144 }
 0x10e   :  { %v162_v48 = vmul.f32 %v3230_v45, %v145_v46 }
 0x110   :  { %v3236_v49 = vsub.f32 %v138_v15, %v162_v48 }
 0x112   :  { %v170_v50 = vmul.f32 %v3236_v49, %v3236_v49 }
 0x114   :  { %v174_v51 = vsel %vm142_vm1, %v170_v50, 0.0 }
 0x115   :  { %175 = vadd.xlane.f32.xlu2 %v174_v51  ;;  %v148_v52 = vpop.xlane.xlu0 %147 }
 0x116   :  { %v163_v53 = vmul.f32 %v3230_v45, %v148_v52 }
 0x118   :  { %v3242_v54 = vsub.f32 %v139_v23, %v163_v53 }
 0x11a   :  { %v171_v56 = vmul.f32 %v3242_v54, %v3242_v54 }
 0x11c   :  { %v177_v57 = vsel %vm142_vm1, %v171_v56, 0.0 }
 0x11d   :  { %178 = vadd.xlane.f32.xlu2 %v177_v57  ;;  %v151_v59 = vpop.xlane.xlu1 %150 }
 0x11e   :  { %v164_v60 = vmul.f32 %v3230_v45, %v151_v59 }
 0x120   :  { %v3251_v61 = vsub.f32 %v140_v30, %v164_v60 }
 0x122   :  { %v172_v62 = vmul.f32 %v3251_v61, %v3251_v61 }
 0x124   :  { %v180_v63 = vsel %vm142_vm1, %v172_v62, 0.0 }
 0x125   :  { %181 = vadd.xlane.f32.xlu0 %v180_v63  ;;  %v154_v0 = vpop.xlane.xlu1 %153 }
 0x126   :  { %v165_v2 = vmul.f32 %v3230_v45, %v154_v0 }
 0x128   :  { %v3257_v3 = vsub.f32 %v141_v35, %v165_v2 }
 0x12a   :  { %v173_v5 = vmul.f32 %v3257_v3, %v3257_v3 }
 0x12c   :  { %v183_v6 = vsel %vm142_vm1, %v173_v5, 0.0 }
 0x12d   :  { %184 = vadd.xlane.f32.xlu1 %v183_v6 }
 0x135   :  { %327 = vperm.xlu2 %2864, %v322_v8  }
 0x139   :  { %333 = vperm.xlu0 %2865, %v322_v8  }
 0x13d   :  { %2867 = vset.pattern.permute.xlu2 %v3232_v47 }
 0x141   :  { %2868 = vset.pattern.permute.xlu0 %v324_v44 }
 0x145   :  { %346 = vperm.xlu2 %2867, %v335_v9  }
 0x146   :  { %340 = vperm.xlu1 %2866, %v335_v9  }
 0x14d   :  { %2870 = vset.pattern.permute.xlu2 %v324_v44 }
 0x14e   :  { %2869 = vset.pattern.permute.xlu1 %v3232_v47 }
 0x16e   :  { %350 = vadd.xlane.f32.xlu2 %v349_v10 }
 0x188   :  { %v176_v12 = vpop.xlane.xlu2 %175 }
 0x189   :  { %v186_v13 = vmul.f32 %v176_v12, %v3230_v45 }
 0x18b   :  { %v190_v15 = vadd.f32 1e-05, %v186_v13 }
 0x18d   :  { %2895 = vrsqrt.f32 %v190_v15  ;;  %vm200_vm5 = vweird.f32 %v190_v15 }
 0x190   :  { %v179_v17 = vpop.xlane.xlu2 %178 }
 0x191   :  { %v187_v18 = vmul.f32 %v179_v17, %v3230_v45 }
 0x193   :  { %v2896_v20 = vpop.eup %2895  ;;  %v191_v21 = vadd.f32 1e-05, %v187_v18 }
 0x194   :  { %v195_v22 = vmul.f32 %v2896_v20, %v190_v15  ;;  %vm201_vm4 = vweird.f32 %v2896_v20 }
 0x195   :  { %2897 = vrsqrt.f32 %v191_v21  ;;  %vm202_vm6 = vmor %vm200_vm5, %vm201_vm4  ;;  %vm210_vm8 = vweird.f32 %v191_v21 }
 0x196   :  { %v196_v23 = vmul.f32 %v2896_v20, %v195_v22 }
 0x198   :  { %v197_v24 = vmul.f32 0.5, %v196_v23  ;;  %v182_v25 = vpop.xlane.xlu0 %181 }
 0x199   :  { %v188_v26 = vmul.f32 %v182_v25, %v3230_v45 }
 0x19a   :  { %v198_v27 = vsub.f32 1.5, %v197_v24 }
 0x19b   :  { %v2898_v28 = vpop.eup %2897  ;;  %v192_v29 = vadd.f32 1e-05, %v188_v26 }
 0x19c   :  { %v199_v30 = vmul.f32 %v2896_v20, %v198_v27  ;;  %v205_v31 = vmul.f32 %v2898_v28, %v191_v21  ;;  %vm211_vm7 = vweird.f32 %v2898_v28 }
 0x19d   :  { %2899 = vrsqrt.f32 %v192_v29  ;;  %vm212_vm9 = vmor %vm210_vm8, %vm211_vm7  ;;  %vm220_vm11 = vweird.f32 %v192_v29 }
 0x19e   :  { %v206_v32 = vmul.f32 %v2898_v28, %v205_v31  ;;  %v203_v33 = vsel %vm202_vm6, %v2896_v20, %v199_v30 }
 0x19f   :  { %v234_v39 = vmul.f32 %v203_v33, %v3236_v49  ;;  %v2878_v49 = vld [vmem:[%s3994_s4 + $0x1] ss:$0 sm:$0xff] }
 0x1a0   :  { %v207_v34 = vmul.f32 0.5, %v206_v32  ;;  %v185_v35 = vpop.xlane.xlu1 %184 }
 0x1a1   :  { %v189_v36 = vmul.f32 %v185_v35, %v3230_v45  ;;  %v3297_v45 = vpop.permute.xlu2 %327  ;;  %v240_v50 = vmul.f32 %v2877_v41, %v234_v39 }
 0x1a2   :  { %v208_v37 = vsub.f32 1.5, %v207_v34  ;;  %v354_v55 = vmul.f32 0.0625, %v3297_v45 }
 0x1a3   :  { %v2900_v38 = vpop.eup %2899  ;;  %v193_v40 = vadd.f32 1e-05, %v189_v36  ;;  %v246_v58 = vadd.f32 %v2878_v49, %v240_v50 }
 0x1a4   :  { %v209_v42 = vmul.f32 %v2898_v28, %v208_v37  ;;  %v215_v43 = vmul.f32 %v2900_v38, %v192_v29  ;;  %vm221_vm10 = vweird.f32 %v2900_v38 }
 0x1a5   :  { %2901 = vrsqrt.f32 %v193_v40  ;;  %vm222_vm12 = vmor %vm220_vm11, %vm221_vm10  ;;  %vm230_vm14 = vweird.f32 %v193_v40 }
 0x1a6   :  { %v213_v44 = vsel %vm212_vm9, %v2898_v28, %v209_v42  ;;  %v216_v46 = vmul.f32 %v2900_v38, %v215_v43  ;;  %v2881_v42 = vld [vmem:[%s3996_s6] ss:$0 sm:$0xff] }
 0x1a7   :  { %v235_v48 = vmul.f32 %v213_v44, %v3242_v54 }
 0x1a8   :  { %v217_v51 = vmul.f32 0.5, %v216_v46 }
 0x1a9   :  { %v241_v52 = vmul.f32 %v2877_v41, %v235_v48  ;;  %v3313_v10 = vpop.permute.xlu2 %346 }
 0x1aa   :  { %v218_v53 = vsub.f32 1.5, %v217_v51  ;;  %v357_v14 = vmul.f32 0.0625, %v3313_v10 }
 0x1ab   :  { %v2902_v56 = vpop.eup %2901  ;;  %v3303_v57 = vpop.permute.xlu0 %333  ;;  %v247_v59 = vadd.f32 %v2878_v49, %v241_v52 }
 0x1ac   :  { %v219_v60 = vmul.f32 %v2900_v38, %v218_v53  ;;  %v225_v54 = vmul.f32 %v2902_v56, %v193_v40  ;;  %v355_v62 = vmul.f32 0.0625, %v3303_v57  ;;  %vm231_vm13 = vweird.f32 %v2902_v56  ;;  %v3370_v53 = vld [vmem:[%s3999_s9 + $0x68] sm:$0xff] }
 0x1ad   :  { %v250_v63 = vpack.c.bf16 %v247_v59, %v246_v58  ;;  %vm232_vm15 = vmor %vm230_vm14, %vm231_vm13  ;;  %v3379_v58 = vld [vmem:[%s3999_s9 + $0x60] sm:$0xff] }
 0x1ae   :  { %v226_v0 = vmul.f32 %v2902_v56, %v225_v54  ;;  %v358_v1 = vadd.f32 %v355_v62, %v354_v55  ;;  %2639 = vmatmul.msk.f32.vlgmr.msra.gmra.mxu3 %vm90_vm0, %v355_v62  ;;  %v223_v2 = vsel %vm222_vm12, %v2900_v38, %v219_v60 }
 0x1af   :  { %2635 = vmatmul.msk.bf16.vlgmr.msra.gmra.mxu1 %vm142_vm1, %v250_v63  ;;  %1126 = vmatpush.msra.mxu3 %v3274_v16  ;;  %v236_v8 = vmul.f32 %v223_v2, %v3251_v61  ;;  %v3392_v63 = vld [vmem:[%s3999_s9 + $0x58] sm:$0xff]  ;;  %v3399_v2 = vld [vmem:[%s3999_s9 + $0x50] sm:$0xff] }
 0x1b0   :  { %v227_v4 = vmul.f32 0.5, %v226_v0  ;;  %v359_v5 = vrot.slane %v358_v1, 4  ;;  %748 = vmatpush.msra.mxu1 %v3274_v16 }
 0x1b1   :  { %1127 = vmatpush.msra.mxu3 %v3282_v19  ;;  %v242_v15 = vmul.f32 %v2877_v41, %v236_v8 }
 0x1b2   :  { %v228_v6 = vsub.f32 1.5, %v227_v4  ;;  %v360_v7 = vadd.f32 %v359_v5, %v358_v1  ;;  %749 = vmatpush.msra.mxu1 %v3282_v19 }
 0x1b3   :  { %v248_v61 = vadd.f32 %v2878_v49, %v242_v15 }
 0x1b4   :  { %v229_v9 = vmul.f32 %v2902_v56, %v228_v6  ;;  %v361_v12 = vrot.slane %v360_v7, 2  ;;  %v3406_v6 = vld [vmem:[%s3999_s9 + $0x48] sm:$0xff] }
 0x1b6   :  { %v233_v11 = vsel %vm232_vm15, %v2902_v56, %v229_v9  ;;  %v362_v21 = vadd.f32 %v361_v12, %v360_v7  ;;  %v3413_v9 = vld [vmem:[%s3999_s9 + $0x40] sm:$0xff]  ;;  %v3420_v12 = vld [vmem:[%s3999_s9 + $0x38] sm:$0xff] }
 0x1b7   :  { %v237_v13 = vmul.f32 %v233_v11, %v3257_v3 }
 0x1b8   :  { %v3317_v17 = vpop.permute.xlu1 %340  ;;  %v363_v26 = vrot.slane %v362_v21, 1 }
 0x1b9   :  { %v356_v18 = vmul.f32 0.0625, %v3317_v17  ;;  %v243_v20 = vmul.f32 %v2877_v41, %v237_v13 }
 0x1ba   :  { %v3322_v28 = vadd.f32 %v363_v26, %v362_v21  ;;  %v3451_v26 = vld [vmem:[%s3999_s9 + $0x18] sm:$0xff] }
 0x1bb   :  { %v365_v22 = vadd.f32 %v357_v14, %v356_v18  ;;  %2640 = vmatmul.msk.f32.gmra.mxu3 %vm90_vm0, %v356_v18  ;;  %v249_v23 = vadd.f32 %v2878_v49, %v243_v20  ;;  %v3361_v49 = vld [vmem:[%s3999_s9 + $0x70] sm:$0xff] }
 0x1bc   :  { %v381_v31 = vadd.f32 1e-05, %v3322_v28  ;;  %v3430_v20 = vld [vmem:[%s3999_s9 + $0x30] sm:$0xff] }
 0x1bd   :  { %v366_v24 = vrot.slane %v365_v22, 4  ;;  %v251_v25 = vpack.c.bf16 %v249_v23, %v248_v61  ;;  %v3439_v61 = vld [vmem:[%s3999_s9 + $0x28] sm:$0xff]  ;;  %v3444_v23 = vld [vmem:[%s3999_s9 + $0x20] sm:$0xff] }
 0x1be   :  { %2903 = vrcp.f32 %v381_v31 }
 0x1bf   :  { %v367_v27 = vadd.f32 %v366_v24, %v365_v22  ;;  %2636 = vmatmul.msk.bf16.gmra.mxu1 %vm142_vm1, %v251_v25 }
 0x1c1   :  { %v368_v3 = vrot.slane %v367_v27, 2 }
 0x1c3   :  { %v369_v29 = vadd.f32 %v368_v3, %v367_v27  ;;  %2641 = vmatmul.msk.f32.gmra.mxu3 %vm90_vm0, %v357_v14 }
 0x1c4   :  { %v2904_v34 = vpop.eup %2903 }
 0x1c5   :  { %v370_v30 = vrot.slane %v369_v29, 1 }
 0x1c7   :  { %v3326_v32 = vadd.f32 %v370_v30, %v369_v29  ;;  %v3461_v30 = vld [vmem:[%s3999_s9 + $0x10] sm:$0xff] }
 0x1c9   :  { %v382_v33 = vadd.f32 1e-05, %v3326_v32 }
 0x1cb   :  { %2905 = vrcp.f32 %v382_v33 }
 0x1cf   :  { %2638 = vmatmul.msk.f32.vlgmr.msrb.gmra.mxu1 %vm90_vm0, %v354_v55 }
 0x1d0   :  { %783 = vmatpush.msrb.mxu1 %v3274_v16 }
 0x1d1   :  { %v2906_v35 = vpop.eup %2905 }
 0x1d2   :  { %v388_v36 = vsel %vm387_vm2, %v2906_v35, %v2904_v34  ;;  %784 = vmatpush.msrb.mxu1 %v3282_v19  ;;  %v3348_v19 = vld [vmem:[%s3999_s9 + $0x78] sm:$0xff]  ;;  %v3472_v35 = vld [vmem:[%s3999_s9 + $0x8] sm:$0xff] }
 0x1d3   :  { %2637 = vmatmul.msk.f32.vlgmr.msra.gmra.mxu2 %vm90_vm0, %v388_v36  ;;  %543 = vmatpush.msrb.mxu0 %v3348_v19 }
 0x1d4   :  { %583 = vmatpush.msrb.mxu2 %v3348_v19 }
 0x1d5   :  { %544 = vmatpush.msrb.mxu0 %v3361_v49 }
 0x1d6   :  { %584 = vmatpush.msrb.mxu2 %v3361_v49 }
 0x1d7   :  { %545 = vmatpush.msrb.mxu0 %v3370_v53 }
 0x1d8   :  { %585 = vmatpush.msrb.mxu2 %v3370_v53 }
 0x1d9   :  { %546 = vmatpush.msrb.mxu0 %v3379_v58 }
 0x1da   :  { %586 = vmatpush.msrb.mxu2 %v3379_v58 }
 0x1db   :  { %547 = vmatpush.msrb.mxu0 %v3392_v63 }
 0x1dc   :  { %587 = vmatpush.msrb.mxu2 %v3392_v63 }
 0x1dd   :  { %548 = vmatpush.msrb.mxu0 %v3399_v2 }
 0x1de   :  { %588 = vmatpush.msrb.mxu2 %v3399_v2 }
 0x1df   :  { %549 = vmatpush.msrb.mxu0 %v3406_v6 }
 0x1e0   :  { %589 = vmatpush.msrb.mxu2 %v3406_v6 }
 0x1e1   :  { %550 = vmatpush.msrb.mxu0 %v3413_v9 }
 0x1e2   :  { %590 = vmatpush.msrb.mxu2 %v3413_v9 }
 0x1e3   :  { %551 = vmatpush.msrb.mxu0 %v3420_v12 }
 0x1e4   :  { %591 = vmatpush.msrb.mxu2 %v3420_v12 }
 0x1e5   :  { %552 = vmatpush.msrb.mxu0 %v3430_v20 }
 0x1e6   :  { %592 = vmatpush.msrb.mxu2 %v3430_v20 }
 0x1e7   :  { %553 = vmatpush.msrb.mxu0 %v3439_v61 }
 0x1e8   :  { %593 = vmatpush.msrb.mxu2 %v3439_v61 }
 0x1e9   :  { %554 = vmatpush.msrb.mxu0 %v3444_v23 }
 0x1ea   :  { %594 = vmatpush.msrb.mxu2 %v3444_v23 }
 0x1eb   :  { %555 = vmatpush.msrb.mxu0 %v3451_v26 }
 0x1ec   :  { %595 = vmatpush.msrb.mxu2 %v3451_v26 }
 0x1ed   :  { %556 = vmatpush.msrb.mxu0 %v3461_v30 }
 0x1ee   :  { %596 = vmatpush.msrb.mxu2 %v3461_v30 }
 0x1ef   :  { %557 = vmatpush.msrb.mxu0 %v3472_v35 }
 0x1f0   :  { %597 = vmatpush.msrb.mxu2 %v3472_v35 }
 0x22c   :  { %v287_v37 = vpop.f32.mrf.mxu1 }
 0x22d   :  { %v3374_v55 = vadd.f32 %v2881_v42, %v287_v37 }
 0x231   :  { %v3334_v39 = vpop.f32.mrf.mxu3 }
 0x234   :  { %v289_v38 = vpop.f32.mrf.mxu1 }
 0x235   :  { %v3365_v51 = vadd.f32 %v2881_v42, %v289_v38 }
 0x237   :  { %v456_v60 = vmul.f32 %v3334_v39, %v3365_v51 }
 0x23c   :  { %v292_v40 = vpop.f32.mrf.mxu1 }
 0x23d   :  { %v3341_v43 = vadd.f32 %v2881_v42, %v292_v40 }
 0x23e   :  { %v3336_v41 = vpop.f32.mrf.mxu3 }
 0x23f   :  { %v457_v48 = vmul.f32 %v3336_v41, %v3341_v43 }
 0x244   :  { %v294_v16 = vpop.f32.mrf.mxu1 }
 0x245   :  { %v3343_v44 = vadd.f32 %v2881_v42, %v294_v16  ;;  %v3485_v42 = vld [vmem:[%s3999_s9] sm:$0xff]  ;;  %s3125_s9 = smov [#allocation5]  }
 0x246   :  { %v3350_v46 = vpop.f32.mrf.mxu3  ;;  %598 = vmatpush.msrb.mxu2 %v3485_v42  ;;  %558 = vmatpush.msrb.mxu0 %v3485_v42  ;;  %s2601_s1 = sshll.u32 %s3125_s9, 4  ;;  %s2602_s1 = int_to_ptr.vmem [resolvable:$true] %s2601_s1 }
 0x247   :  { %v458_v50 = vmul.f32 %v3350_v46, %v3343_v44 }
 0x248   :  { %886 = vmatpush.msra.mxu0 %v3348_v19  ;;  %926 = vmatpush.msra.mxu2 %v3348_v19 }
 0x249   :  { %v466_v52 = vadd.f32 %v458_v50, %v457_v48 }
 0x24a   :  { %887 = vmatpush.msra.mxu0 %v3361_v49  ;;  %927 = vmatpush.msra.mxu2 %v3361_v49 }
 0x24b   :  { %v467_v56 = vrot.slane %v466_v52, 4 }
 0x24c   :  { %v3381_v59 = vpop.f32.mrf.mxu1  ;;  %888 = vmatpush.msra.mxu0 %v3370_v53  ;;  %928 = vmatpush.msra.mxu2 %v3370_v53 }
 0x24d   :  { %v468_v54 = vadd.f32 %v467_v56, %v466_v52  ;;  %v455_v62 = vmul.f32 %v3381_v59, %v3374_v55 }
 0x24e   :  { %889 = vmatpush.msra.mxu0 %v3379_v58  ;;  %929 = vmatpush.msra.mxu2 %v3379_v58 }
 0x24f   :  { %v469_v0 = vrot.slane %v468_v54, 2  ;;  %v459_v1 = vadd.f32 %v456_v60, %v455_v62 }
 0x250   :  { %890 = vmatpush.msra.mxu0 %v3392_v63  ;;  %930 = vmatpush.msra.mxu2 %v3392_v63 }
 0x251   :  { %v470_v4 = vadd.f32 %v469_v0, %v468_v54  ;;  %v460_v5 = vrot.slane %v459_v1, 4 }
 0x252   :  { %891 = vmatpush.msra.mxu0 %v3399_v2  ;;  %931 = vmatpush.msra.mxu2 %v3399_v2 }
 0x253   :  { %v461_v7 = vadd.f32 %v460_v5, %v459_v1  ;;  %v471_v8 = vrot.slane %v470_v4, 1 }
 0x254   :  { %892 = vmatpush.msra.mxu0 %v3406_v6  ;;  %932 = vmatpush.msra.mxu2 %v3406_v6 }
 0x255   :  { %v462_v11 = vrot.slane %v461_v7, 2  ;;  %v472_v18 = vadd.f32 %v471_v8, %v470_v4 }
 0x256   :  { %v3422_v13 = vpop.f32.mrf.mxu2  ;;  %893 = vmatpush.msra.mxu0 %v3413_v9  ;;  %933 = vmatpush.msra.mxu2 %v3413_v9 }
 0x257   :  { %v412_v14 = vrot.slane %v3422_v13, 1  ;;  %v463_v15 = vadd.f32 %v462_v11, %v461_v7 }
 0x258   :  { %894 = vmatpush.msra.mxu0 %v3420_v12  ;;  %934 = vmatpush.msra.mxu2 %v3420_v12 }
 0x259   :  { %v464_v21 = vrot.slane %v463_v15, 1  ;;  %v474_v22 = vmul.f32 %v472_v18, %v412_v14 }
 0x25a   :  { %895 = vmatpush.msra.mxu0 %v3430_v20  ;;  %935 = vmatpush.msra.mxu2 %v3430_v20 }
 0x25b   :  { %v465_v24 = vadd.f32 %v464_v21, %v463_v15  ;;  %v476_v25 = vperm.slane %v474_v22, 0 }
 0x25c   :  { %896 = vmatpush.msra.mxu0 %v3439_v61  ;;  %936 = vmatpush.msra.mxu2 %v3439_v61 }
 0x25d   :  { %v473_v27 = vmul.f32 %v465_v24, %v3422_v13  ;;  %v479_v3 = vsub.f32 %v3341_v43, %v476_v25  ;;  %v480_v29 = vsub.f32 %v3343_v44, %v476_v25 }
 0x25e   :  { %897 = vmatpush.msra.mxu0 %v3444_v23  ;;  %937 = vmatpush.msra.mxu2 %v3444_v23 }
 0x25f   :  { %v475_v31 = vperm.slane %v473_v27, 0  ;;  %v3465_v33 = vmul.f32 %v479_v3, %v479_v3  ;;  %v3467_v34 = vmul.f32 %v480_v29, %v480_v29 }
 0x260   :  { %898 = vmatpush.msra.mxu0 %v3451_v26  ;;  %938 = vmatpush.msra.mxu2 %v3451_v26 }
 0x261   :  { %v477_v36 = vsub.f32 %v3374_v55, %v475_v31  ;;  %v478_v37 = vsub.f32 %v3365_v51, %v475_v31  ;;  %v487_v38 = vmul.f32 %v3465_v33, %v3336_v41  ;;  %v488_v40 = vmul.f32 %v3467_v34, %v3350_v46 }
 0x262   :  { %899 = vmatpush.msra.mxu0 %v3461_v30  ;;  %939 = vmatpush.msra.mxu2 %v3461_v30 }
 0x263   :  { %v3489_v16 = vmul.f32 %v477_v36, %v477_v36  ;;  %v3491_v48 = vmul.f32 %v478_v37, %v478_v37  ;;  %v496_v50 = vadd.f32 %v488_v40, %v487_v38 }
 0x264   :  { %900 = vmatpush.msra.mxu0 %v3472_v35  ;;  %940 = vmatpush.msra.mxu2 %v3472_v35 }
 0x265   :  { %v485_v41 = vmul.f32 %v3489_v16, %v3381_v59  ;;  %v486_v46 = vmul.f32 %v3491_v48, %v3334_v39  ;;  %v497_v52 = vrot.slane %v496_v50, 4 }
 0x266   :  { %901 = vmatpush.msra.mxu0 %v3485_v42  ;;  %941 = vmatpush.msra.mxu2 %v3485_v42 }
 0x267   :  { %v489_v56 = vadd.f32 %v486_v46, %v485_v41  ;;  %v498_v60 = vadd.f32 %v497_v52, %v496_v50 }
 0x269   :  { %v490_v54 = vrot.slane %v489_v56, 4  ;;  %v499_v62 = vrot.slane %v498_v60, 2 }
 0x26b   :  { %v491_v59 = vadd.f32 %v490_v54, %v489_v56  ;;  %v500_v0 = vadd.f32 %v499_v62, %v498_v60  ;;  %v2880_v54 = vld [vmem:[%s3997_s7 + $0x1] ss:$0 sm:$0xff]  ;;  %v351_v62 = vpop.xlane.xlu2 %350 }
 0x26d   :  { %v492_v39 = vrot.slane %v491_v59, 2  ;;  %v501_v19 = vrot.slane %v500_v0, 1 }
 0x26f   :  { %v493_v1 = vadd.f32 %v492_v39, %v491_v59  ;;  %v502_v49 = vadd.f32 %v501_v19, %v500_v0  ;;  %v3553_v59 = vld [vmem:[%s3997_s7] ss:$0 sm:$0xff]  ;;  %s2603_s7 = sshll.u32 %s4005_s15, 4  ;;  %s2604_s7 = int_to_ptr.hbm [resolvable:$true] %s2603_s7 }
 0x270   :  { %v373_v0 = vmul.f32 %v3553_v59, %v3322_v28 }
 0x271   :  { %v494_v4 = vrot.slane %v493_v1, 1  ;;  %v504_v53 = vmul.f32 %v502_v49, %v412_v14 }
 0x273   :  { %v495_v58 = vadd.f32 %v494_v4, %v493_v1  ;;  %v3515_v5 = vadd.f32 1e-05, %v504_v53  ;;  %v374_v1 = vmul.f32 %v3553_v59, %v3326_v32 }
 0x275   :  { %v503_v63 = vmul.f32 %v495_v58, %v3422_v13  ;;  %2907 = vlog2.f32 %v3515_v5  ;;  %v533_v37 = vand.u32 2147483648, %v3515_v5  ;;  %vm527_vm8 = vweird.f32 %v3515_v5 }
 0x276   :  { %2909 = vrcp.f32 %v3515_v5  ;;  %v531_v40 = vand.u32 2147483647, %v3515_v5 }
 0x277   :  { %v505_v2 = vadd.f32 1e-05, %v503_v63  ;;  %v534_v50 = vor.u32 1.1754944e-38, %v533_v37 }
 0x278   :  { %vm532_vm10 = vcmp.eq.f32.partialorder %v531_v40, 8.507059e+37 }
 0x279   :  { %2911 = vrcp.f32 %v505_v2  ;;  %v518_v22 = vand.u32 2147483648, %v505_v2  ;;  %v516_v23 = vand.u32 2147483647, %v505_v2  ;;  %vm512_vm4 = vweird.f32 %v505_v2 }
 0x27a   :  { %2913 = vlog2.f32 %v505_v2 }
 0x27b   :  { %v2908_v6 = vpop.eup %2907  ;;  %v519_v27 = vor.u32 1.1754944e-38, %v518_v22  ;;  %vm517_vm6 = vcmp.eq.f32.partialorder %v516_v23, 8.507059e+37 }
 0x27c   :  { %v2910_v7 = vpop.eup %2909  ;;  %v575_v8 = vmul.f32 0.6931472, %v2908_v6 }
 0x27d   :  { %v523_v14 = vmul.f32 %v2910_v7, %v3515_v5  ;;  %vm528_vm7 = vweird.f32 %v2910_v7 }
 0x27e   :  { %v577_v11 = vmul.f32 0.5, %v575_v8  ;;  %vm529_vm9 = vmor %vm527_vm8, %vm528_vm7 }
 0x27f   :  { %v2912_v9 = vpop.eup %2911  ;;  %v524_v24 = vsub.f32 1.0, %v523_v14 }
 0x280   :  { %v2914_v12 = vpop.eup %2913  ;;  %v508_v13 = vmul.f32 %v2912_v9, %v505_v2  ;;  %v580_v21 = vrot.slane %v577_v11, 7  ;;  %vm513_vm3 = vweird.f32 %v2912_v9 }
 0x281   :  { %v573_v15 = vmul.f32 0.6931472, %v2914_v12  ;;  %vm514_vm5 = vmor %vm512_vm4, %vm513_vm3  ;;  %v525_v29 = vmul.f32 %v2910_v7, %v524_v24 }
 0x282   :  { %v509_v18 = vsub.f32 1.0, %v508_v13 }
 0x283   :  { %v576_v20 = vmul.f32 0.5, %v573_v15  ;;  %v526_v36 = vadd.f32 %v2910_v7, %v525_v29 }
 0x284   :  { %v510_v61 = vmul.f32 %v2912_v9, %v509_v18 }
 0x285   :  { %v581_v25 = vsel %vm387_vm2, %v580_v21, %v576_v20  ;;  %v530_v42 = vsel %vm529_vm9, %v2910_v7, %v526_v36 }
 0x286   :  { %599 = vmatmul.f32.vlgmr.msrb.gmra.mxu2 %v581_v25  ;;  %v511_v26 = vadd.f32 %v2912_v9, %v510_v61  ;;  %v535_v41 = vsel %vm532_vm10, %v534_v50, %v530_v42 }
 0x287   :  { %v536_v52 = vmul.f32 0.5, %v535_v41 }
 0x288   :  { %v515_v3 = vsel %vm514_vm5, %v2912_v9, %v511_v26 }
 0x289   :  { %v520_v30 = vsel %vm517_vm6, %v519_v27, %v515_v3  ;;  %v538_v56 = vperm.slane %v536_v52, 0 }
 0x28a   :  { %v521_v31 = vmul.f32 0.5, %v520_v30 }
 0x28b   :  { %v541_v60 = vmul.f32 %v538_v56, %v3465_v33 }
 0x28c   :  { %v537_v35 = vperm.slane %v521_v31, 0 }
 0x28e   :  { %v539_v38 = vmul.f32 %v537_v35, %v3489_v16  ;;  %v540_v46 = vmul.f32 %v537_v35, %v3491_v48  ;;  %v542_v16 = vmul.f32 %v538_v56, %v3467_v34  ;;  %v3555_v48 = vmul.f32 %v2880_v54, %v351_v62 }
 0x290   :  { %559 = vmatmul.f32.vlgmr.msrb.gmra.mxu0 %v539_v38  ;;  %v379_v33 = vsub.f32 %v373_v0, %v3555_v48  ;;  %v3561_v19 = vrot.slane %v3555_v48, 1 }
 0x292   :  { %v603_v39 = vsub.f32 0.0, %v379_v33  ;;  %v380_v4 = vsub.f32 %v374_v1, %v3561_v19 }
 0x294   :  { %v611_v34 = vand.u32 2147483647, %v603_v39  ;;  %v604_v58 = vsub.f32 0.0, %v380_v4  ;;  %v605_v18 = vmax.f32 %v603_v39, 0.0  ;;  %vm607_vm12 = vcmp.ne.f32.partialorder %v603_v39, %v603_v39 }
 0x296   :  { %v613_v49 = vsub.f32 0.0, %v611_v34  ;;  %v612_v5 = vand.u32 2147483647, %v604_v58  ;;  %v606_v36 = vmax.f32 %v604_v58, 0.0  ;;  %vm608_vm14 = vcmp.ne.f32.partialorder %v604_v58, %v604_v58 }
 0x298   :  { %562 = vmatmul.f32.gmra.mxu0 %v540_v46  ;;  %v615_v53 = vmul.f32 1.442695, %v613_v49  ;;  %v614_v2 = vsub.f32 0.0, %v612_v5 }
 0x29a   :  { %2915 = vpow2.f32 %v615_v53  ;;  %v617_v6 = vmul.f32 1.442695, %v614_v2 }
 0x2a0   :  { %565 = vmatmul.f32.gmra.mxu0 %v541_v60  ;;  %v2916_v63 = vpop.eup %2915 }
 0x2a1   :  { %v619_v28 = vadd.f32 1.0, %v2916_v63  ;;  %v622_v7 = vmul.f32 -0.5, %v2916_v63  ;;  %v625_v12 = vand.u32 2147483647, %v2916_v63 }
 0x2a3   :  { %2917 = vlog2.f32 %v619_v28  ;;  %v623_v11 = vadd.f32 1.0, %v622_v7  ;;  %vm626_vm11 = vcmp.lt.f32.partialorder %v625_v12, 0.0004427343 }
 0x2a4   :  { %2919 = vpow2.f32 %v617_v6 }
 0x2a5   :  { %v624_v14 = vmul.f32 %v2916_v63, %v623_v11 }
 0x2a8   :  { %568 = vmatmul.f32.gmra.mxu0 %v542_v16 }
 0x2a9   :  { %v2918_v8 = vpop.eup %2917 }
 0x2aa   :  { %v2920_v9 = vpop.eup %2919  ;;  %v621_v13 = vmul.f32 0.6931472, %v2918_v8 }
 0x2ab   :  { %v628_v32 = vadd.f32 1.0, %v2920_v9  ;;  %v631_v21 = vmul.f32 -0.5, %v2920_v9  ;;  %v634_v24 = vand.u32 2147483647, %v2920_v9 }
 0x2ac   :  { %v627_v15 = vsel %vm626_vm11, %v624_v14, %v621_v13 }
 0x2ad   :  { %2921 = vlog2.f32 %v628_v32  ;;  %v637_v20 = vadd.f32 %v627_v15, %v605_v18  ;;  %v632_v23 = vadd.f32 1.0, %v631_v21  ;;  %vm635_vm13 = vcmp.lt.f32.partialorder %v634_v24, 0.0004427343 }
 0x2af   :  { %v639_v61 = vsel %vm607_vm12, %v603_v39, %v637_v20  ;;  %v633_v29 = vmul.f32 %v2920_v9, %v632_v23 }
 0x2b0   :  { %v641_v25 = vsub.f32 0.0, %v639_v61 }
 0x2b3   :  { %v2922_v22 = vpop.eup %2921 }
 0x2b4   :  { %v630_v26 = vmul.f32 0.6931472, %v2922_v22 }
 0x2b6   :  { %v636_v31 = vsel %vm635_vm13, %v633_v29, %v630_v26 }
 0x2b7   :  { %v638_v38 = vadd.f32 %v636_v31, %v606_v36 }
 0x2b9   :  { %v640_v42 = vsel %vm608_vm14, %v604_v58, %v638_v38  ;;  %vm1675_vm14 = vcmask 1043456  }
 0x2ba   :  { %v642_v52 = vsub.f32 0.0, %v640_v42 }
 0x309   :  { %v600_v27 = vpop.f32.mrf.mxu2 }
 0x30a   :  { %v647_v3 = vsub.f32 %v641_v25, %v600_v27  ;;  %v644_v50 = vrot.slane %v600_v27, 1 }
 0x30c   :  { %v649_v30 = vperm.slane %v647_v3, 0  ;;  %v648_v60 = vsub.f32 %v642_v52, %v644_v50 }
 0x30d   :  { %v560_v35 = vpop.f32.mrf.mxu0 }
 0x30e   :  { %v651_v37 = vsub.f32 %v649_v30, %v560_v35  ;;  %v650_v16 = vperm.slane %v648_v60, 0 }
 0x310   :  { %v655_v40 = vsel %vm90_vm0, %v651_v37, -inf }
 0x311   :  { %656 = vmax.xlane.f32.xlu1 %v655_v40 }
 0x315   :  { %v563_v41 = vpop.f32.mrf.mxu0 }
 0x316   :  { %v652_v46 = vsub.f32 %v649_v30, %v563_v41 }
 0x318   :  { %v658_v56 = vsel %vm90_vm0, %v652_v46, -inf }
 0x319   :  { %659 = vmax.xlane.f32.xlu0 %v658_v56 }
 0x31d   :  { %v566_v54 = vpop.f32.mrf.mxu0 }
 0x31e   :  { %v653_v62 = vsub.f32 %v650_v16, %v566_v54 }
 0x320   :  { %v661_v0 = vsel %vm90_vm0, %v653_v62, -inf }
 0x321   :  { %662 = vmax.xlane.f32.xlu2 %v661_v0 }
 0x325   :  { %v569_v33 = vpop.f32.mrf.mxu0 }
 0x326   :  { %v654_v39 = vsub.f32 %v650_v16, %v569_v33 }
 0x328   :  { %v664_v34 = vsel %vm90_vm0, %v654_v39, -inf }
 0x329   :  { %665 = vmax.xlane.f32.xlu1 %v664_v34 }
 0x384   :  { %v657_v1 = vpop.xlane.xlu1 %656 }
 0x385   :  { %v667_v49 = vsub.f32 %v651_v37, %v657_v1 }
 0x387   :  { %v671_v4 = vmul.f32 1.442695, %v667_v49 }
 0x389   :  { %2923 = vpow2.f32 %v671_v4 }
 0x38c   :  { %v660_v53 = vpop.xlane.xlu0 %659 }
 0x38d   :  { %v668_v58 = vsub.f32 %v652_v46, %v660_v53 }
 0x38f   :  { %v2924_v5 = vpop.eup %2923  ;;  %v673_v63 = vmul.f32 1.442695, %v668_v58 }
 0x390   :  { %v679_v2 = vsel %vm90_vm0, %v2924_v5, 0.0 }
 0x391   :  { %2925 = vpow2.f32 %v673_v63  ;;  %680 = vadd.xlane.f32.xlu2 %v679_v2 }
 0x394   :  { %v663_v28 = vpop.xlane.xlu2 %662 }
 0x395   :  { %v669_v6 = vsub.f32 %v653_v62, %v663_v28 }
 0x397   :  { %v2926_v7 = vpop.eup %2925  ;;  %v675_v8 = vmul.f32 1.442695, %v669_v6 }
 0x398   :  { %v682_v9 = vsel %vm90_vm0, %v2926_v7, 0.0 }
 0x399   :  { %2927 = vpow2.f32 %v675_v8  ;;  %683 = vadd.xlane.f32.xlu1 %v682_v9 }
 0x39c   :  { %v666_v11 = vpop.xlane.xlu1 %665 }
 0x39d   :  { %v670_v12 = vsub.f32 %v654_v39, %v666_v11 }
 0x39f   :  { %v2928_v13 = vpop.eup %2927  ;;  %v677_v32 = vmul.f32 1.442695, %v670_v12 }
 0x3a0   :  { %v685_v14 = vsel %vm90_vm0, %v2928_v13, 0.0 }
 0x3a1   :  { %2929 = vpow2.f32 %v677_v32  ;;  %686 = vadd.xlane.f32.xlu2 %v685_v14 }
 0x3a7   :  { %v2930_v15 = vpop.eup %2929 }
 0x3a8   :  { %v688_v18 = vsel %vm90_vm0, %v2930_v15, 0.0 }
 0x3a9   :  { %689 = vadd.xlane.f32.xlu0 %v688_v18 }
 0x404   :  { %v681_v20 = vpop.xlane.xlu2 %680 }
 0x405   :  { %2931 = vrcp.f32 %v681_v20 }
 0x40b   :  { %v2932_v22 = vpop.eup %2931 }
 0x40c   :  { %v684_v21 = vpop.xlane.xlu1 %683  ;;  %v695_v61 = vmul.f32 %v2932_v22, %v2924_v5 }
 0x40d   :  { %2933 = vrcp.f32 %v684_v21 }
 0x40e   :  { %v699_v24 = vmul.f32 %v695_v61, %v3297_v45 }
 0x410   :  { %v703_v3 = vsel %vm90_vm0, %v699_v24, 0.0 }
 0x413   :  { %v2934_v23 = vpop.eup %2933 }
 0x414   :  { %v696_v25 = vmul.f32 %v2934_v23, %v2926_v7  ;;  %v687_v26 = vpop.xlane.xlu2 %686 }
 0x415   :  { %2935 = vrcp.f32 %v687_v26 }
 0x416   :  { %v700_v27 = vmul.f32 %v696_v25, %v3303_v57 }
 0x418   :  { %v704_v29 = vsel %vm90_vm0, %v700_v27, 0.0 }
 0x419   :  { %v705_v30 = vadd.f32 %v704_v29, %v703_v3 }
 0x41b   :  { %v706_v31 = vrot.slane %v705_v30, 4  ;;  %v2936_v36 = vpop.eup %2935 }
 0x41c   :  { %v690_v35 = vpop.xlane.xlu0 %689  ;;  %v697_v38 = vmul.f32 %v2936_v36, %v2928_v13 }
 0x41d   :  { %2937 = vrcp.f32 %v690_v35  ;;  %v707_v37 = vadd.f32 %v706_v31, %v705_v30 }
 0x41e   :  { %v701_v50 = vmul.f32 %v697_v38, %v3317_v17 }
 0x41f   :  { %v708_v42 = vrot.slane %v707_v37, 2 }
 0x420   :  { %v712_v56 = vsel %vm90_vm0, %v701_v50, 0.0 }
 0x421   :  { %v709_v52 = vadd.f32 %v708_v42, %v707_v37 }
 0x423   :  { %v2938_v40 = vpop.eup %2937  ;;  %v710_v62 = vrot.slane %v709_v52, 1 }
 0x424   :  { %v698_v41 = vmul.f32 %v2938_v40, %v2930_v15 }
 0x425   :  { %v3582_v39 = vadd.f32 %v710_v62, %v709_v52 }
 0x426   :  { %v702_v46 = vmul.f32 %v698_v41, %v3313_v10 }
 0x427   :  { %v725_v49 = vadd.f32 1e-05, %v3582_v39 }
 0x428   :  { %v713_v60 = vsel %vm90_vm0, %v702_v46, 0.0 }
 0x429   :  { %v714_v16 = vadd.f32 %v713_v60, %v712_v56  ;;  %2939 = vrcp.f32 %v725_v49 }
 0x42b   :  { %v715_v54 = vrot.slane %v714_v16, 4 }
 0x42d   :  { %v716_v0 = vadd.f32 %v715_v54, %v714_v16 }
 0x42f   :  { %v717_v33 = vrot.slane %v716_v0, 2  ;;  %v2940_v58 = vpop.eup %2939 }
 0x431   :  { %v718_v34 = vadd.f32 %v717_v33, %v716_v0 }
 0x433   :  { %v719_v1 = vrot.slane %v718_v34, 1 }
 0x435   :  { %v3585_v4 = vadd.f32 %v719_v1, %v718_v34 }
 0x437   :  { %v726_v53 = vadd.f32 1e-05, %v3585_v4 }
 0x439   :  { %2941 = vrcp.f32 %v726_v53 }
 0x43f   :  { %v2942_v5 = vpop.eup %2941 }
 0x440   :  { %v731_v63 = vsel %vm387_vm2, %v2942_v5, %v2940_v58 }
 0x441   :  { %2642 = vmatmul.msk.f32.vlgmr.msra.gmra.mxu1 %vm90_vm0, %v731_v63 }
 0x449   :  { %2643 = vmatmul.msk.f32.vlgmr.msrb.gmra.mxu1 %vm90_vm0, %v699_v24 }
 0x451   :  { %2644 = vmatmul.msk.f32.gmra.mxu1 %vm90_vm0, %v700_v27 }
 0x459   :  { %2645 = vmatmul.msk.f32.gmra.mxu1 %vm90_vm0, %v701_v50 }
 0x461   :  { %2646 = vmatmul.msk.f32.gmra.mxu1 %vm90_vm0, %v702_v46 }
 0x4be   :  { %v3594_v2 = vpop.f32.mrf.mxu1 }
 0x4bf   :  { %v755_v50 = vrot.slane %v3594_v2, 1 }
 0x4c6   :  { %v786_v28 = vpop.f32.mrf.mxu1 }
 0x4c7   :  { %v798_v7 = vmul.f32 %v786_v28, %v3374_v55 }
 0x4ce   :  { %v789_v6 = vpop.f32.mrf.mxu1 }
 0x4cf   :  { %v799_v8 = vmul.f32 %v789_v6, %v3365_v51 }
 0x4d1   :  { %v802_v9 = vadd.f32 %v799_v8, %v798_v7 }
 0x4d3   :  { %v803_v11 = vrot.slane %v802_v9, 4 }
 0x4d5   :  { %v804_v12 = vadd.f32 %v803_v11, %v802_v9 }
 0x4d6   :  { %v792_v13 = vpop.f32.mrf.mxu1 }
 0x4d7   :  { %v805_v32 = vrot.slane %v804_v12, 2  ;;  %v800_v22 = vmul.f32 %v792_v13, %v3341_v43 }
 0x4d9   :  { %v806_v14 = vadd.f32 %v805_v32, %v804_v12 }
 0x4db   :  { %v807_v15 = vrot.slane %v806_v14, 1 }
 0x4dd   :  { %v808_v18 = vadd.f32 %v807_v15, %v806_v14 }
 0x4de   :  { %v795_v20 = vpop.f32.mrf.mxu1 }
 0x4df   :  { %v816_v21 = vmul.f32 %v808_v18, %v3594_v2  ;;  %v801_v61 = vmul.f32 %v795_v20, %v3343_v44 }
 0x4e1   :  { %v818_v23 = vperm.slane %v816_v21, 0  ;;  %v809_v24 = vadd.f32 %v801_v61, %v800_v22 }
 0x4e3   :  { %v820_v25 = vsub.f32 %v3374_v55, %v818_v23  ;;  %v821_v26 = vsub.f32 %v3365_v51, %v818_v23  ;;  %v810_v27 = vrot.slane %v809_v24, 4 }
 0x4e5   :  { %v824_v3 = vmul.f32 %v820_v25, %v820_v25  ;;  %v3603_v29 = vmul.f32 %v821_v26, %v821_v26  ;;  %v811_v30 = vadd.f32 %v810_v27, %v809_v24 }
 0x4e7   :  { %v828_v31 = vmul.f32 %v824_v3, %v786_v28  ;;  %v829_v35 = vmul.f32 %v3603_v29, %v789_v6  ;;  %v812_v36 = vrot.slane %v811_v30, 2 }
 0x4e9   :  { %v832_v37 = vadd.f32 %v829_v35, %v828_v31  ;;  %v813_v38 = vadd.f32 %v812_v36, %v811_v30 }
 0x4eb   :  { %v833_v40 = vrot.slane %v832_v37, 4  ;;  %v814_v42 = vrot.slane %v813_v38, 1 }
 0x4ed   :  { %v834_v41 = vadd.f32 %v833_v40, %v832_v37  ;;  %v815_v46 = vadd.f32 %v814_v42, %v813_v38 }
 0x4ef   :  { %v835_v52 = vrot.slane %v834_v41, 2  ;;  %v817_v56 = vmul.f32 %v815_v46, %v755_v50 }
 0x4f1   :  { %v836_v60 = vadd.f32 %v835_v52, %v834_v41  ;;  %v819_v16 = vperm.slane %v817_v56, 0 }
 0x4f3   :  { %v837_v54 = vrot.slane %v836_v60, 1  ;;  %v822_v62 = vsub.f32 %v3341_v43, %v819_v16  ;;  %v823_v0 = vsub.f32 %v3343_v44, %v819_v16 }
 0x4f5   :  { %v838_v33 = vadd.f32 %v837_v54, %v836_v60  ;;  %v3609_v34 = vmul.f32 %v822_v62, %v822_v62  ;;  %v3611_v1 = vmul.f32 %v823_v0, %v823_v0 }
 0x4f7   :  { %v846_v49 = vmul.f32 %v838_v33, %v3594_v2  ;;  %v830_v53 = vmul.f32 %v3609_v34, %v792_v13  ;;  %v831_v58 = vmul.f32 %v3611_v1, %v795_v20 }
 0x4f9   :  { %v848_v5 = vadd.f32 1e-05, %v846_v49  ;;  %v839_v63 = vadd.f32 %v831_v58, %v830_v53  ;;  %v722_v58 = vmul.f32 %v3553_v59, %v3585_v4 }
 0x4fb   :  { %2943 = vrcp.f32 %v848_v5  ;;  %v840_v28 = vrot.slane %v839_v63, 4  ;;  %v861_v15 = vand.u32 2147483648, %v848_v5  ;;  %v859_v2 = vand.u32 2147483647, %v848_v5 }
 0x4fc   :  { %vm855_vm3 = vweird.f32 %v848_v5  ;;  %2945 = vlog2.f32 %v848_v5 }
 0x4fd   :  { %v841_v6 = vadd.f32 %v840_v28, %v839_v63  ;;  %v862_v22 = vor.u32 1.1754944e-38, %v861_v15  ;;  %vm860_vm5 = vcmp.eq.f32.partialorder %v859_v2, 8.507059e+37  ;;  %v724_v63 = vsub.f32 %v722_v58, %v3561_v19 }
 0x4ff   :  { %v842_v7 = vrot.slane %v841_v6, 2 }
 0x501   :  { %v2944_v8 = vpop.eup %2943  ;;  %v843_v9 = vadd.f32 %v842_v7, %v841_v6  ;;  %v947_v6 = vsub.f32 0.0, %v724_v63 }
 0x502   :  { %v851_v11 = vmul.f32 %v2944_v8, %v848_v5  ;;  %vm856_vm15 = vweird.f32 %v2944_v8  ;;  %v2946_v26 = vpop.eup %2945 }
 0x503   :  { %v844_v12 = vrot.slane %v843_v9, 1  ;;  %vm857_vm4 = vmor %vm855_vm3, %vm856_vm15  ;;  %v916_v36 = vmul.f32 0.6931472, %v2946_v26  ;;  %vm951_vm13 = vcmp.ne.f32.partialorder %v947_v6, %v947_v6  ;;  %vm1641_vm15 = vcmask 31744  }
 0x504   :  { %v852_v32 = vsub.f32 1.0, %v851_v11 }
 0x505   :  { %v845_v14 = vadd.f32 %v844_v12, %v843_v9  ;;  %v919_v46 = vmul.f32 0.5, %v916_v36  ;;  %v949_v36 = vmax.f32 %v947_v6, 0.0 }
 0x506   :  { %v853_v18 = vmul.f32 %v2944_v8, %v852_v32 }
 0x507   :  { %v847_v21 = vmul.f32 %v845_v14, %v755_v50 }
 0x508   :  { %v854_v13 = vadd.f32 %v2944_v8, %v853_v18 }
 0x509   :  { %v849_v20 = vadd.f32 1e-05, %v847_v21 }
 0x50a   :  { %v858_v61 = vsel %vm857_vm4, %v2944_v8, %v854_v13  ;;  %v955_v8 = vand.u32 2147483647, %v947_v6 }
 0x50b   :  { %2947 = vrcp.f32 %v849_v20  ;;  %v863_v23 = vsel %vm860_vm5, %v862_v22, %v858_v61  ;;  %v876_v42 = vand.u32 2147483648, %v849_v20  ;;  %v874_v41 = vand.u32 2147483647, %v849_v20 }
 0x50c   :  { %v864_v24 = vmul.f32 0.5, %v863_v23  ;;  %2949 = vlog2.f32 %v849_v20  ;;  %vm870_vm7 = vweird.f32 %v849_v20 }
 0x50d   :  { %v877_v16 = vor.u32 1.1754944e-38, %v876_v42  ;;  %vm875_vm9 = vcmp.eq.f32.partialorder %v874_v41, 8.507059e+37 }
 0x50e   :  { %v880_v25 = vperm.slane %v864_v24, 0 }
 0x510   :  { %v882_v27 = vmul.f32 %v880_v25, %v824_v3  ;;  %v883_v56 = vmul.f32 %v880_v25, %v3603_v29  ;;  %v721_v29 = vmul.f32 %v3553_v59, %v3582_v39 }
 0x511   :  { %v2948_v30 = vpop.eup %2947 }
 0x512   :  { %v2950_v31 = vpop.eup %2949  ;;  %902 = vmatmul.f32.vlgmr.msra.gmra.mxu0 %v882_v27  ;;  %v866_v35 = vmul.f32 %v2948_v30, %v849_v20  ;;  %vm871_vm6 = vweird.f32 %v2948_v30  ;;  %v723_v5 = vsub.f32 %v721_v29, %v3555_v48 }
 0x513   :  { %v918_v37 = vmul.f32 0.6931472, %v2950_v31  ;;  %vm872_vm8 = vmor %vm870_vm7, %vm871_vm6 }
 0x514   :  { %v867_v38 = vsub.f32 1.0, %v866_v35  ;;  %v946_v28 = vsub.f32 0.0, %v723_v5 }
 0x515   :  { %v920_v40 = vmul.f32 0.5, %v918_v37 }
 0x516   :  { %v868_v50 = vmul.f32 %v2948_v30, %v867_v38  ;;  %v954_v7 = vand.u32 2147483647, %v946_v28  ;;  %vm950_vm12 = vcmp.ne.f32.partialorder %v946_v28, %v946_v28 }
 0x517   :  { %v923_v52 = vrot.slane %v920_v40, 7 }
 0x518   :  { %v869_v60 = vadd.f32 %v2948_v30, %v868_v50  ;;  %v956_v9 = vsub.f32 0.0, %v954_v7 }
 0x519   :  { %v924_v3 = vsel %vm387_vm2, %v923_v52, %v919_v46 }
 0x51a   :  { %942 = vmatmul.f32.vlgmr.msra.gmra.mxu2 %v924_v3  ;;  %905 = vmatmul.f32.gmra.mxu0 %v883_v56  ;;  %v873_v54 = vsel %vm872_vm8, %v2948_v30, %v869_v60  ;;  %v958_v11 = vmul.f32 1.442695, %v956_v9  ;;  %v948_v30 = vmax.f32 %v946_v28, 0.0 }
 0x51b   :  { %v878_v62 = vsel %vm875_vm9, %v877_v16, %v873_v54 }
 0x51c   :  { %v879_v0 = vmul.f32 0.5, %v878_v62  ;;  %2951 = vpow2.f32 %v958_v11 }
 0x51e   :  { %v881_v33 = vperm.slane %v879_v0, 0 }
 0x520   :  { %v884_v49 = vmul.f32 %v881_v33, %v3609_v34  ;;  %v885_v53 = vmul.f32 %v881_v33, %v3611_v1  ;;  %v957_v34 = vsub.f32 0.0, %v955_v8 }
 0x522   :  { %908 = vmatmul.f32.gmra.mxu0 %v884_v49  ;;  %v960_v12 = vmul.f32 1.442695, %v957_v34  ;;  %v2952_v1 = vpop.eup %2951 }
 0x523   :  { %v962_v39 = vadd.f32 1.0, %v2952_v1  ;;  %v965_v4 = vmul.f32 -0.5, %v2952_v1  ;;  %v968_v13 = vand.u32 2147483647, %v2952_v1 }
 0x524   :  { %2953 = vpow2.f32 %v960_v12 }
 0x525   :  { %2955 = vlog2.f32 %v962_v39  ;;  %v966_v2 = vadd.f32 1.0, %v965_v4  ;;  %vm969_vm10 = vcmp.lt.f32.partialorder %v968_v13, 0.0004427343 }
 0x527   :  { %v967_v24 = vmul.f32 %v2952_v1, %v966_v2 }
 0x52a   :  { %911 = vmatmul.f32.gmra.mxu0 %v885_v53  ;;  %v2954_v32 = vpop.eup %2953 }
 0x52b   :  { %v971_v14 = vadd.f32 1.0, %v2954_v32  ;;  %v974_v15 = vmul.f32 -0.5, %v2954_v32  ;;  %v2956_v18 = vpop.eup %2955  ;;  %v977_v23 = vand.u32 2147483647, %v2954_v32 }
 0x52c   :  { %v964_v20 = vmul.f32 0.6931472, %v2956_v18 }
 0x52d   :  { %2957 = vlog2.f32 %v971_v14  ;;  %v975_v22 = vadd.f32 1.0, %v974_v15  ;;  %vm978_vm11 = vcmp.lt.f32.partialorder %v977_v23, 0.0004427343 }
 0x52e   :  { %v970_v26 = vsel %vm969_vm10, %v967_v24, %v964_v20 }
 0x52f   :  { %v976_v27 = vmul.f32 %v2954_v32, %v975_v22  ;;  %v980_v35 = vadd.f32 %v970_v26, %v948_v30 }
 0x531   :  { %v982_v40 = vsel %vm950_vm12, %v946_v28, %v980_v35 }
 0x532   :  { %v984_v50 = vsub.f32 0.0, %v982_v40 }
 0x533   :  { %v2958_v21 = vpop.eup %2957 }
 0x534   :  { %v973_v25 = vmul.f32 0.6931472, %v2958_v21 }
 0x536   :  { %v979_v31 = vsel %vm978_vm11, %v976_v27, %v973_v25 }
 0x537   :  { %v981_v38 = vadd.f32 %v979_v31, %v949_v36 }
 0x539   :  { %v983_v42 = vsel %vm951_vm13, %v947_v6, %v981_v38 }
 0x53a   :  { %v985_v56 = vsub.f32 0.0, %v983_v42 }
 0x58f   :  { %v903_v61 = vpop.f32.mrf.mxu0 }
 0x597   :  { %v906_v37 = vpop.f32.mrf.mxu0 }
 0x59d   :  { %v943_v41 = vpop.f32.mrf.mxu2 }
 0x59e   :  { %v987_v46 = vrot.slane %v943_v41, 1  ;;  %v990_v52 = vsub.f32 %v984_v50, %v943_v41 }
 0x59f   :  { %v909_v60 = vpop.f32.mrf.mxu0 }
 0x5a0   :  { %v992_v3 = vperm.slane %v990_v52, 0  ;;  %v991_v16 = vsub.f32 %v985_v56, %v987_v46 }
 0x5a2   :  { %v993_v54 = vperm.slane %v991_v16, 0  ;;  %v995_v62 = vsub.f32 %v992_v3, %v906_v37  ;;  %v994_v0 = vsub.f32 %v992_v3, %v903_v61 }
 0x5a4   :  { %v996_v33 = vsub.f32 %v993_v54, %v909_v60  ;;  %v1001_v49 = vsel %vm90_vm0, %v995_v62, -inf  ;;  %v998_v53 = vsel %vm90_vm0, %v994_v0, -inf }
 0x5a5   :  { %1002 = vmax.xlane.f32.xlu2 %v1001_v49  ;;  %999 = vmax.xlane.f32.xlu1 %v998_v53 }
 0x5a6   :  { %v1004_v29 = vsel %vm90_vm0, %v996_v33, -inf }
 0x5a7   :  { %1005 = vmax.xlane.f32.xlu0 %v1004_v29  ;;  %v912_v58 = vpop.f32.mrf.mxu0 }
 0x5a8   :  { %v997_v5 = vsub.f32 %v993_v54, %v912_v58 }
 0x5aa   :  { %v1007_v63 = vsel %vm90_vm0, %v997_v5, -inf }
 0x5ad   :  { %1008 = vmax.xlane.f32.xlu1 %v1007_v63 }
 0x618   :  { %v1003_v28 = vpop.xlane.xlu2 %1002  ;;  %v1000_v6 = vpop.xlane.xlu1 %999 }
 0x619   :  { %v1011_v7 = vsub.f32 %v995_v62, %v1003_v28  ;;  %v1010_v8 = vsub.f32 %v994_v0, %v1000_v6 }
 0x61a   :  { %v1006_v9 = vpop.xlane.xlu0 %1005 }
 0x61b   :  { %v1016_v34 = vmul.f32 1.442695, %v1011_v7  ;;  %v1014_v11 = vmul.f32 1.442695, %v1010_v8  ;;  %v1012_v12 = vsub.f32 %v996_v33, %v1006_v9 }
 0x61d   :  { %2959 = vpow2.f32 %v1016_v34  ;;  %v1018_v1 = vmul.f32 1.442695, %v1012_v12 }
 0x61e   :  { %2961 = vpow2.f32 %v1014_v11 }
 0x61f   :  { %2963 = vpow2.f32 %v1018_v1 }
 0x620   :  { %v1009_v32 = vpop.xlane.xlu1 %1008 }
 0x621   :  { %v1013_v39 = vsub.f32 %v997_v5, %v1009_v32 }
 0x623   :  { %v2960_v14 = vpop.eup %2959  ;;  %v1020_v4 = vmul.f32 1.442695, %v1013_v39 }
 0x624   :  { %v2962_v15 = vpop.eup %2961  ;;  %v1025_v18 = vsel %vm90_vm0, %v2960_v14, 0.0 }
 0x625   :  { %v2964_v2 = vpop.eup %2963  ;;  %2965 = vpow2.f32 %v1020_v4  ;;  %v1022_v21 = vsel %vm90_vm0, %v2962_v15, 0.0  ;;  %1026 = vadd.xlane.f32.xlu0 %v1025_v18 }
 0x626   :  { %1023 = vadd.xlane.f32.xlu2 %v1022_v21  ;;  %v1028_v13 = vsel %vm90_vm0, %v2964_v2, 0.0  ;;  %v3659_v21 = vld [vmem:[%s4002_s12] sm:$0xff] }
 0x627   :  { %1029 = vadd.xlane.f32.xlu1 %v1028_v13  ;;  %v3664_v13 = vld [vmem:[%s4002_s12 + $0x8] sm:$0xff] }
 0x62b   :  { %v2966_v20 = vpop.eup %2965 }
 0x62c   :  { %v1031_v22 = vsel %vm90_vm0, %v2966_v20, 0.0 }
 0x62e   :  { %1032 = vadd.xlane.f32.xlu2 %v1031_v22  ;;  %v2768_v22 = vld [vmem:[#allocation2 + $0xf0] sm:$0xf0] }
 0x698   :  { %v1027_v61 = vpop.xlane.xlu0 %1026 }
 0x699   :  { %v1024_v23 = vpop.xlane.xlu2 %1023  ;;  %2967 = vrcp.f32 %v1027_v61  ;;  %v2766_v61 = vld [vmem:[#allocation2 + $0xe0] sm:$0xf] }
 0x69a   :  { %2969 = vrcp.f32 %v1024_v23  ;;  %v1030_v24 = vpop.xlane.xlu1 %1029 }
 0x69b   :  { %2971 = vrcp.f32 %v1030_v24  ;;  %v2847_v24 = vld [vmem:[#allocation2 + $0xec] sm:$0xf0] }
 0x69f   :  { %v2968_v25 = vpop.eup %2967 }
 0x6a0   :  { %v2970_v26 = vpop.eup %2969  ;;  %v1039_v27 = vmul.f32 %v2968_v25, %v2960_v14  ;;  %v2774_v25 = vld [vmem:[#allocation2 + $0xe8] sm:$0xf] }
 0x6a1   :  { %v1038_v30 = vmul.f32 %v2970_v26, %v2962_v15  ;;  %v1033_v31 = vpop.xlane.xlu2 %1032  ;;  %v2972_v35 = vpop.eup %2971  ;;  %v2848_v26 = vld [vmem:[#allocation2 + $0xf4] sm:$0xf0] }
 0x6a2   :  { %v1043_v36 = vmul.f32 %v1039_v27, %v3303_v57  ;;  %2973 = vrcp.f32 %v1033_v31  ;;  %v1040_v42 = vmul.f32 %v2972_v35, %v2964_v2  ;;  %v2767_v27 = vor.u32 %v2847_v24, %v2766_v61  ;;  %v2846_v31 = vld [vmem:[#allocation2 + $0xec] sm:$0xf]  ;;  %v2776_v35 = vld [vmem:[#allocation2 + $0xf8] sm:$0xf0] }
 0x6a3   :  { %v1042_v37 = vmul.f32 %v1038_v30, %v3297_v45  ;;  %v2775_v30 = vor.u32 %v2848_v26, %v2774_v25  ;;  %v2830_v61 = vld [vmem:[#allocation2 + $0x6c] sm:$0xf]  ;;  %v2825_v25 = vld [vmem:[#allocation2 + $0x44] sm:$0xf]  ;;  %v2688_v26 = vld [vmem:[#allocation2 + $0x50] sm:$0xf0] }
 0x6a4   :  { %v1047_v38 = vsel %vm90_vm0, %v1043_v36, 0.0  ;;  %v1044_v52 = vmul.f32 %v1040_v42, %v3317_v17  ;;  %1363 = vmatpush.bf16.msra.mxu1 %v2767_v27  ;;  %v2686_v27 = vld [vmem:[#allocation2 + $0x40] sm:$0xf] }
 0x6a5   :  { %v1046_v40 = vsel %vm90_vm0, %v1042_v37, 0.0  ;;  %1389 = vmatpush.bf16.msrb.mxu0 %v2775_v30  ;;  %v2691_v30 = vor.u32 %v2825_v25, %v2688_v26 }
 0x6a6   :  { %v1048_v50 = vadd.f32 %v1047_v38, %v1046_v40  ;;  %v1055_v57 = vsel %vm90_vm0, %v1044_v52, 0.0  ;;  %v2752_v38 = vld [vmem:[#allocation2 + $0xd0] sm:$0xf0]  ;;  %v2750_v40 = vld [vmem:[#allocation2 + $0xc0] sm:$0xf] }
 0x6a8   :  { %v2974_v41 = vpop.eup %2973  ;;  %v1049_v46 = vrot.slane %v1048_v50, 4 }
 0x6a9   :  { %v1041_v56 = vmul.f32 %v2974_v41, %v2966_v20  ;;  %v2871_v20 = vpack.i.bf16 %v3659_v21, %v3664_v13  ;;  %v2758_v41 = vld [vmem:[#allocation2 + $0xc8] sm:$0xf] }
 0x6aa   :  { %v1050_v60 = vadd.f32 %v1049_v46, %v1048_v50  ;;  %v2843_v50 = vld [vmem:[#allocation2 + $0xcc] sm:$0xf0]  ;;  %v2844_v46 = vld [vmem:[#allocation2 + $0xd4] sm:$0xf0] }
 0x6ab   :  { %v1045_v3 = vmul.f32 %v1041_v56, %v3313_v10  ;;  %v2751_v56 = vor.u32 %v2843_v50, %v2750_v40  ;;  %v2696_v50 = vld [vmem:[#allocation2 + $0x58] sm:$0xf0] }
 0x6ac   :  { %v1051_v16 = vrot.slane %v1050_v60, 2 }
 0x6ad   :  { %v1056_v54 = vsel %vm90_vm0, %v1045_v3, 0.0  ;;  %1364 = vmatpush.bf16.msra.mxu1 %v2751_v56 }
 0x6ae   :  { %v1052_v45 = vadd.f32 %v1051_v16, %v1050_v60  ;;  %v1057_v62 = vadd.f32 %v1056_v54, %v1055_v57  ;;  %v2759_v60 = vor.u32 %v2844_v46, %v2758_v41  ;;  %v2760_v16 = vld [vmem:[#allocation2 + $0xd8] sm:$0xf0]  ;;  %v2837_v54 = vld [vmem:[#allocation2 + $0xa4] sm:$0xf] }
 0x6b0   :  { %v1053_v0 = vrot.slane %v1052_v45, 1  ;;  %v1058_v33 = vrot.slane %v1057_v62, 4  ;;  %1390 = vmatpush.bf16.msrb.mxu0 %v2759_v60  ;;  %v2821_v60 = vld [vmem:[#allocation2 + $0x24] sm:$0xf] }
 0x6b2   :  { %v1054_v49 = vadd.f32 %v1053_v0, %v1052_v45  ;;  %v1059_v53 = vadd.f32 %v1058_v33, %v1057_v62  ;;  %v2736_v45 = vld [vmem:[#allocation2 + $0xb0] sm:$0xf0]  ;;  %v2734_v62 = vld [vmem:[#allocation2 + $0xa0] sm:$0xf]  ;;  %v2839_v33 = vld [vmem:[#allocation2 + $0xac] sm:$0xf0] }
 0x6b3   :  { %v2739_v0 = vor.u32 %v2837_v54, %v2736_v45  ;;  %v2823_v45 = vld [vmem:[#allocation2 + $0x2c] sm:$0xf0] }
 0x6b4   :  { %v1060_v29 = vrot.slane %v1059_v53, 2  ;;  %v1064_v58 = vmul.f32 %v3553_v59, %v1054_v49  ;;  %v1068_v10 = vadd.f32 1e-05, %v1054_v49  ;;  %v2742_v49 = vld [vmem:[#allocation2 + $0xa8] sm:$0xf] }
 0x6b6   :  { %v1061_v5 = vadd.f32 %v1060_v29, %v1059_v53  ;;  %v1066_v17 = vsub.f32 %v1064_v58, %v3555_v48  ;;  %v2840_v53 = vld [vmem:[#allocation2 + $0xb4] sm:$0xf0]  ;;  %v2735_v29 = vor.u32 %v2839_v33, %v2734_v62  ;;  %v2678_v62 = vld [vmem:[#allocation2 + $0x28] sm:$0xf] }
 0x6b7   :  { %v2743_v58 = vor.u32 %v2840_v53, %v2742_v49  ;;  %v2822_v53 = vld [vmem:[#allocation2 + $0x2c] sm:$0xf] }
 0x6b8   :  { %v1062_v63 = vrot.slane %v1061_v5, 1  ;;  %v1544_v28 = vmul.f32 0.5, %v1066_v17  ;;  %v2744_v17 = vld [vmem:[#allocation2 + $0xb8] sm:$0xf0]  ;;  %1365 = vmatpush.bf16.msra.mxu1 %v2735_v29 }
 0x6b9   :  { %1391 = vmatpush.bf16.msrb.mxu0 %v2743_v58  ;;  %v2680_v29 = vld [vmem:[#allocation2 + $0x38] sm:$0xf0]  ;;  %v2817_v58 = vld [vmem:[#allocation2 + $0x4] sm:$0xf] }
 0x6ba   :  { %v1063_v6 = vadd.f32 %v1062_v63, %v1061_v5  ;;  %2975 = vtanh.f32 %v1544_v28  ;;  %v2838_v5 = vld [vmem:[#allocation2 + $0xac] sm:$0xf]  ;;  %v2833_v28 = vld [vmem:[#allocation2 + $0x84] sm:$0xf] }
 0x6bb   :  { %2977 = vrcp.f32 %v1068_v10  ;;  %v2747_v63 = vor.u32 %v2838_v5, %v2744_v17  ;;  %v2720_v10 = vld [vmem:[#allocation2 + $0x90] sm:$0xf0]  ;;  %v2654_v17 = vld [vmem:[#allocation2] sm:$0xf] }
 0x6bc   :  { %v1069_v7 = vadd.f32 1e-05, %v1063_v6  ;;  %v1065_v8 = vmul.f32 %v3553_v59, %v1063_v6  ;;  %v2718_v6 = vld [vmem:[#allocation2 + $0x80] sm:$0xf]  ;;  %v2656_v5 = vld [vmem:[#allocation2 + $0x10] sm:$0xf0] }
 0x6be   :  { %2979 = vrcp.f32 %v1069_v7  ;;  %v1067_v9 = vsub.f32 %v1065_v8, %v3561_v19  ;;  %v2723_v7 = vor.u32 %v2833_v28, %v2720_v10  ;;  %v2835_v8 = vld [vmem:[#allocation2 + $0x8c] sm:$0xf0]  ;;  %v2662_v10 = vld [vmem:[#allocation2 + $0x8] sm:$0xf] }
 0x6bf   :  { %v2819_v28 = vld [vmem:[#allocation2 + $0xc] sm:$0xf0] }
 0x6c0   :  { %v2976_v34 = vpop.eup %2975  ;;  %v1545_v11 = vmul.f32 0.5, %v1067_v9  ;;  %v2726_v9 = vld [vmem:[#allocation2 + $0x88] sm:$0xf] }
 0x6c1   :  { %v1548_v12 = vadd.f32 1.0, %v2976_v34  ;;  %v2978_v1 = vpop.eup %2977  ;;  %v2836_v34 = vld [vmem:[#allocation2 + $0x94] sm:$0xf0] }
 0x6c2   :  { %2981 = vtanh.f32 %v1545_v11 }
 0x6c3   :  { %v1550_v32 = vmul.f32 0.5, %v1548_v12  ;;  %v2719_v12 = vor.u32 %v2835_v8, %v2718_v6  ;;  %v2820_v6 = vld [vmem:[#allocation2 + $0x14] sm:$0xf0]  ;;  %v2655_v8 = vor.u32 %v2819_v28, %v2654_v17 }
 0x6c4   :  { %v2980_v39 = vpop.eup %2979 }
 0x6c5   :  { %v1074_v48 = vsel %vm387_vm2, %v2980_v39, %v2978_v1  ;;  %v1559_v14 = vperm.slane %v1550_v32, 0  ;;  %v2727_v1 = vor.u32 %v2836_v34, %v2726_v9  ;;  %v2728_v39 = vld [vmem:[#allocation2 + $0x98] sm:$0xf0]  ;;  %1366 = vmatpush.bf16.msra.mxu1 %v2719_v12  ;;  %v2663_v9 = vor.u32 %v2820_v6, %v2662_v10  ;;  %v2818_v34 = vld [vmem:[#allocation2 + $0xc] sm:$0xf] }
 0x6c6   :  { %2647 = vmatmul.msk.f32.vlgmr.msrb.gmra.mxu3 %vm90_vm0, %v1074_v48 }
 0x6c7   :  { %1570 = vperm.xlu1 %2869, %v1559_v14   ;;  %1564 = vperm.xlu0 %2868, %v1559_v14   ;;  %v2829_v14 = vld [vmem:[#allocation2 + $0x64] sm:$0xf] }
 0x6c8   :  { %v2982_v4 = vpop.eup %2981  ;;  %1392 = vmatpush.bf16.msrb.mxu0 %v2727_v1 }
 0x6c9   :  { %v1549_v59 = vadd.f32 1.0, %v2982_v4  ;;  %v2704_v4 = vld [vmem:[#allocation2 + $0x70] sm:$0xf0] }
 0x6cb   :  { %v1551_v15 = vmul.f32 0.5, %v1549_v59  ;;  %v2702_v59 = vld [vmem:[#allocation2 + $0x60] sm:$0xf] }
 0x6cd   :  { %v1572_v18 = vperm.slane %v1551_v15, 0  ;;  %v1587_v2 = vrot.slane %v1551_v15, 7  ;;  %v2707_v15 = vor.u32 %v2829_v14, %v2704_v4 }
 0x6ce   :  { %2648 = vmatmul.msk.f32.vlgmr.msra.gmra.mxu3 %vm90_vm0, %v1042_v37  ;;  %v2841_v37 = vld [vmem:[#allocation2 + $0xc4] sm:$0xf] }
 0x6cf   :  { %1577 = vperm.xlu2 %2870, %v1572_v18   ;;  %1583 = vperm.xlu1 %2869, %v1572_v18   ;;  %v3650_v19 = vsel %vm387_vm2, %v1587_v2, %v1550_v32  ;;  %v2755_v42 = vor.u32 %v2841_v37, %v2752_v38  ;;  %v2834_v32 = vld [vmem:[#allocation2 + $0x8c] sm:$0xf]  ;;  %v2831_v18 = vld [vmem:[#allocation2 + $0x6c] sm:$0xf0]  ;;  %v2710_v2 = vld [vmem:[#allocation2 + $0x68] sm:$0xf] }
 0x6d0   :  { %2876 = vset.pattern.permute.xlu0 %v3232_v47  ;;  %v2845_v47 = vld [vmem:[#allocation2 + $0xe4] sm:$0xf]  ;;  %v2731_v48 = vor.u32 %v2834_v32, %v2728_v39 }
 0x6d1   :  { %v2771_v23 = vor.u32 %v2845_v47, %v2768_v22  ;;  %v2703_v47 = vor.u32 %v2831_v18, %v2702_v59 }
 0x6d3   :  { %1376 = vmatpush.bf16.msrb.mxu3 %v2771_v23  ;;  %v2712_v23 = vld [vmem:[#allocation2 + $0x78] sm:$0xf0]  ;;  %1367 = vmatpush.bf16.msra.mxu1 %v2703_v47 }
 0x6d4   :  { %v2715_v24 = vor.u32 %v2830_v61, %v2712_v23 }
 0x6d6   :  { %2649 = vmatmul.msk.f32.gmra.mxu3 %vm90_vm0, %v1043_v36  ;;  %v2779_v36 = vor.u32 %v2846_v31, %v2776_v35  ;;  %v2827_v31 = vld [vmem:[#allocation2 + $0x4c] sm:$0xf0]  ;;  %v2694_v35 = vld [vmem:[#allocation2 + $0x48] sm:$0xf] }
 0x6d7   :  { %2872 = vrot.lane.b32.xlu2 %v2871_v20, %s3117_s21  ;;  %1377 = vmatpush.bf16.msrb.mxu3 %v2755_v42  ;;  %v2832_v20 = vld [vmem:[#allocation2 + $0x74] sm:$0xf0]  ;;  %v2687_v38 = vor.u32 %v2827_v31, %v2686_v27  ;;  %v2826_v42 = vld [vmem:[#allocation2 + $0x4c] sm:$0xf] }
 0x6d8   :  { %1402 = vmatpush.bf16.msrb.mxu2 %v2779_v36  ;;  %v2711_v22 = vor.u32 %v2832_v20, %v2710_v2  ;;  %v2828_v36 = vld [vmem:[#allocation2 + $0x54] sm:$0xf0]  ;;  %v2699_v56 = vor.u32 %v2826_v42, %v2696_v50 }
 0x6d9   :  { %v2695_v40 = vor.u32 %v2828_v36, %v2694_v35  ;;  %1368 = vmatpush.bf16.msra.mxu1 %v2687_v38 }
 0x6da   :  { %1393 = vmatpush.bf16.msrb.mxu0 %v2711_v22 }
 0x6db   :  { %1378 = vmatpush.bf16.msrb.mxu3 %v2739_v0  ;;  %v2824_v0 = vld [vmem:[#allocation2 + $0x34] sm:$0xf0] }
 0x6dc   :  { %v2679_v49 = vor.u32 %v2824_v0, %v2678_v62 }
 0x6de   :  { %2650 = vmatmul.msk.f32.gmra.mxu3 %vm90_vm0, %v1044_v52  ;;  %1394 = vmatpush.bf16.msrb.mxu0 %v2695_v40 }
 0x6df   :  { %1379 = vmatpush.bf16.msrb.mxu3 %v2723_v7 }
 0x6e2   :  { %1395 = vmatpush.bf16.msrb.mxu0 %v2679_v49 }
 0x6e3   :  { %1380 = vmatpush.bf16.msrb.mxu3 %v2707_v15 }
 0x6e6   :  { %2651 = vmatmul.msk.f32.gmra.mxu3 %vm90_vm0, %v1045_v3  ;;  %v2842_v3 = vld [vmem:[#allocation2 + $0xcc] sm:$0xf]  ;;  %1396 = vmatpush.bf16.msrb.mxu0 %v2663_v9 }
 0x6e7   :  { %v2763_v57 = vor.u32 %v2842_v3, %v2760_v16  ;;  %1381 = vmatpush.bf16.msrb.mxu3 %v2691_v30  ;;  %v2672_v3 = vld [vmem:[#allocation2 + $0x30] sm:$0xf0]  ;;  %v2670_v16 = vld [vmem:[#allocation2 + $0x20] sm:$0xf] }
 0x6e8   :  { %v2675_v54 = vor.u32 %v2821_v60, %v2672_v3  ;;  %v2671_v33 = vor.u32 %v2823_v45, %v2670_v16 }
 0x6e9   :  { %1403 = vmatpush.bf16.msrb.mxu2 %v2763_v57 }
 0x6ea   :  { %1369 = vmatpush.bf16.msra.mxu1 %v2671_v33 }
 0x6eb   :  { %1382 = vmatpush.bf16.msrb.mxu3 %v2675_v54 }
 0x6ed   :  { %1404 = vmatpush.bf16.msrb.mxu2 %v2747_v63  ;;  %v2659_v63 = vor.u32 %v2817_v58, %v2656_v5 }
 0x6ee   :  { %1370 = vmatpush.bf16.msra.mxu1 %v2655_v8 }
 0x6ef   :  { %1383 = vmatpush.bf16.msrb.mxu3 %v2659_v63 }
 0x6f1   :  { %1405 = vmatpush.bf16.msrb.mxu2 %v2731_v48  ;;  %v3679_v48 = vld [vmem:[%s4003_s13] sm:$0xf]  ;;  %s3118_s13 = smov 32  }
 0x6f3   :  { %2783 = vmatpush.msk.msra.mxu3 %vm1675_vm14, %v3679_v48 }
 0x6f5   :  { %1406 = vmatpush.bf16.msrb.mxu2 %v2715_v24 }
 0x6f9   :  { %1407 = vmatpush.bf16.msrb.mxu2 %v2699_v56 }
 0x729   :  { %v3674_v32 = vpop.permute.xlu2 %1577 }
 0x731   :  { %v2873_v18 = vpop.permute.xlu2 %2872 }
 0x732   :  { %v2875_v22 = vunpack.i.h.bf16 %v2873_v18  ;;  %v2874_v61 = vunpack.i.l.bf16 %v2873_v18 }
 0x734   :  { %1613 = vmatpush.msrb.mxu1 %v2874_v61 }
 0x736   :  { %1614 = vmatpush.msrb.mxu1 %v2875_v22 }
 0x739   :  { %v3672_v12 = vpop.permute.xlu1 %1570  ;;  %v3689_v23 = vpop.permute.xlu0 %1564 }
 0x73a   :  { %v3701_v30 = vmul.f32 0.25, %v3689_v23 }
 0x741   :  { %v3687_v2 = vpop.permute.xlu1 %1583 }
 0x742   :  { %v3692_v25 = vmul.f32 0.25, %v3687_v2 }
 0x749   :  { %v3668_v52 = vpop.f32.mrf.mxu3 }
 0x74a   :  { %v1098_v50 = vrot.slane %v3668_v52, 1 }
 0x751   :  { %v1129_v11 = vpop.f32.mrf.mxu3 }
 0x752   :  { %v1141_v41 = vmul.f32 %v1129_v11, %v3374_v55  ;;  %v2664_v11 = vld [vmem:[#allocation2 + $0x18] sm:$0xf0] }
 0x753   :  { %v2667_v1 = vor.u32 %v2818_v34, %v2664_v11 }
 0x759   :  { %v1132_v37 = vpop.f32.mrf.mxu3 }
 0x75a   :  { %v1142_v46 = vmul.f32 %v1132_v37, %v3365_v51  ;;  %v2683_v51 = vor.u32 %v2822_v53, %v2680_v29 }
 0x75c   :  { %v1145_v57 = vadd.f32 %v1142_v46, %v1141_v41  ;;  %1408 = vmatpush.bf16.msrb.mxu2 %v2683_v51 }
 0x75e   :  { %v1146_v55 = vrot.slane %v1145_v57, 4 }
 0x760   :  { %v1147_v39 = vadd.f32 %v1146_v55, %v1145_v57  ;;  %1409 = vmatpush.bf16.msrb.mxu2 %v2667_v1 }
 0x761   :  { %v1135_v7 = vpop.f32.mrf.mxu3 }
 0x762   :  { %v1148_v14 = vrot.slane %v1147_v39, 2  ;;  %v1143_v59 = vmul.f32 %v1135_v7, %v3341_v43  ;;  %v3695_v43 = vmul.f32 0.25, %v3674_v32 }
 0x764   :  { %2793 = vmatpush.msk.msra.mxu2 %vm1675_vm14, %v3679_v48  ;;  %v1149_v20 = vadd.f32 %v1148_v14, %v1147_v39  ;;  %v1630_v35 = vadd.f32 %v3692_v25, %v3695_v43 }
 0x766   :  { %v1150_v26 = vrot.slane %v1149_v20, 1  ;;  %v1631_v42 = vrot.slane %v1630_v35, 4 }
 0x768   :  { %v1151_v36 = vadd.f32 %v1150_v26, %v1149_v20  ;;  %v1632_v3 = vadd.f32 %v1631_v42, %v1630_v35 }
 0x769   :  { %v1138_v4 = vpop.f32.mrf.mxu3 }
 0x76a   :  { %v1144_v15 = vmul.f32 %v1138_v4, %v3343_v44  ;;  %v3698_v44 = vmul.f32 0.25, %v3672_v12  ;;  %v1159_v41 = vmul.f32 %v1151_v36, %v3668_v52  ;;  %v1633_v62 = vrot.slane %v1632_v3, 2 }
 0x76c   :  { %v1152_v47 = vadd.f32 %v1144_v15, %v1143_v59  ;;  %v1623_v38 = vadd.f32 %v3698_v44, %v3701_v30  ;;  %v1161_v16 = vpack.c.bf16 %v1159_v41, %v1159_v41  ;;  %v1634_v29 = vadd.f32 %v1633_v62, %v1632_v3 }
 0x76e   :  { %v1153_v24 = vrot.slane %v1152_v47, 4  ;;  %v1624_v56 = vrot.slane %v1623_v38, 4  ;;  %v1197_v0 = vunpack.c.l.b16 %v1161_v16  ;;  %v1635_v52 = vrot.slane %v1634_v29, 1 }
 0x76f   :  { %v3122_v16 = vmov 1934713408  }
 0x770   :  { %v1154_v27 = vadd.f32 %v1153_v24, %v1152_v47  ;;  %v1625_v54 = vadd.f32 %v1624_v56, %v1623_v38  ;;  %v1636_v5 = vadd.f32 %v1635_v52, %v1634_v29  ;;  %v3121_v24 = vmov 1983009808  }
 0x771   :  { %v1459_v26 = vunpack.c.l.s4 %v3121_v24 }
 0x772   :  { %v1155_v31 = vrot.slane %v1154_v27, 2  ;;  %v1626_v49 = vrot.slane %v1625_v54, 2  ;;  %v1667_v63 = vadd.f32 1e-05, %v1636_v5 }
 0x773   :  { %v1460_v38 = vunpack.c.0.s8 %v1459_v26 }
 0x774   :  { %v1156_v37 = vadd.f32 %v1155_v31, %v1154_v27  ;;  %v1627_v51 = vadd.f32 %v1626_v49, %v1625_v54  ;;  %2983 = vrcp.f32 %v1667_v63 }
 0x776   :  { %v1157_v40 = vrot.slane %v1156_v37, 1  ;;  %v1628_v58 = vrot.slane %v1627_v51, 1 }
 0x778   :  { %v1158_v46 = vadd.f32 %v1157_v40, %v1156_v37  ;;  %v1629_v17 = vadd.f32 %v1628_v58, %v1627_v51 }
 0x77a   :  { %v1160_v60 = vmul.f32 %v1158_v46, %v1098_v50  ;;  %v1666_v28 = vadd.f32 1e-05, %v1629_v17  ;;  %v2984_v10 = vpop.eup %2983 }
 0x77c   :  { %v1162_v57 = vpack.c.bf16 %v1160_v60, %v1160_v60  ;;  %2985 = vrcp.f32 %v1666_v28 }
 0x77e   :  { %v1198_v45 = vunpack.c.l.b16 %v1162_v57  ;;  %v1483_v57 = vunpack.c.l.s4 %v3122_v16 }
 0x780   :  { %v1199_v33 = vrot.slane %v1198_v45, 7  ;;  %v1484_v52 = vunpack.c.0.s8 %v1483_v57 }
 0x782   :  { %v1200_v53 = vsel %vm387_vm2, %v1199_v33, %v1197_v0  ;;  %v2986_v6 = vpop.eup %2985 }
 0x783   :  { %v1201_v55 = vpack.c.b16 %v1200_v53, %v1200_v53  ;;  %v1672_v7 = vsel %vm387_vm2, %v2984_v10, %v2986_v6 }
 0x785   :  { %1371 = vmatmul.bf16.vlgmr.msra.gmra.mxu1 %v1201_v55  ;;  %1384 = vmatmul.bf16.vlgmr.msrb.gmra.mxu3 %v1201_v55 }
 0x786   :  { %1397 = vmatmul.bf16.vlgmr.msrb.gmra.mxu0 %v1201_v55  ;;  %1410 = vmatmul.bf16.vlgmr.msrb.gmra.mxu2 %v1201_v55 }
 0x787   :  { %2781 = vmatpush.msk.msra.mxu1 %vm1675_vm14, %v3679_v48 }
 0x795   :  { %2780 = vmatmul.msk.f32.vlgmr.msrb.gmra.mxu1 %vm90_vm0, %v3650_v19  ;;  %2784 = vmatmul.msk.f32.vlgmr.msra.gmra.mxu3 %vm1641_vm15, %v3701_v30  ;;  %vm1456_vm0 = vcmask 1047556  }
 0x79d   :  { %2782 = vmatmul.msk.f32.vlgmr.msra.gmra.mxu1 %vm1641_vm15, %v1672_v7  ;;  %2785 = vmatmul.msk.f32.gmra.mxu3 %vm1641_vm15, %v3698_v44 }
 0x7a5   :  { %2786 = vmatmul.msk.f32.gmra.mxu3 %vm1641_vm15, %v3695_v43 }
 0x7ad   :  { %2787 = vmatmul.msk.f32.gmra.mxu3 %vm1641_vm15, %v3692_v25 }
 0x802   :  { %v3724_v8 = vpop.f32.mrf.mxu1 }
 0x803   :  { %v1398_v19 = vpop.f32.mrf.mxu0  ;;  %1422 = vrot.lane.b32.xlu0 %v3724_v8, %s3118_s13 }
 0x808   :  { %v1385_v9 = vpop.f32.mrf.mxu3 }
 0x809   :  { %v1411_v34 = vpop.f32.mrf.mxu2  ;;  %1432 = vrot.lane.b32.xlu1 %v1385_v9, %s3118_s13 }
 0x80a   :  { %1452 = vrot.lane.b32.xlu2 %v1411_v34, %s3118_s13  ;;  %v1374_v11 = vpop.f32.mrf.mxu1 }
 0x80b   :  { %v1400_v1 = vpop.f32.mrf.mxu0  ;;  %1442 = vrot.lane.b32.xlu0 %v1398_v19, %s3118_s13 }
 0x810   :  { %v1387_v39 = vpop.f32.mrf.mxu3 }
 0x811   :  { %v1413_v14 = vpop.f32.mrf.mxu2  ;;  %1426 = vrot.lane.b32.xlu1 %v1385_v9, %s3119_s24 }
 0x812   :  { %1429 = vrot.lane.b32.xlu2 %v1385_v9, %s3120_s5 }
 0x813   :  { %1416 = vrot.lane.b32.xlu0 %v3724_v8, %s3119_s24 }
 0x818   :  { %v3729_v22 = vpop.f32.mrf.mxu3 }
 0x819   :  { %1446 = vrot.lane.b32.xlu1 %v1411_v34, %s3119_s24 }
 0x81a   :  { %1449 = vrot.lane.b32.xlu2 %v1411_v34, %s3120_s5 }
 0x81b   :  { %1439 = vrot.lane.b32.xlu0 %v1398_v19, %s3120_s5 }
 0x820   :  { %v3732_v42 = vpop.f32.mrf.mxu3 }
 0x821   :  { %1419 = vrot.lane.b32.xlu1 %v3724_v8, %s3120_s5 }
 0x822   :  { %1436 = vrot.lane.b32.xlu2 %v1398_v19, %s3119_s24 }
 0x828   :  { %v3743_v1 = vpop.f32.mrf.mxu3 }
 0x864   :  { %v1453_v4 = vpop.permute.xlu2 %1452 }
 0x865   :  { %v1514_v50 = vrot.slane %v1453_v4, 4 }
 0x86c   :  { %v1430_v59 = vpop.permute.xlu2 %1429 }
 0x86d   :  { %v1468_v41 = vrot.slane %v1430_v59, 4 }
 0x86f   :  { %v1469_v33 = vsel %vm1456_vm0, %v1468_v41, %v1385_v9 }
 0x870   :  { %v1473_v17 = vperm.slane %v1469_v33, %v1460_v38 }
 0x874   :  { %v1450_v47 = vpop.permute.xlu2 %1449 }
 0x875   :  { %v1423_v15 = vpop.permute.xlu0 %1422  ;;  %v1508_v36 = vrot.slane %v1450_v47, 4 }
 0x876   :  { %v1462_v49 = vrot.slane %v1423_v15, 4 }
 0x877   :  { %v1509_v3 = vsel %vm1456_vm0, %v1508_v36, %v1411_v34  ;;  %v1558_v36 = vld [vmem:[%s4004_s14 + $0x18] sm:$0xff] }
 0x878   :  { %v1513_v29 = vperm.slane %v1509_v3, %v1460_v38  ;;  %1904 = vmatpush.msra.mxu0 %v1558_v36  ;;  %1863 = vmatpush.msrb.mxu1 %v1558_v36  ;;  %v1555_v3 = vld [vmem:[%s4004_s14] sm:$0xff] }
 0x879   :  { %2288 = vmatpush.msrb.mxu3 %v1558_v36  ;;  %2247 = vmatpush.msrb.mxu2 %v1558_v36 }
 0x87b   :  { %v1433_v18 = vpop.permute.xlu1 %1432 }
 0x87c   :  { %v1474_v31 = vrot.slane %v1433_v18, 4  ;;  %v1437_v40 = vpop.permute.xlu2 %1436 }
 0x87d   :  { %v1443_v20 = vpop.permute.xlu0 %1442 }
 0x87e   :  { %v1502_v35 = vrot.slane %v1443_v20, 4 }
 0x880   :  { %v1503_v46 = vsel %vm1456_vm0, %v1502_v35, %v1437_v40 }
 0x881   :  { %v1507_v45 = vperm.slane %v1503_v46, %v1460_v38 }
 0x883   :  { %v1427_v61 = vpop.permute.xlu1 %1426  ;;  %v1520_v63 = vrot.slane %v1507_v45, 4 }
 0x884   :  { %v1475_v37 = vsel %vm1456_vm0, %v1474_v31, %v1427_v61 }
 0x885   :  { %v1417_v27 = vpop.permute.xlu0 %1416  ;;  %v1479_v56 = vperm.slane %v1475_v37, %v1460_v38  ;;  %v1557_v37 = vld [vmem:[%s4004_s14 + $0x10] sm:$0xff] }
 0x886   :  { %v1463_v58 = vsel %vm1456_vm0, %v1462_v49, %v1417_v27  ;;  %1905 = vmatpush.msra.mxu0 %v1557_v37  ;;  %1864 = vmatpush.msrb.mxu1 %v1557_v37  ;;  %v3786_v49 = vpop.f32.mrf.mxu1 }
 0x887   :  { %v1486_v55 = vrot.slane %v1479_v56, 4  ;;  %v1467_v34 = vperm.slane %v1463_v58, %v1460_v38  ;;  %v1740_v56 = vpop.f32.mrf.mxu3  ;;  %2289 = vmatpush.msrb.mxu3 %v1557_v37  ;;  %2248 = vmatpush.msrb.mxu2 %v1557_v37 }
 0x889   :  { %v1487_v7 = vsel %vm1456_vm0, %v1486_v55, %v1473_v17  ;;  %v1480_v47 = vrot.slane %v1467_v34, 4 }
 0x88a   :  { %v1491_v59 = vperm.slane %v1487_v7, %v1484_v52 }
 0x88b   :  { %v1447_v60 = vpop.permute.xlu1 %1446 }
 0x88c   :  { %v1515_v54 = vsel %vm1456_vm0, %v1514_v50, %v1447_v60  ;;  %v1492_v31 = vrot.slane %v1491_v59, 4  ;;  %v1556_v50 = vld [vmem:[%s4004_s14 + $0x8] sm:$0xff] }
 0x88d   :  { %v1519_v62 = vperm.slane %v1515_v54, %v1460_v38  ;;  %v1440_v0 = vpop.permute.xlu0 %1439  ;;  %1906 = vmatpush.msra.mxu0 %v1556_v50  ;;  %1865 = vmatpush.msrb.mxu1 %v1556_v50 }
 0x88e   :  { %v1496_v53 = vrot.slane %v1440_v0, 4  ;;  %2290 = vmatpush.msrb.mxu3 %v1556_v50  ;;  %2249 = vmatpush.msrb.mxu2 %v1556_v50  ;;  %v1696_v7 = vpop.f32.mrf.mxu1 }
 0x88f   :  { %v1526_v51 = vrot.slane %v1519_v62, 4  ;;  %1907 = vmatpush.msra.mxu0 %v1555_v3  ;;  %1866 = vmatpush.msrb.mxu1 %v1555_v3 }
 0x890   :  { %v1497_v5 = vsel %vm1456_vm0, %v1496_v53, %v1398_v19  ;;  %v2882_v19 = vld [vmem:[%s4001_s11] ss:$0 sm:$0xff]  ;;  %2291 = vmatpush.msrb.mxu3 %v1555_v3  ;;  %2250 = vmatpush.msrb.mxu2 %v1555_v3 }
 0x891   :  { %v1527_v28 = vsel %vm1456_vm0, %v1526_v51, %v1513_v29  ;;  %v1501_v10 = vperm.slane %v1497_v5, %v1460_v38  ;;  %2795 = vmatpush.msk.msrb.mxu0 %vm1675_vm14, %v3679_v48  ;;  %2805 = vmatpush.msk.msra.mxu1 %vm1675_vm14, %v3679_v48 }
 0x892   :  { %v1531_v6 = vperm.slane %v1527_v28, %v1484_v52  ;;  %2807 = vmatpush.msk.msra.mxu3 %vm1675_vm14, %v3679_v48 }
 0x893   :  { %v1521_v9 = vsel %vm1456_vm0, %v1520_v63, %v1501_v10  ;;  %v1420_v11 = vpop.permute.xlu1 %1419 }
 0x894   :  { %v1532_v39 = vrot.slane %v1531_v6, 4  ;;  %v1525_v14 = vperm.slane %v1521_v9, %v1484_v52  ;;  %v1455_v4 = vrot.slane %v1420_v11, 4  ;;  %v1700_v11 = vrot.slane %v1696_v7, 1 }
 0x896   :  { %v1533_v15 = vsel %vm1456_vm0, %v1532_v39, %v1525_v14  ;;  %v1534_v18 = vrot.slane %v1525_v14, 4  ;;  %v1457_v20 = vsel %vm1456_vm0, %v1455_v4, %v3724_v8 }
 0x897   :  { %v1461_v61 = vperm.slane %v1457_v20, %v1460_v38  ;;  %v3752_v26 = vadd.f32 %v2882_v19, %v1533_v15 }
 0x898   :  { %v1535_v24 = vsel %vm1456_vm0, %v1531_v6, %v1534_v18 }
 0x899   :  { %v1481_v27 = vsel %vm1456_vm0, %v1480_v47, %v1461_v61  ;;  %v3761_v40 = vadd.f32 %v2882_v19, %v1535_v24  ;;  %v1744_v41 = vmul.f32 %v3732_v42, %v3752_v26 }
 0x89a   :  { %v1485_v35 = vperm.slane %v1481_v27, %v1484_v52 }
 0x89b   :  { %v1746_v16 = vmul.f32 %v1740_v56, %v3761_v40  ;;  %v1748_v45 = vsel %vm142_vm1, %v1744_v41, 0.0 }
 0x89c   :  { %v1493_v8 = vsel %vm1456_vm0, %v1492_v31, %v1485_v35  ;;  %v1494_v38 = vrot.slane %v1485_v35, 4 }
 0x89d   :  { %v3769_v46 = vadd.f32 %v2882_v19, %v1493_v8  ;;  %v1757_v53 = vsel %vm142_vm1, %v1746_v16, 0.0 }
 0x89e   :  { %v1495_v60 = vsel %vm1456_vm0, %v1491_v59, %v1494_v38 }
 0x89f   :  { %v3776_v57 = vadd.f32 %v2882_v19, %v1495_v60  ;;  %v1743_v54 = vmul.f32 %v3729_v22, %v3769_v46 }
 0x8a1   :  { %v1745_v62 = vmul.f32 %v3743_v1, %v3776_v57  ;;  %v1747_v0 = vsel %vm142_vm1, %v1743_v54, 0.0 }
 0x8a2   :  { %v1749_v33 = vadd.f32 %v1748_v45, %v1747_v0 }
 0x8a3   :  { %v1756_v29 = vsel %vm142_vm1, %v1745_v62, 0.0 }
 0x8a4   :  { %v1750_v55 = vrot.slane %v1749_v33, 4  ;;  %v1758_v51 = vadd.f32 %v1757_v53, %v1756_v29 }
 0x8a6   :  { %v1751_v52 = vadd.f32 %v1750_v55, %v1749_v33  ;;  %v1759_v58 = vrot.slane %v1758_v51, 4 }
 0x8a8   :  { %v1752_v5 = vrot.slane %v1751_v52, 2  ;;  %v1760_v17 = vadd.f32 %v1759_v58, %v1758_v51 }
 0x8aa   :  { %v1753_v63 = vadd.f32 %v1752_v5, %v1751_v52  ;;  %v1761_v28 = vrot.slane %v1760_v17, 2 }
 0x8ac   :  { %v1754_v10 = vrot.slane %v1753_v63, 1  ;;  %v1762_v6 = vadd.f32 %v1761_v28, %v1760_v17 }
 0x8ae   :  { %v1755_v34 = vadd.f32 %v1754_v10, %v1753_v63  ;;  %v1763_v9 = vrot.slane %v1762_v6, 1 }
 0x8b0   :  { %v1764_v39 = vadd.f32 %v1763_v9, %v1762_v6  ;;  %v1765_v14 = vmul.f32 %v1755_v34, %v1696_v7 }
 0x8b2   :  { %v1766_v4 = vmul.f32 %v1764_v39, %v1700_v11  ;;  %v1767_v19 = vperm.slane %v1765_v14, 0 }
 0x8b4   :  { %v1768_v59 = vperm.slane %v1766_v4, 0  ;;  %v1769_v15 = vsub.f32 %v3769_v46, %v1767_v19  ;;  %v1770_v48 = vsub.f32 %v3752_v26, %v1767_v19 }
 0x8b6   :  { %v1771_v18 = vsub.f32 %v3776_v57, %v1768_v59  ;;  %v1772_v20 = vsub.f32 %v3761_v40, %v1768_v59  ;;  %v3798_v47 = vmul.f32 %v1769_v15, %v1769_v15  ;;  %v3800_v61 = vmul.f32 %v1770_v48, %v1770_v48 }
 0x8b8   :  { %v3802_v24 = vmul.f32 %v1771_v18, %v1771_v18  ;;  %v3804_v27 = vmul.f32 %v1772_v20, %v1772_v20  ;;  %v1777_v31 = vmul.f32 %v3798_v47, %v3729_v22  ;;  %v1778_v35 = vmul.f32 %v3800_v61, %v3732_v42 }
 0x8ba   :  { %v1779_v36 = vmul.f32 %v3802_v24, %v3743_v1  ;;  %v1781_v37 = vsel %vm142_vm1, %v1777_v31, 0.0  ;;  %v1780_v8 = vmul.f32 %v3804_v27, %v1740_v56  ;;  %v1782_v38 = vsel %vm142_vm1, %v1778_v35, 0.0 }
 0x8bb   :  { %v1783_v50 = vadd.f32 %v1782_v38, %v1781_v37 }
 0x8bc   :  { %v1790_v41 = vsel %vm142_vm1, %v1779_v36, 0.0  ;;  %v1791_v60 = vsel %vm142_vm1, %v1780_v8, 0.0 }
 0x8bd   :  { %v1784_v3 = vrot.slane %v1783_v50, 4  ;;  %v1792_v16 = vadd.f32 %v1791_v60, %v1790_v41 }
 0x8bf   :  { %v1785_v22 = vadd.f32 %v1784_v3, %v1783_v50  ;;  %v1793_v54 = vrot.slane %v1792_v16, 4 }
 0x8c1   :  { %v1786_v45 = vrot.slane %v1785_v22, 2  ;;  %v1794_v42 = vadd.f32 %v1793_v54, %v1792_v16 }
 0x8c3   :  { %v1787_v62 = vadd.f32 %v1786_v45, %v1785_v22  ;;  %v1795_v0 = vrot.slane %v1794_v42, 2 }
 0x8c5   :  { %v1788_v1 = vrot.slane %v1787_v62, 1  ;;  %v1796_v33 = vadd.f32 %v1795_v0, %v1794_v42  ;;  %v1638_v0 = vmul.f32 %v3698_v44, %v3664_v13 }
 0x8c7   :  { %v1789_v53 = vadd.f32 %v1788_v1, %v1787_v62  ;;  %v1797_v29 = vrot.slane %v1796_v33, 1  ;;  %v1637_v1 = vmul.f32 %v3701_v30, %v3659_v21 }
 0x8c9   :  { %v1798_v56 = vadd.f32 %v1797_v29, %v1796_v33  ;;  %v1799_v55 = vmul.f32 %v1789_v53, %v1696_v7  ;;  %v1642_v33 = vsel %vm1641_vm15, %v1637_v1, 0.0 }
 0x8cb   :  { %v1800_v51 = vmul.f32 %v1798_v56, %v1700_v11  ;;  %v1801_v52 = vadd.f32 1e-05, %v1799_v55 }
 0x8cd   :  { %v1802_v58 = vadd.f32 1e-05, %v1800_v51  ;;  %2987 = vrcp.f32 %v1801_v52  ;;  %v1814_v14 = vand.u32 2147483648, %v1801_v52  ;;  %v1812_v7 = vand.u32 2147483647, %v1801_v52 }
 0x8ce   :  { %2989 = vlog2.f32 %v1801_v52  ;;  %vm1808_vm4 = vweird.f32 %v1801_v52 }
 0x8cf   :  { %2991 = vrcp.f32 %v1802_v58  ;;  %v1815_v18 = vor.u32 1.1754944e-38, %v1814_v14  ;;  %vm1813_vm6 = vcmp.eq.f32.partialorder %v1812_v7, 8.507059e+37  ;;  %v1829_v50 = vand.u32 2147483648, %v1802_v58 }
 0x8d0   :  { %2993 = vlog2.f32 %v1802_v58  ;;  %vm1823_vm8 = vweird.f32 %v1802_v58  ;;  %v1827_v60 = vand.u32 2147483647, %v1802_v58 }
 0x8d1   :  { %v1830_v16 = vor.u32 1.1754944e-38, %v1829_v50 }
 0x8d2   :  { %vm1828_vm10 = vcmp.eq.f32.partialorder %v1827_v60, 8.507059e+37 }
 0x8d3   :  { %v2988_v5 = vpop.eup %2987 }
 0x8d4   :  { %v2990_v17 = vpop.eup %2989  ;;  %v1804_v63 = vmul.f32 %v2988_v5, %v1801_v52  ;;  %vm1809_vm3 = vweird.f32 %v2988_v5 }
 0x8d5   :  { %v2992_v28 = vpop.eup %2991  ;;  %v1881_v9 = vmul.f32 0.6931472, %v2990_v17  ;;  %vm1810_vm5 = vmor %vm1808_vm4, %vm1809_vm3 }
 0x8d6   :  { %v2994_v10 = vpop.eup %2993  ;;  %v1805_v6 = vsub.f32 1.0, %v1804_v63  ;;  %v1819_v34 = vmul.f32 %v2992_v28, %v1802_v58  ;;  %vm1824_vm7 = vweird.f32 %v2992_v28 }
 0x8d7   :  { %v1883_v39 = vmul.f32 0.6931472, %v2994_v10  ;;  %v1884_v15 = vmul.f32 0.5, %v1881_v9  ;;  %vm1825_vm9 = vmor %vm1823_vm8, %vm1824_vm7 }
 0x8d8   :  { %v1806_v4 = vmul.f32 %v2988_v5, %v1805_v6  ;;  %v1820_v11 = vsub.f32 1.0, %v1819_v34 }
 0x8d9   :  { %v1885_v19 = vmul.f32 0.5, %v1883_v39 }
 0x8da   :  { %v1807_v59 = vadd.f32 %v2988_v5, %v1806_v4  ;;  %v1821_v31 = vmul.f32 %v2992_v28, %v1820_v11 }
 0x8db   :  { %v1888_v48 = vrot.slane %v1885_v19, 7 }
 0x8dc   :  { %v1811_v20 = vsel %vm1810_vm5, %v2988_v5, %v1807_v59  ;;  %v1822_v38 = vadd.f32 %v2992_v28, %v1821_v31 }
 0x8dd   :  { %v1889_v35 = vsel %vm387_vm2, %v1888_v48, %v1884_v15  ;;  %v1816_v36 = vsel %vm1813_vm6, %v1815_v18, %v1811_v20 }
 0x8de   :  { %2792 = vmatmul.msk.f32.vlgmr.msra.gmra.mxu0 %vm142_vm1, %v1889_v35  ;;  %v1817_v37 = vmul.f32 0.5, %v1816_v36  ;;  %v1826_v3 = vsel %vm1825_vm9, %v2992_v28, %v1822_v38 }
 0x8df   :  { %v1831_v22 = vsel %vm1828_vm10, %v1830_v16, %v1826_v3 }
 0x8e0   :  { %v1833_v8 = vperm.slane %v1817_v37, 0  ;;  %v1832_v45 = vmul.f32 0.5, %v1831_v22 }
 0x8e2   :  { %v1835_v41 = vmul.f32 %v1833_v8, %v3798_v47  ;;  %v1836_v54 = vmul.f32 %v1833_v8, %v3800_v61  ;;  %v1834_v42 = vperm.slane %v1832_v45, 0  ;;  %v1643_v61 = vsel %vm1641_vm15, %v1638_v0, 0.0 }
 0x8e3   :  { %v1644_v53 = vadd.f32 %v1643_v61, %v1642_v33 }
 0x8e4   :  { %2788 = vmatmul.msk.f32.vlgmr.msrb.gmra.mxu1 %vm142_vm1, %v1835_v41  ;;  %v1837_v62 = vmul.f32 %v1834_v42, %v3802_v24  ;;  %v1838_v47 = vmul.f32 %v1834_v42, %v3804_v27  ;;  %v1640_v24 = vmul.f32 %v3692_v25, %v3664_v13  ;;  %v1639_v27 = vmul.f32 %v3695_v43, %v3659_v21 }
 0x8e5   :  { %v1645_v29 = vrot.slane %v1644_v53, 4  ;;  %v3841_v21 = vrot.slane %v3786_v49, 1 }
 0x8e6   :  { %v1652_v51 = vsel %vm1641_vm15, %v1640_v24, 0.0  ;;  %v1651_v44 = vsel %vm1641_vm15, %v1639_v27, 0.0 }
 0x8e7   :  { %v1646_v56 = vadd.f32 %v1645_v29, %v1644_v53  ;;  %v1653_v52 = vadd.f32 %v1652_v51, %v1651_v44 }
 0x8e9   :  { %v1647_v55 = vrot.slane %v1646_v56, 2  ;;  %v1654_v58 = vrot.slane %v1653_v52, 4 }
 0x8eb   :  { %v1648_v30 = vadd.f32 %v1647_v55, %v1646_v56  ;;  %v1655_v17 = vadd.f32 %v1654_v58, %v1653_v52 }
 0x8ec   :  { %2789 = vmatmul.msk.f32.gmra.mxu1 %vm142_vm1, %v1836_v54 }
 0x8ed   :  { %v1649_v5 = vrot.slane %v1648_v30, 1  ;;  %v1656_v10 = vrot.slane %v1655_v17, 2 }
 0x8ef   :  { %v1650_v63 = vadd.f32 %v1649_v5, %v1648_v30  ;;  %v1657_v34 = vadd.f32 %v1656_v10, %v1655_v17 }
 0x8f1   :  { %v1664_v28 = vsub.f32 %v1650_v63, %v3786_v49  ;;  %v1658_v25 = vrot.slane %v1657_v34, 1 }
 0x8f3   :  { %v1912_v6 = vsub.f32 0.0, %v1664_v28  ;;  %v1659_v9 = vadd.f32 %v1658_v25, %v1657_v34 }
 0x8f4   :  { %2790 = vmatmul.msk.f32.gmra.mxu1 %vm142_vm1, %v1837_v62 }
 0x8f5   :  { %v1920_v13 = vand.u32 2147483647, %v1912_v6  ;;  %v1665_v39 = vsub.f32 %v1659_v9, %v3841_v21  ;;  %v1914_v50 = vmax.f32 %v1912_v6, 0.0  ;;  %vm1916_vm12 = vcmp.ne.f32.partialorder %v1912_v6, %v1912_v6 }
 0x8f7   :  { %v1922_v43 = vsub.f32 0.0, %v1920_v13  ;;  %v1913_v4 = vsub.f32 0.0, %v1665_v39 }
 0x8f9   :  { %v1924_v14 = vmul.f32 1.442695, %v1922_v43  ;;  %v1921_v7 = vand.u32 2147483647, %v1913_v4  ;;  %v1915_v53 = vmax.f32 %v1913_v4, 0.0  ;;  %vm1917_vm14 = vcmp.ne.f32.partialorder %v1913_v4, %v1913_v4 }
 0x8fb   :  { %2995 = vpow2.f32 %v1924_v14  ;;  %v1923_v19 = vsub.f32 0.0, %v1921_v7 }
 0x8fc   :  { %2791 = vmatmul.msk.f32.gmra.mxu1 %vm142_vm1, %v1838_v47 }
 0x8fd   :  { %v1926_v15 = vmul.f32 1.442695, %v1923_v19 }
 0x901   :  { %v2996_v11 = vpop.eup %2995 }
 0x902   :  { %v1928_v59 = vadd.f32 1.0, %v2996_v11  ;;  %v1931_v48 = vmul.f32 -0.5, %v2996_v11  ;;  %v1934_v31 = vand.u32 2147483647, %v2996_v11 }
 0x904   :  { %2997 = vlog2.f32 %v1928_v59  ;;  %v1932_v20 = vadd.f32 1.0, %v1931_v48  ;;  %vm1935_vm11 = vcmp.lt.f32.partialorder %v1934_v31, 0.0004427343 }
 0x905   :  { %2999 = vpow2.f32 %v1926_v15 }
 0x906   :  { %v1933_v37 = vmul.f32 %v2996_v11, %v1932_v20 }
 0x90a   :  { %v2998_v18 = vpop.eup %2997 }
 0x90b   :  { %v3000_v35 = vpop.eup %2999  ;;  %v1930_v36 = vmul.f32 0.6931472, %v2998_v18 }
 0x90c   :  { %v1937_v8 = vadd.f32 1.0, %v3000_v35  ;;  %v1940_v60 = vmul.f32 -0.5, %v3000_v35  ;;  %v1943_v42 = vand.u32 2147483647, %v3000_v35 }
 0x90d   :  { %v1936_v38 = vsel %vm1935_vm11, %v1933_v37, %v1930_v36 }
 0x90e   :  { %v1946_v41 = vadd.f32 %v1936_v38, %v1914_v50  ;;  %3001 = vlog2.f32 %v1937_v8  ;;  %v1941_v54 = vadd.f32 1.0, %v1940_v60  ;;  %vm1944_vm13 = vcmp.lt.f32.partialorder %v1943_v42, 0.0004427343 }
 0x910   :  { %v1948_v3 = vsel %vm1916_vm12, %v1912_v6, %v1946_v41  ;;  %v1942_v0 = vmul.f32 %v3000_v35, %v1941_v54 }
 0x911   :  { %v1950_v22 = vsub.f32 0.0, %v1948_v3 }
 0x914   :  { %v3002_v16 = vpop.eup %3001 }
 0x915   :  { %v1939_v47 = vmul.f32 0.6931472, %v3002_v16 }
 0x917   :  { %v1945_v61 = vsel %vm1944_vm13, %v1942_v0, %v1939_v47 }
 0x918   :  { %v1947_v56 = vadd.f32 %v1945_v61, %v1915_v53 }
 0x91a   :  { %v1949_v27 = vsel %vm1917_vm14, %v1913_v4, %v1947_v56  ;;  %vm2593_vm14 = vcmask 556032  }
 0x91b   :  { %v1951_v52 = vsub.f32 0.0, %v1949_v27 }
 0x95b   :  { %v1909_v45 = vpop.f32.mrf.mxu0 }
 0x95c   :  { %v1956_v62 = vsub.f32 %v1950_v22, %v1909_v45  ;;  %v1953_v55 = vrot.slane %v1909_v45, 1  ;;  %v3857_v45 = vld [vmem:[%s4002_s12] sm:$0xff] }
 0x95e   :  { %v1958_v1 = vperm.slane %v1956_v62, 0  ;;  %v1957_v58 = vsub.f32 %v1951_v52, %v1953_v55 }
 0x960   :  { %v1959_v5 = vperm.slane %v1957_v58, 0 }
 0x961   :  { %v1868_v33 = vpop.f32.mrf.mxu1 }
 0x962   :  { %v1960_v29 = vsub.f32 %v1958_v1, %v1868_v33 }
 0x964   :  { %v1964_v24 = vsel %vm1641_vm15, %v1960_v29, -inf }
 0x965   :  { %1965 = vmax.xlane.f32.xlu1 %v1964_v24 }
 0x969   :  { %v1871_v51 = vpop.f32.mrf.mxu1 }
 0x96a   :  { %v1961_v44 = vsub.f32 %v1958_v1, %v1871_v51  ;;  %v3866_v1 = vld [vmem:[%s4002_s12 + $0x8] sm:$0xff]  ;;  %s3123_s12 = smov 4  }
 0x96c   :  { %v1967_v30 = vsel %vm1641_vm15, %v1961_v44, -inf }
 0x96d   :  { %1968 = vmax.xlane.f32.xlu2 %v1967_v30 }
 0x971   :  { %v1874_v17 = vpop.f32.mrf.mxu1 }
 0x972   :  { %v1962_v63 = vsub.f32 %v1959_v5, %v1874_v17 }
 0x974   :  { %v1970_v28 = vsel %vm1641_vm15, %v1962_v63, -inf }
 0x975   :  { %1971 = vmax.xlane.f32.xlu0 %v1970_v28 }
 0x979   :  { %v1877_v10 = vpop.f32.mrf.mxu1 }
 0x97a   :  { %v1963_v6 = vsub.f32 %v1959_v5, %v1877_v10 }
 0x97c   :  { %v1973_v34 = vsel %vm1641_vm15, %v1963_v6, -inf }
 0x97d   :  { %1974 = vmax.xlane.f32.xlu1 %v1973_v34 }
 0x9d8   :  { %v1966_v13 = vpop.xlane.xlu1 %1965 }
 0x9d9   :  { %v1976_v25 = vsub.f32 %v1960_v29, %v1966_v13 }
 0x9db   :  { %v1980_v43 = vmul.f32 1.442695, %v1976_v25 }
 0x9dd   :  { %3003 = vpow2.f32 %v1980_v43 }
 0x9e0   :  { %v1969_v9 = vpop.xlane.xlu2 %1968 }
 0x9e1   :  { %v1977_v39 = vsub.f32 %v1961_v44, %v1969_v9 }
 0x9e3   :  { %v3004_v14 = vpop.eup %3003  ;;  %v1982_v4 = vmul.f32 1.442695, %v1977_v39 }
 0x9e4   :  { %v1988_v7 = vsel %vm1641_vm15, %v3004_v14, 0.0 }
 0x9e5   :  { %3005 = vpow2.f32 %v1982_v4  ;;  %1989 = vadd.xlane.f32.xlu2 %v1988_v7 }
 0x9e8   :  { %v1972_v11 = vpop.xlane.xlu0 %1971 }
 0x9e9   :  { %v1978_v19 = vsub.f32 %v1962_v63, %v1972_v11 }
 0x9eb   :  { %v3006_v59 = vpop.eup %3005  ;;  %v1984_v15 = vmul.f32 1.442695, %v1978_v19 }
 0x9ec   :  { %v1991_v48 = vsel %vm1641_vm15, %v3006_v59, 0.0 }
 0x9ed   :  { %3007 = vpow2.f32 %v1984_v15  ;;  %1992 = vadd.xlane.f32.xlu0 %v1991_v48 }
 0x9f0   :  { %v1975_v18 = vpop.xlane.xlu1 %1974 }
 0x9f1   :  { %v1979_v20 = vsub.f32 %v1963_v6, %v1975_v18 }
 0x9f3   :  { %v3008_v31 = vpop.eup %3007  ;;  %v1986_v35 = vmul.f32 1.442695, %v1979_v20 }
 0x9f4   :  { %v1994_v36 = vsel %vm1641_vm15, %v3008_v31, 0.0 }
 0x9f5   :  { %3009 = vpow2.f32 %v1986_v35  ;;  %1995 = vadd.xlane.f32.xlu1 %v1994_v36 }
 0x9fb   :  { %v3010_v37 = vpop.eup %3009 }
 0x9fc   :  { %v1997_v8 = vsel %vm1641_vm15, %v3010_v37, 0.0 }
 0x9fd   :  { %1998 = vadd.xlane.f32.xlu2 %v1997_v8 }
 0xa58   :  { %v1990_v38 = vpop.xlane.xlu2 %1989 }
 0xa59   :  { %3011 = vrcp.f32 %v1990_v38 }
 0xa5f   :  { %v3012_v50 = vpop.eup %3011 }
 0xa60   :  { %v2004_v41 = vmul.f32 %v3012_v50, %v3004_v14  ;;  %v1993_v60 = vpop.xlane.xlu0 %1992 }
 0xa61   :  { %3013 = vrcp.f32 %v1993_v60 }
 0xa62   :  { %v2008_v3 = vmul.f32 %v2004_v41, %v3689_v23 }
 0xa64   :  { %2796 = vmatmul.msk.f32.vlgmr.msrb.gmra.mxu0 %vm1641_vm15, %v2008_v3  ;;  %v2030_v42 = vmul.f32 %v3857_v45, %v2008_v3  ;;  %v2012_v47 = vsel %vm1641_vm15, %v2008_v3, 0.0 }
 0xa66   :  { %v2034_v53 = vsel %vm1641_vm15, %v2030_v42, 0.0 }
 0xa67   :  { %v3014_v16 = vpop.eup %3013 }
 0xa68   :  { %v1996_v22 = vpop.xlane.xlu1 %1995  ;;  %v2005_v54 = vmul.f32 %v3014_v16, %v3006_v59 }
 0xa69   :  { %3015 = vrcp.f32 %v1996_v22 }
 0xa6a   :  { %v2009_v62 = vmul.f32 %v2005_v54, %v3672_v12 }
 0xa6c   :  { %v2013_v0 = vsel %vm1641_vm15, %v2009_v62, 0.0  ;;  %v2031_v61 = vmul.f32 %v3866_v1, %v2009_v62  ;;  %2797 = vmatmul.msk.f32.gmra.mxu0 %vm1641_vm15, %v2009_v62 }
 0xa6d   :  { %v2014_v33 = vadd.f32 %v2013_v0, %v2012_v47 }
 0xa6e   :  { %v2035_v29 = vsel %vm1641_vm15, %v2031_v61, 0.0 }
 0xa6f   :  { %v3016_v56 = vpop.eup %3015  ;;  %v3872_v24 = vadd.f32 %v2035_v29, %v2034_v53  ;;  %v2015_v27 = vrot.slane %v2014_v33, 4 }
 0xa70   :  { %v1999_v55 = vpop.xlane.xlu2 %1998  ;;  %v2006_v51 = vmul.f32 %v3016_v56, %v3008_v31 }
 0xa71   :  { %3017 = vrcp.f32 %v1999_v55  ;;  %v2016_v52 = vadd.f32 %v2015_v27, %v2014_v33 }
 0xa72   :  { %v2010_v44 = vmul.f32 %v2006_v51, %v3674_v32 }
 0xa73   :  { %v2017_v58 = vrot.slane %v2016_v52, 2 }
 0xa74   :  { %2798 = vmatmul.msk.f32.gmra.mxu0 %vm1641_vm15, %v2010_v44  ;;  %v2032_v17 = vmul.f32 %v3857_v45, %v2010_v44  ;;  %v2021_v10 = vsel %vm1641_vm15, %v2010_v44, 0.0 }
 0xa75   :  { %v2018_v28 = vadd.f32 %v2017_v58, %v2016_v52 }
 0xa76   :  { %v2043_v25 = vsel %vm1641_vm15, %v2032_v17, 0.0 }
 0xa77   :  { %v3018_v30 = vpop.eup %3017  ;;  %v2019_v14 = vrot.slane %v2018_v28, 1 }
 0xa78   :  { %v2007_v5 = vmul.f32 %v3018_v30, %v3010_v37 }
 0xa79   :  { %v2020_v11 = vadd.f32 %v2019_v14, %v2018_v28 }
 0xa7a   :  { %v2011_v63 = vmul.f32 %v2007_v5, %v3687_v2 }
 0xa7b   :  { %v2054_v15 = vadd.f32 1e-05, %v2020_v11 }
 0xa7c   :  { %v2022_v6 = vsel %vm1641_vm15, %v2011_v63, 0.0  ;;  %v2033_v34 = vmul.f32 %v3866_v1, %v2011_v63  ;;  %2799 = vmatmul.msk.f32.gmra.mxu0 %vm1641_vm15, %v2011_v63 }
 0xa7d   :  { %v2023_v13 = vadd.f32 %v2022_v6, %v2021_v10  ;;  %3019 = vrcp.f32 %v2054_v15 }
 0xa7e   :  { %v2044_v43 = vsel %vm1641_vm15, %v2033_v34, 0.0 }
 0xa7f   :  { %v2024_v9 = vrot.slane %v2023_v13, 4  ;;  %v3884_v39 = vadd.f32 %v2044_v43, %v2043_v25 }
 0xa81   :  { %v2025_v4 = vadd.f32 %v2024_v9, %v2023_v13 }
 0xa83   :  { %v2026_v7 = vrot.slane %v2025_v4, 2  ;;  %v3020_v20 = vpop.eup %3019 }
 0xa85   :  { %v2027_v19 = vadd.f32 %v2026_v7, %v2025_v4 }
 0xa87   :  { %v2028_v59 = vrot.slane %v2027_v19, 1 }
 0xa89   :  { %v2029_v48 = vadd.f32 %v2028_v59, %v2027_v19 }
 0xa8b   :  { %v2055_v18 = vadd.f32 1e-05, %v2029_v48 }
 0xa8d   :  { %3021 = vrcp.f32 %v2055_v18 }
 0xa93   :  { %v3022_v31 = vpop.eup %3021 }
 0xa94   :  { %v2060_v35 = vsel %vm387_vm2, %v3022_v31, %v3020_v20 }
 0xa95   :  { %2794 = vmatmul.msk.f32.vlgmr.msra.gmra.mxu2 %vm1641_vm15, %v2060_v35 }
 0xae1   :  { %v2115_v36 = vpop.f32.mrf.mxu0 }
 0xae2   :  { %v2127_v41 = vmul.f32 %v2115_v36, %v3769_v46 }
 0xae4   :  { %v2131_v22 = vsel %vm142_vm1, %v2127_v41, 0.0 }
 0xae9   :  { %v2118_v37 = vpop.f32.mrf.mxu0 }
 0xaea   :  { %v2128_v38 = vmul.f32 %v2118_v37, %v3752_v26 }
 0xaec   :  { %v2132_v3 = vsel %vm142_vm1, %v2128_v38, 0.0 }
 0xaed   :  { %v2133_v42 = vadd.f32 %v2132_v3, %v2131_v22 }
 0xaef   :  { %v2134_v0 = vrot.slane %v2133_v42, 4 }
 0xaf1   :  { %v2121_v8 = vpop.f32.mrf.mxu0  ;;  %v2135_v33 = vadd.f32 %v2134_v0, %v2133_v42 }
 0xaf2   :  { %v2129_v16 = vmul.f32 %v2121_v8, %v3776_v57 }
 0xaf3   :  { %v2136_v29 = vrot.slane %v2135_v33, 2 }
 0xaf4   :  { %v2140_v62 = vsel %vm142_vm1, %v2129_v16, 0.0 }
 0xaf5   :  { %v2137_v27 = vadd.f32 %v2136_v29, %v2135_v33 }
 0xaf7   :  { %v2138_v51 = vrot.slane %v2137_v27, 1 }
 0xaf9   :  { %v2124_v50 = vpop.f32.mrf.mxu0  ;;  %v2139_v52 = vadd.f32 %v2138_v51, %v2137_v27 }
 0xafa   :  { %v2130_v60 = vmul.f32 %v2124_v50, %v3761_v40 }
 0xafc   :  { %v2141_v54 = vsel %vm142_vm1, %v2130_v60, 0.0 }
 0xafd   :  { %v2142_v47 = vadd.f32 %v2141_v54, %v2140_v62 }
 0xaff   :  { %v2143_v61 = vrot.slane %v2142_v47, 4 }
 0xb01   :  { %v2144_v53 = vadd.f32 %v2143_v61, %v2142_v47 }
 0xb03   :  { %v2145_v56 = vrot.slane %v2144_v53, 2 }
 0xb05   :  { %v2146_v55 = vadd.f32 %v2145_v56, %v2144_v53 }
 0xb07   :  { %v2147_v44 = vrot.slane %v2146_v55, 1 }
 0xb09   :  { %v2148_v5 = vadd.f32 %v2147_v44, %v2146_v55 }
 0xb18   :  { %v2080_v30 = vpop.f32.mrf.mxu2 }
 0xb19   :  { %v2084_v58 = vrot.slane %v2080_v30, 1  ;;  %v2149_v17 = vmul.f32 %v2139_v52, %v2080_v30 }
 0xb1b   :  { %v2150_v63 = vmul.f32 %v2148_v5, %v2084_v58  ;;  %v2151_v28 = vperm.slane %v2149_v17, 0 }
 0xb1d   :  { %v2152_v10 = vperm.slane %v2150_v63, 0  ;;  %v2153_v6 = vsub.f32 %v3769_v46, %v2151_v28  ;;  %v2154_v34 = vsub.f32 %v3752_v26, %v2151_v28 }
 0xb1f   :  { %v2155_v13 = vsub.f32 %v3776_v57, %v2152_v10  ;;  %v2156_v25 = vsub.f32 %v3761_v40, %v2152_v10  ;;  %v3900_v43 = vmul.f32 %v2153_v6, %v2153_v6  ;;  %v3902_v9 = vmul.f32 %v2154_v34, %v2154_v34 }
 0xb21   :  { %v3904_v14 = vmul.f32 %v2155_v13, %v2155_v13  ;;  %v3906_v4 = vmul.f32 %v2156_v25, %v2156_v25  ;;  %v2161_v7 = vmul.f32 %v3900_v43, %v2115_v36  ;;  %v2162_v11 = vmul.f32 %v3902_v9, %v2118_v37 }
 0xb23   :  { %v2163_v19 = vmul.f32 %v3904_v14, %v2121_v8  ;;  %v2164_v59 = vmul.f32 %v3906_v4, %v2124_v50  ;;  %v2165_v15 = vsel %vm142_vm1, %v2161_v7, 0.0  ;;  %v2166_v48 = vsel %vm142_vm1, %v2162_v11, 0.0 }
 0xb24   :  { %v2167_v18 = vadd.f32 %v2166_v48, %v2165_v15 }
 0xb25   :  { %v2174_v20 = vsel %vm142_vm1, %v2163_v19, 0.0  ;;  %v2175_v31 = vsel %vm142_vm1, %v2164_v59, 0.0 }
 0xb26   :  { %v2168_v35 = vrot.slane %v2167_v18, 4  ;;  %v2176_v38 = vadd.f32 %v2175_v31, %v2174_v20 }
 0xb28   :  { %v2169_v41 = vadd.f32 %v2168_v35, %v2167_v18  ;;  %v2177_v60 = vrot.slane %v2176_v38, 4 }
 0xb2a   :  { %v2170_v36 = vrot.slane %v2169_v41, 2  ;;  %v2178_v3 = vadd.f32 %v2177_v60, %v2176_v38 }
 0xb2c   :  { %v2171_v37 = vadd.f32 %v2170_v36, %v2169_v41  ;;  %v2179_v16 = vrot.slane %v2178_v3, 2 }
 0xb2e   :  { %v2172_v8 = vrot.slane %v2171_v37, 1  ;;  %v2180_v22 = vadd.f32 %v2179_v16, %v2178_v3 }
 0xb30   :  { %v2173_v50 = vadd.f32 %v2172_v8, %v2171_v37  ;;  %v2181_v54 = vrot.slane %v2180_v22, 1  ;;  %v2037_v37 = vrot.slane %v3872_v24, 4 }
 0xb32   :  { %v2182_v42 = vadd.f32 %v2181_v54, %v2180_v22  ;;  %v2183_v62 = vmul.f32 %v2173_v50, %v2080_v30  ;;  %v2038_v16 = vadd.f32 %v2037_v37, %v3872_v24 }
 0xb34   :  { %v2184_v47 = vmul.f32 %v2182_v42, %v2084_v58  ;;  %v2185_v0 = vadd.f32 1e-05, %v2183_v62  ;;  %v2039_v8 = vrot.slane %v2038_v16, 2 }
 0xb36   :  { %v2186_v61 = vadd.f32 1e-05, %v2184_v47  ;;  %3023 = vrcp.f32 %v2185_v0  ;;  %v2198_v44 = vand.u32 2147483648, %v2185_v0  ;;  %v2196_v30 = vand.u32 2147483647, %v2185_v0 }
 0xb37   :  { %3025 = vlog2.f32 %v2185_v0  ;;  %vm2192_vm3 = vweird.f32 %v2185_v0  ;;  %v2040_v22 = vadd.f32 %v2039_v8, %v2038_v16 }
 0xb38   :  { %3027 = vrcp.f32 %v2186_v61  ;;  %v2199_v10 = vor.u32 1.1754944e-38, %v2198_v44  ;;  %vm2197_vm5 = vcmp.eq.f32.partialorder %v2196_v30, 8.507059e+37  ;;  %v2213_v48 = vand.u32 2147483648, %v2186_v61 }
 0xb39   :  { %3029 = vlog2.f32 %v2186_v61  ;;  %vm2207_vm7 = vweird.f32 %v2186_v61  ;;  %v2211_v20 = vand.u32 2147483647, %v2186_v61  ;;  %v2041_v50 = vrot.slane %v2040_v22, 1 }
 0xb3a   :  { %v2214_v35 = vor.u32 1.1754944e-38, %v2213_v48 }
 0xb3b   :  { %vm2212_vm9 = vcmp.eq.f32.partialorder %v2211_v20, 8.507059e+37  ;;  %v2042_v42 = vadd.f32 %v2041_v50, %v2040_v22 }
 0xb3c   :  { %v3024_v33 = vpop.eup %3023 }
 0xb3d   :  { %v3026_v53 = vpop.eup %3025  ;;  %v2188_v29 = vmul.f32 %v3024_v33, %v2185_v0  ;;  %vm2193_vm0 = vweird.f32 %v3024_v33 }
 0xb3e   :  { %v3028_v56 = vpop.eup %3027  ;;  %v2265_v52 = vmul.f32 0.6931472, %v3026_v53  ;;  %vm2194_vm4 = vmor %vm2192_vm3, %vm2193_vm0 }
 0xb3f   :  { %v3030_v27 = vpop.eup %3029  ;;  %v2189_v55 = vsub.f32 1.0, %v2188_v29  ;;  %v2203_v51 = vmul.f32 %v3028_v56, %v2186_v61  ;;  %vm2208_vm6 = vweird.f32 %v3028_v56 }
 0xb40   :  { %v2267_v5 = vmul.f32 0.6931472, %v3030_v27  ;;  %v2268_v6 = vmul.f32 0.5, %v2265_v52  ;;  %vm2209_vm8 = vmor %vm2207_vm7, %vm2208_vm6 }
 0xb41   :  { %v2190_v17 = vmul.f32 %v3024_v33, %v2189_v55  ;;  %v2204_v58 = vsub.f32 1.0, %v2203_v51 }
 0xb42   :  { %v2269_v63 = vmul.f32 0.5, %v2267_v5 }
 0xb43   :  { %v2191_v28 = vadd.f32 %v3024_v33, %v2190_v17  ;;  %v2205_v25 = vmul.f32 %v3028_v56, %v2204_v58 }
 0xb44   :  { %v2272_v34 = vrot.slane %v2269_v63, 7 }
 0xb45   :  { %v2195_v13 = vsel %vm2194_vm4, %v3024_v33, %v2191_v28  ;;  %v2206_v15 = vadd.f32 %v3028_v56, %v2205_v25 }
 0xb46   :  { %v2200_v7 = vsel %vm2197_vm5, %v2199_v10, %v2195_v13  ;;  %v2273_v11 = vsel %vm387_vm2, %v2272_v34, %v2268_v6 }
 0xb47   :  { %v2201_v19 = vmul.f32 0.5, %v2200_v7  ;;  %2804 = vmatmul.msk.f32.vlgmr.msrb.gmra.mxu3 %vm142_vm1, %v2273_v11  ;;  %v2210_v31 = vsel %vm2209_vm8, %v3028_v56, %v2206_v15 }
 0xb48   :  { %v2215_v38 = vsel %vm2212_vm9, %v2214_v35, %v2210_v31 }
 0xb49   :  { %v2217_v59 = vperm.slane %v2201_v19, 0  ;;  %v2216_v60 = vmul.f32 0.5, %v2215_v38 }
 0xb4b   :  { %v2219_v18 = vmul.f32 %v2217_v59, %v3900_v43  ;;  %v2220_v41 = vmul.f32 %v2217_v59, %v3902_v9  ;;  %v2218_v36 = vperm.slane %v2216_v60, 0  ;;  %v2046_v9 = vrot.slane %v3884_v39, 4 }
 0xb4d   :  { %2800 = vmatmul.msk.f32.vlgmr.msrb.gmra.mxu2 %vm142_vm1, %v2219_v18  ;;  %v2221_v3 = vmul.f32 %v2218_v36, %v3904_v14  ;;  %v2222_v43 = vmul.f32 %v2218_v36, %v3906_v4  ;;  %v2047_v54 = vadd.f32 %v2046_v9, %v3884_v39  ;;  %v2052_v14 = vsub.f32 %v2042_v42, %v3786_v49 }
 0xb4f   :  { %v2048_v62 = vrot.slane %v2047_v54, 2  ;;  %v2296_v0 = vsub.f32 0.0, %v2052_v14 }
 0xb51   :  { %v2049_v47 = vadd.f32 %v2048_v62, %v2047_v54  ;;  %v2304_v61 = vand.u32 2147483647, %v2296_v0  ;;  %v2298_v34 = vmax.f32 %v2296_v0, 0.0  ;;  %vm2300_vm11 = vcmp.ne.f32.partialorder %v2296_v0, %v2296_v0 }
 0xb53   :  { %v2050_v4 = vrot.slane %v2049_v47, 1  ;;  %v2306_v33 = vsub.f32 0.0, %v2304_v61 }
 0xb55   :  { %2801 = vmatmul.msk.f32.gmra.mxu2 %vm142_vm1, %v2220_v41  ;;  %v2051_v53 = vadd.f32 %v2050_v4, %v2049_v47  ;;  %v2308_v29 = vmul.f32 1.442695, %v2306_v33 }
 0xb57   :  { %v2053_v24 = vsub.f32 %v2051_v53, %v3841_v21  ;;  %3031 = vpow2.f32 %v2308_v29 }
 0xb59   :  { %v2297_v56 = vsub.f32 0.0, %v2053_v24 }
 0xb5b   :  { %v2305_v27 = vand.u32 2147483647, %v2297_v56  ;;  %v2299_v60 = vmax.f32 %v2297_v56, 0.0  ;;  %vm2301_vm13 = vcmp.ne.f32.partialorder %v2297_v56, %v2297_v56 }
 0xb5d   :  { %2802 = vmatmul.msk.f32.gmra.mxu2 %vm142_vm1, %v2221_v3  ;;  %v3032_v55 = vpop.eup %3031  ;;  %v2307_v51 = vsub.f32 0.0, %v2305_v27 }
 0xb5e   :  { %v2312_v44 = vadd.f32 1.0, %v3032_v55  ;;  %v2315_v52 = vmul.f32 -0.5, %v3032_v55  ;;  %v2318_v30 = vand.u32 2147483647, %v3032_v55 }
 0xb5f   :  { %v2310_v39 = vmul.f32 1.442695, %v2307_v51 }
 0xb60   :  { %3033 = vlog2.f32 %v2312_v44  ;;  %v2316_v17 = vadd.f32 1.0, %v2315_v52  ;;  %vm2319_vm10 = vcmp.lt.f32.partialorder %v2318_v30, 0.0004427343 }
 0xb61   :  { %3035 = vpow2.f32 %v2310_v39 }
 0xb62   :  { %v2317_v28 = vmul.f32 %v3032_v55, %v2316_v17 }
 0xb65   :  { %2803 = vmatmul.msk.f32.gmra.mxu2 %vm142_vm1, %v2222_v43 }
 0xb66   :  { %v3034_v5 = vpop.eup %3033 }
 0xb67   :  { %v3036_v58 = vpop.eup %3035  ;;  %v2314_v63 = vmul.f32 0.6931472, %v3034_v5 }
 0xb68   :  { %v2321_v10 = vadd.f32 1.0, %v3036_v58  ;;  %v2324_v25 = vmul.f32 -0.5, %v3036_v58  ;;  %v2327_v48 = vand.u32 2147483647, %v3036_v58 }
 0xb69   :  { %v2320_v6 = vsel %vm2319_vm10, %v2317_v28, %v2314_v63 }
 0xb6a   :  { %v2330_v13 = vadd.f32 %v2320_v6, %v2298_v34  ;;  %3037 = vlog2.f32 %v2321_v10  ;;  %v2325_v59 = vadd.f32 1.0, %v2324_v25  ;;  %vm2328_vm12 = vcmp.lt.f32.partialorder %v2327_v48, 0.0004427343 }
 0xb6c   :  { %v2332_v7 = vsel %vm2300_vm11, %v2296_v0, %v2330_v13  ;;  %v2326_v31 = vmul.f32 %v3036_v58, %v2325_v59 }
 0xb6d   :  { %v2334_v19 = vsub.f32 0.0, %v2332_v7 }
 0xb70   :  { %v3038_v11 = vpop.eup %3037 }
 0xb71   :  { %v2323_v20 = vmul.f32 0.6931472, %v3038_v11 }
 0xb73   :  { %v2329_v38 = vsel %vm2328_vm12, %v2326_v31, %v2323_v20 }
 0xb74   :  { %v2331_v3 = vadd.f32 %v2329_v38, %v2299_v60 }
 0xb76   :  { %v2333_v37 = vsel %vm2301_vm13, %v2297_v56, %v2331_v3 }
 0xb77   :  { %v2335_v9 = vsub.f32 0.0, %v2333_v37 }
 0xbca   :  { %v2293_v15 = vpop.f32.mrf.mxu3 }
 0xbcb   :  { %v2340_v18 = vsub.f32 %v2334_v19, %v2293_v15  ;;  %v2337_v16 = vrot.slane %v2293_v15, 1 }
 0xbcd   :  { %v2342_v35 = vperm.slane %v2340_v18, 0  ;;  %v2341_v54 = vsub.f32 %v2335_v9, %v2337_v16 }
 0xbcf   :  { %v2343_v42 = vperm.slane %v2341_v54, 0 }
 0xbd0   :  { %v2252_v41 = vpop.f32.mrf.mxu2 }
 0xbd1   :  { %v2344_v36 = vsub.f32 %v2342_v35, %v2252_v41 }
 0xbd3   :  { %v2348_v43 = vsel %vm1641_vm15, %v2344_v36, -inf }
 0xbd4   :  { %2349 = vmax.xlane.f32.xlu0 %v2348_v43 }
 0xbd8   :  { %v2255_v8 = vpop.f32.mrf.mxu2 }
 0xbd9   :  { %v2345_v22 = vsub.f32 %v2342_v35, %v2255_v8 }
 0xbdb   :  { %v2351_v50 = vsel %vm1641_vm15, %v2345_v22, -inf }
 0xbdc   :  { %2352 = vmax.xlane.f32.xlu1 %v2351_v50 }
 0xbe0   :  { %v2258_v62 = vpop.f32.mrf.mxu2 }
 0xbe1   :  { %v2346_v14 = vsub.f32 %v2343_v42, %v2258_v62 }
 0xbe3   :  { %v2354_v47 = vsel %vm1641_vm15, %v2346_v14, -inf }
 0xbe4   :  { %2355 = vmax.xlane.f32.xlu2 %v2354_v47 }
 0xbe8   :  { %v2261_v0 = vpop.f32.mrf.mxu2 }
 0xbe9   :  { %v2347_v4 = vsub.f32 %v2343_v42, %v2261_v0 }
 0xbeb   :  { %v2357_v61 = vsel %vm1641_vm15, %v2347_v4, -inf }
 0xbec   :  { %2358 = vmax.xlane.f32.xlu0 %v2357_v61 }
 0xc47   :  { %v2350_v33 = vpop.xlane.xlu0 %2349 }
 0xc48   :  { %v2360_v53 = vsub.f32 %v2344_v36, %v2350_v33 }
 0xc4a   :  { %v2364_v29 = vmul.f32 1.442695, %v2360_v53 }
 0xc4c   :  { %3039 = vpow2.f32 %v2364_v29 }
 0xc4f   :  { %v2353_v24 = vpop.xlane.xlu1 %2352 }
 0xc50   :  { %v2361_v56 = vsub.f32 %v2345_v22, %v2353_v24 }
 0xc52   :  { %v3040_v27 = vpop.eup %3039  ;;  %v2366_v55 = vmul.f32 1.442695, %v2361_v56 }
 0xc53   :  { %v2372_v51 = vsel %vm1641_vm15, %v3040_v27, 0.0 }
 0xc54   :  { %3041 = vpow2.f32 %v2366_v55  ;;  %2373 = vadd.xlane.f32.xlu1 %v2372_v51 }
 0xc57   :  { %v2356_v44 = vpop.xlane.xlu2 %2355 }
 0xc58   :  { %v2362_v39 = vsub.f32 %v2346_v14, %v2356_v44 }
 0xc5a   :  { %v3042_v52 = vpop.eup %3041  ;;  %v2368_v5 = vmul.f32 1.442695, %v2362_v39 }
 0xc5b   :  { %v2375_v17 = vsel %vm1641_vm15, %v3042_v52, 0.0 }
 0xc5c   :  { %3043 = vpow2.f32 %v2368_v5  ;;  %2376 = vadd.xlane.f32.xlu2 %v2375_v17 }
 0xc5f   :  { %v2359_v30 = vpop.xlane.xlu0 %2358 }
 0xc60   :  { %v2363_v58 = vsub.f32 %v2347_v4, %v2359_v30 }
 0xc62   :  { %v3044_v63 = vpop.eup %3043  ;;  %v2370_v28 = vmul.f32 1.442695, %v2363_v58 }
 0xc63   :  { %v2378_v10 = vsel %vm1641_vm15, %v3044_v63, 0.0 }
 0xc64   :  { %3045 = vpow2.f32 %v2370_v28  ;;  %2379 = vadd.xlane.f32.xlu0 %v2378_v10 }
 0xc6a   :  { %v3046_v6 = vpop.eup %3045 }
 0xc6b   :  { %v2381_v34 = vsel %vm1641_vm15, %v3046_v6, 0.0 }
 0xc6c   :  { %2382 = vadd.xlane.f32.xlu1 %v2381_v34 }
 0xcc7   :  { %v2374_v13 = vpop.xlane.xlu1 %2373 }
 0xcc8   :  { %3047 = vrcp.f32 %v2374_v13 }
 0xcce   :  { %v3048_v25 = vpop.eup %3047 }
 0xccf   :  { %v2388_v7 = vmul.f32 %v3048_v25, %v3040_v27  ;;  %v2377_v11 = vpop.xlane.xlu2 %2376 }
 0xcd0   :  { %3049 = vrcp.f32 %v2377_v11 }
 0xcd1   :  { %v2392_v19 = vmul.f32 %v2388_v7, %v3689_v23 }
 0xcd3   :  { %2808 = vmatmul.msk.f32.vlgmr.msra.gmra.mxu3 %vm1641_vm15, %v2392_v19  ;;  %v2414_v18 = vmul.f32 %v3857_v45, %v2392_v19  ;;  %v2396_v31 = vsel %vm1641_vm15, %v2392_v19, 0.0 }
 0xcd5   :  { %v2418_v23 = vsel %vm1641_vm15, %v2414_v18, 0.0 }
 0xcd6   :  { %v3050_v59 = vpop.eup %3049 }
 0xcd7   :  { %v2380_v15 = vpop.xlane.xlu0 %2379  ;;  %v2389_v48 = vmul.f32 %v3050_v59, %v3042_v52 }
 0xcd8   :  { %3051 = vrcp.f32 %v2380_v15 }
 0xcd9   :  { %v2393_v20 = vmul.f32 %v2389_v48, %v3672_v12 }
 0xcdb   :  { %v2397_v35 = vsel %vm1641_vm15, %v2393_v20, 0.0  ;;  %v2415_v38 = vmul.f32 %v3866_v1, %v2393_v20  ;;  %2809 = vmatmul.msk.f32.gmra.mxu3 %vm1641_vm15, %v2393_v20 }
 0xcdc   :  { %v2398_v41 = vadd.f32 %v2397_v35, %v2396_v31 }
 0xcdd   :  { %v2419_v60 = vsel %vm1641_vm15, %v2415_v38, 0.0 }
 0xcde   :  { %v3052_v36 = vpop.eup %3051  ;;  %v2420_v3 = vadd.f32 %v2419_v60, %v2418_v23  ;;  %v2399_v43 = vrot.slane %v2398_v41, 4 }
 0xcdf   :  { %v2383_v37 = vpop.xlane.xlu1 %2382  ;;  %v2390_v16 = vmul.f32 %v3052_v36, %v3044_v63 }
 0xce0   :  { %3053 = vrcp.f32 %v2383_v37  ;;  %v2400_v8 = vadd.f32 %v2399_v43, %v2398_v41  ;;  %v2421_v9 = vrot.slane %v2420_v3, 4 }
 0xce1   :  { %v2394_v12 = vmul.f32 %v2390_v16, %v3674_v32 }
 0xce2   :  { %v2401_v50 = vrot.slane %v2400_v8, 2  ;;  %v2422_v14 = vadd.f32 %v2421_v9, %v2420_v3 }
 0xce3   :  { %2810 = vmatmul.msk.f32.gmra.mxu3 %vm1641_vm15, %v2394_v12  ;;  %v2416_v42 = vmul.f32 %v3857_v45, %v2394_v12  ;;  %v2405_v0 = vsel %vm1641_vm15, %v2394_v12, 0.0 }
 0xce4   :  { %v2402_v47 = vadd.f32 %v2401_v50, %v2400_v8  ;;  %v2423_v45 = vrot.slane %v2422_v14, 2 }
 0xce5   :  { %v2427_v33 = vsel %vm1641_vm15, %v2416_v42, 0.0 }
 0xce6   :  { %v3054_v22 = vpop.eup %3053  ;;  %v2403_v56 = vrot.slane %v2402_v47, 1  ;;  %v2424_v44 = vadd.f32 %v2423_v45, %v2422_v14 }
 0xce7   :  { %v2391_v54 = vmul.f32 %v3054_v22, %v3046_v6 }
 0xce8   :  { %v2404_v39 = vadd.f32 %v2403_v56, %v2402_v47  ;;  %v2425_v17 = vrot.slane %v2424_v44, 1 }
 0xce9   :  { %v2395_v62 = vmul.f32 %v2391_v54, %v3687_v2 }
 0xcea   :  { %v2438_v58 = vadd.f32 1e-05, %v2404_v39  ;;  %v2426_v6 = vadd.f32 %v2425_v17, %v2424_v44 }
 0xceb   :  { %v2406_v4 = vsel %vm1641_vm15, %v2395_v62, 0.0  ;;  %v2417_v61 = vmul.f32 %v3866_v1, %v2395_v62  ;;  %2811 = vmatmul.msk.f32.gmra.mxu3 %vm1641_vm15, %v2395_v62 }
 0xcec   :  { %v2407_v32 = vadd.f32 %v2406_v4, %v2405_v0  ;;  %3055 = vrcp.f32 %v2438_v58  ;;  %v2436_v25 = vsub.f32 %v2426_v6, %v3786_v49 }
 0xced   :  { %v2428_v53 = vsel %vm1641_vm15, %v2417_v61, 0.0 }
 0xcee   :  { %v2408_v29 = vrot.slane %v2407_v32, 4  ;;  %v2429_v24 = vadd.f32 %v2428_v53, %v2427_v33 }
 0xcf0   :  { %v2409_v2 = vadd.f32 %v2408_v29, %v2407_v32  ;;  %v2430_v27 = vrot.slane %v2429_v24, 4 }
 0xcf2   :  { %v2410_v55 = vrot.slane %v2409_v2, 2  ;;  %v2431_v51 = vadd.f32 %v2430_v27, %v2429_v24  ;;  %v3056_v19 = vpop.eup %3055 }
 0xcf4   :  { %v2411_v52 = vadd.f32 %v2410_v55, %v2409_v2  ;;  %v2432_v5 = vrot.slane %v2431_v51, 2 }
 0xcf6   :  { %v2412_v1 = vrot.slane %v2411_v52, 1  ;;  %v2433_v30 = vadd.f32 %v2432_v5, %v2431_v51 }
 0xcf8   :  { %v2413_v63 = vadd.f32 %v2412_v1, %v2411_v52  ;;  %v2434_v28 = vrot.slane %v2433_v30, 1 }
 0xcfa   :  { %v2439_v10 = vadd.f32 1e-05, %v2413_v63  ;;  %v2435_v34 = vadd.f32 %v2434_v28, %v2433_v30 }
 0xcfc   :  { %3057 = vrcp.f32 %v2439_v10  ;;  %v2437_v13 = vsub.f32 %v2435_v34, %v3841_v21 }
 0xcfe   :  { %v2573_v7 = vrot.slane %v2437_v13, 7 }
 0xd00   :  { %v3963_v11 = vsel %vm387_vm2, %v2573_v7, %v2436_v25 }
 0xd02   :  { %v3058_v59 = vpop.eup %3057 }
 0xd03   :  { %v2444_v15 = vsel %vm387_vm2, %v3058_v59, %v3056_v19 }
 0xd04   :  { %2806 = vmatmul.msk.f32.vlgmr.msra.gmra.mxu1 %vm1641_vm15, %v2444_v15 }
 0xd56   :  { %v2499_v48 = vpop.f32.mrf.mxu3 }
 0xd57   :  { %v2511_v31 = vmul.f32 %v2499_v48, %v3769_v46 }
 0xd59   :  { %v2515_v49 = vsel %vm142_vm1, %v2511_v31, 0.0 }
 0xd5e   :  { %v2502_v18 = vpop.f32.mrf.mxu3 }
 0xd5f   :  { %v2512_v20 = vmul.f32 %v2502_v18, %v3752_v26 }
 0xd61   :  { %v2516_v21 = vsel %vm142_vm1, %v2512_v20, 0.0 }
 0xd62   :  { %v2517_v38 = vadd.f32 %v2516_v21, %v2515_v49 }
 0xd64   :  { %v2518_v41 = vrot.slane %v2517_v38, 4 }
 0xd66   :  { %v2505_v35 = vpop.f32.mrf.mxu3  ;;  %v2519_v3 = vadd.f32 %v2518_v41, %v2517_v38 }
 0xd67   :  { %v2513_v23 = vmul.f32 %v2505_v35, %v3776_v57 }
 0xd68   :  { %v2520_v8 = vrot.slane %v2519_v3, 2 }
 0xd69   :  { %v2524_v43 = vsel %vm142_vm1, %v2513_v23, 0.0 }
 0xd6a   :  { %v2521_v50 = vadd.f32 %v2520_v8, %v2519_v3 }
 0xd6c   :  { %v2522_v42 = vrot.slane %v2521_v50, 1 }
 0xd6e   :  { %v2508_v60 = vpop.f32.mrf.mxu3  ;;  %v2523_v14 = vadd.f32 %v2522_v42, %v2521_v50 }
 0xd6f   :  { %v2514_v36 = vmul.f32 %v2508_v60, %v3761_v40 }
 0xd71   :  { %v2525_v37 = vsel %vm142_vm1, %v2514_v36, 0.0 }
 0xd72   :  { %v2526_v16 = vadd.f32 %v2525_v37, %v2524_v43 }
 0xd74   :  { %v2527_v12 = vrot.slane %v2526_v16, 4 }
 0xd76   :  { %v2528_v22 = vadd.f32 %v2527_v12, %v2526_v16 }
 0xd78   :  { %v2529_v9 = vrot.slane %v2528_v22, 2 }
 0xd7a   :  { %v2530_v54 = vadd.f32 %v2529_v9, %v2528_v22 }
 0xd7c   :  { %v2531_v62 = vrot.slane %v2530_v54, 1 }
 0xd7e   :  { %v2532_v4 = vadd.f32 %v2531_v62, %v2530_v54 }
 0xd81   :  { %v2464_v47 = vpop.f32.mrf.mxu1 }
 0xd82   :  { %v2468_v0 = vrot.slane %v2464_v47, 1  ;;  %v2533_v61 = vmul.f32 %v2523_v14, %v2464_v47 }
 0xd84   :  { %v2534_v32 = vmul.f32 %v2532_v4, %v2468_v0  ;;  %v2535_v33 = vperm.slane %v2533_v61, 0 }
 0xd86   :  { %v2536_v53 = vperm.slane %v2534_v32, 0  ;;  %v2537_v29 = vsub.f32 %v3769_v46, %v2535_v33  ;;  %v2538_v24 = vsub.f32 %v3752_v26, %v2535_v33  ;;  %v2578_v45 = vrot.slane %v2534_v32, 7 }
 0xd88   :  { %v2539_v56 = vsub.f32 %v3776_v57, %v2536_v53  ;;  %v2540_v2 = vsub.f32 %v3761_v40, %v2536_v53  ;;  %v2541_v27 = vmul.f32 %v2537_v29, %v2537_v29  ;;  %v2542_v55 = vmul.f32 %v2538_v24, %v2538_v24 }
 0xd89   :  { %v2579_v51 = vsel %vm387_vm2, %v2578_v45, %v2533_v61 }
 0xd8a   :  { %v2543_v44 = vmul.f32 %v2539_v56, %v2539_v56  ;;  %v2544_v39 = vmul.f32 %v2540_v2, %v2540_v2  ;;  %v2545_v52 = vmul.f32 %v2541_v27, %v2499_v48  ;;  %v2546_v5 = vmul.f32 %v2542_v55, %v2502_v18  ;;  %2580 = vrot.lane.b32.xlu2 %v2579_v51, %s3123_s12 }
 0xd8c   :  { %v2547_v1 = vmul.f32 %v2543_v44, %v2505_v35  ;;  %v2548_v17 = vmul.f32 %v2544_v39, %v2508_v60  ;;  %v2549_v46 = vsel %vm142_vm1, %v2545_v52, 0.0  ;;  %v2550_v26 = vsel %vm142_vm1, %v2546_v5, 0.0 }
 0xd8d   :  { %v2551_v30 = vadd.f32 %v2550_v26, %v2549_v46 }
 0xd8e   :  { %v2558_v57 = vsel %vm142_vm1, %v2547_v1, 0.0  ;;  %v2559_v40 = vsel %vm142_vm1, %v2548_v17, 0.0  ;;  %vm2591_vm1 = vcmask 293888  }
 0xd8f   :  { %v2552_v58 = vrot.slane %v2551_v30, 4  ;;  %v2560_v63 = vadd.f32 %v2559_v40, %v2558_v57 }
 0xd91   :  { %v2553_v28 = vadd.f32 %v2552_v58, %v2551_v30  ;;  %v2561_v10 = vrot.slane %v2560_v63, 4 }
 0xd93   :  { %v2554_v6 = vrot.slane %v2553_v28, 2  ;;  %v2562_v34 = vadd.f32 %v2561_v10, %v2560_v63 }
 0xd95   :  { %v2555_v13 = vadd.f32 %v2554_v6, %v2553_v28  ;;  %v2563_v25 = vrot.slane %v2562_v34, 2 }
 0xd97   :  { %v2556_v7 = vrot.slane %v2555_v13, 1  ;;  %v2564_v19 = vadd.f32 %v2563_v25, %v2562_v34 }
 0xd99   :  { %v2557_v59 = vadd.f32 %v2556_v7, %v2555_v13  ;;  %v2565_v15 = vrot.slane %v2564_v19, 1 }
 0xd9b   :  { %v2566_v48 = vadd.f32 %v2565_v15, %v2564_v19  ;;  %v2567_v18 = vmul.f32 %v2557_v59, %v2464_v47 }
 0xd9d   :  { %v2568_v20 = vmul.f32 %v2566_v48, %v2468_v0  ;;  %v2569_v21 = vadd.f32 1e-05, %v2567_v18 }
 0xd9f   :  { %v2570_v31 = vadd.f32 1e-05, %v2568_v20 }
 0xda1   :  { %v2585_v35 = vrot.slane %v2570_v31, 7 }
 0xda3   :  { %v2586_v49 = vsel %vm387_vm2, %v2585_v35, %v2569_v21 }
 0xda4   :  { %2587 = vrot.lane.b32.xlu0 %v2586_v49, %s3124_s17 }
 0xde4   :  { %v2581_v38 = vpop.permute.xlu2 %2580 }
 0xde5   :  { %v2590_v41 = vsel %vm1641_vm15, %v3963_v11, %v2581_v38 }
 0xe16   :  { %v2588_v23 = vpop.permute.xlu0 %2587 }
 0xe17   :  { %v2592_v60 = vsel %vm2591_vm1, %v2590_v41, %v2588_v23 }
 0xe18   :  { %v2594_v36 = vsel %vm2593_vm14, %v2592_v60, 0.0 }
 0xe19   :  { %2595 = vst [vmem:[#allocation5] sm:$0x3] %v2594_v36 }
 0xe1a   :  { %2606 = dma.vmem_to_hbm [thread:$0]  %s2602_s1, 32, %s2604_s7, [#allocation4]  }
 0xe1b   :  { %3111 = dma.done.wait [#allocation4], 32  }
 0xe1c   :  { %3112 = vsyncadd [#allocation4], 4294967264 }
 0xe1d   :  { %2611 = vsyncpa [#allocation3], 1 }
 0xe1e   :  { %2612 = vsyncpa [#allocation4], 1 }

</bundles_post_ra>
